<compile_context>
chip_gen: v7x
topology: tpu7x:2x2x1
jax: 0.10.0
libtpu: 0.0.40
codegen_flags: <defaults>
</compile_context>

<pallas_src>
import functools

import jax
import jax.numpy as jnp
from jax import lax
from jax.experimental import pallas as pl
from jax.experimental.pallas import tpu as pltpu


# ----------------------------------------------------------------------------
# Fused Pallas kernel: stem conv + BottleneckBlock + global average pool
# ----------------------------------------------------------------------------
def _fused_resnet_kernel(p_ref, sw_ref, ss_ref, sb_ref,
                         w1_ref, s1_ref, b1_ref,
                         w2_ref, s2_ref, b2_ref,
                         w3_ref, s3_ref, b3_ref,
                         out_ref, *, H, W):
    HW = H * W
    C = w1_ref.shape[0]        # block in/out channels
    Cb = w1_ref.shape[1]       # bottleneck channels

    # ---- stem: single K=27 bf16 matmul over im2col patches + BN + ReLU ----
    stem = jnp.dot(p_ref[0], sw_ref[...],
                   preferred_element_type=jnp.float32)              # (HW, C)
    x = jnp.maximum(stem * ss_ref[...] + sb_ref[...], 0.0)          # f32 residual

    # ---- bottleneck conv1 (1x1) + BN + ReLU (bf16 MXU, f32 accumulate) ----
    t1 = jnp.dot(x.astype(jnp.bfloat16), w1_ref[...],
                 preferred_element_type=jnp.float32)
    t1 = jnp.maximum(t1 * s1_ref[...] + b1_ref[...], 0.0)

    # ---- bottleneck conv2 (3x3, stride 1, pad 1) ----
    # Cast to the MXU operand dtype ONCE, zero-pad the (H, W) map in VMEM,
    # take 9 static tap slices and concatenate them along lanes (all pieces
    # are 128-lane aligned) -> ONE wide-K matmul with K = 9*Cb.
    t1b = t1.astype(jnp.bfloat16).reshape(H, W, Cb)
    zc = jnp.zeros((H, 1, Cb), jnp.bfloat16)
    zr = jnp.zeros((1, W + 2, Cb), jnp.bfloat16)
    padded = jnp.concatenate([zc, t1b, zc], axis=1)                  # (H, W+2, Cb)
    padded = jnp.concatenate([zr, padded, zr], axis=0)               # (H+2, W+2, Cb)
    taps = jnp.concatenate(
        [padded[di:di + H, dj:dj + W, :] for di in range(3) for dj in range(3)],
        axis=-1).reshape(HW, 9 * Cb)                                 # (HW, 9*Cb) bf16
    t2 = jnp.dot(taps, w2_ref[...], preferred_element_type=jnp.float32)
    t2 = jnp.maximum(t2 * s2_ref[...] + b2_ref[...], 0.0)

    # ---- bottleneck conv3 (1x1) + BN + identity shortcut + ReLU ----
    t3 = jnp.dot(t2.astype(jnp.bfloat16), w3_ref[...],
                 preferred_element_type=jnp.float32)
    y = jnp.maximum(t3 * s3_ref[...] + b3_ref[...] + x, 0.0)         # (HW, C)

    # ---- fused global average pool: pooled vector is the only HBM output ----
    out_ref[...] = (jnp.sum(y, axis=0, keepdims=True) * (1.0 / HW)).reshape(1, 1, C)


# ----------------------------------------------------------------------------
# Wrapper: preprocess + im2col for the 3-channel stem, one fused pallas_call
# ----------------------------------------------------------------------------
def resnet_forward(x_nchw, params):
    # preprocess_image: NCHW -> NHWC (channels -> lanes), (x - mean) * inv_std.
    x = jnp.transpose(x_nchw, (0, 2, 3, 1)).astype(jnp.float32)
    N, H, W, Cin = x.shape
    xn = (x - params["pixel_mean"]) * params["pixel_inv_std"]

    # Tiny im2col for the stem (Cin=3): (N, H*W, 27) bf16, built by XLA so the
    # in-kernel stem is a single dense K=27 MXU matmul.
    xp = jnp.pad(xn, ((0, 0), (1, 1), (1, 1), (0, 0)))
    patches = jnp.concatenate(
        [xp[:, di:di + H, dj:dj + W, :] for di in range(3) for dj in range(3)],
        axis=-1).reshape(N, H * W, 9 * Cin).astype(jnp.bfloat16)

    sw = params["stem_w"].reshape(9 * Cin, -1).astype(jnp.bfloat16)   # (27, C)
    C = sw.shape[-1]
    blk = params["block"]
    Cb = blk["w1"].shape[-1]
    w1 = blk["w1"].astype(jnp.bfloat16)                               # (C, Cb)
    w2 = blk["w2"].reshape(9 * Cb, Cb).astype(jnp.bfloat16)           # (9*Cb, Cb)
    w3 = blk["w3"].astype(jnp.bfloat16)                               # (Cb, C)

    kern = functools.partial(_fused_resnet_kernel, H=H, W=W)
    pooled = pl.pallas_call(
        kern,
        grid=(N,),
        in_specs=[
            pl.BlockSpec((1, H * W, 9 * Cin), lambda n: (n, 0, 0)),
            pl.BlockSpec((9 * Cin, C), lambda n: (0, 0)),
            pl.BlockSpec((1, C), lambda n: (0, 0)),
            pl.BlockSpec((1, C), lambda n: (0, 0)),
            pl.BlockSpec((C, Cb), lambda n: (0, 0)),
            pl.BlockSpec((1, Cb), lambda n: (0, 0)),
            pl.BlockSpec((1, Cb), lambda n: (0, 0)),
            pl.BlockSpec((9 * Cb, Cb), lambda n: (0, 0)),
            pl.BlockSpec((1, Cb), lambda n: (0, 0)),
            pl.BlockSpec((1, Cb), lambda n: (0, 0)),
            pl.BlockSpec((Cb, C), lambda n: (0, 0)),
            pl.BlockSpec((1, C), lambda n: (0, 0)),
            pl.BlockSpec((1, C), lambda n: (0, 0)),
        ],
        out_specs=pl.BlockSpec((1, 1, C), lambda n: (n, 0, 0)),
        out_shape=jax.ShapeDtypeStruct((N, 1, C), jnp.float32),
        compiler_params=pltpu.CompilerParams(
            dimension_semantics=("parallel",)),
    )(patches, sw, params["stem_s"], params["stem_b"],
      w1, blk["s1"], blk["b1"], w2, blk["s2"], blk["b2"],
      w3, blk["s3"], blk["b3"])
    # features = cat([features[f]]) (single map: no-op), avgpool, flatten(1)
    return pooled[:, 0, :]


# ----------------------------------------------------------------------------
# Pure-JAX reference (lax.conv) at matching precision, for self-checking
# ----------------------------------------------------------------------------
def _reference_forward(x_nchw, params):
    x = jnp.transpose(x_nchw, (0, 2, 3, 1)).astype(jnp.float32)
    xn = (x - params["pixel_mean"]) * params["pixel_inv_std"]

    def conv3x3(v, w):
        return lax.conv_general_dilated(
            v.astype(jnp.bfloat16), w.astype(jnp.bfloat16),
            window_strides=(1, 1), padding="SAME",
            dimension_numbers=("NHWC", "HWIO", "NHWC"),
            preferred_element_type=jnp.float32)

    def conv1x1(v, w):
        n, h, ww, ci = v.shape
        out = jnp.dot(v.reshape(-1, ci).astype(jnp.bfloat16),
                      w.astype(jnp.bfloat16),
                      preferred_element_type=jnp.float32)
        return out.reshape(n, h, ww, -1)

    def bn(v, s, b):
        return v * s.reshape(1, 1, 1, -1) + b.reshape(1, 1, 1, -1)

    blk = params["block"]
    f = jnp.maximum(bn(conv3x3(xn, params["stem_w"]),
                       params["stem_s"], params["stem_b"]), 0.0)
    t = jnp.maximum(bn(conv1x1(f, blk["w1"]), blk["s1"], blk["b1"]), 0.0)
    t = jnp.maximum(bn(conv3x3(t, blk["w2"]), blk["s2"], blk["b2"]), 0.0)
    t = jnp.maximum(bn(conv1x1(t, blk["w3"]), blk["s3"], blk["b3"]) + f, 0.0)
    return jnp.mean(t, axis=(1, 2))


# ----------------------------------------------------------------------------
# Parameters (FrozenBN folded to affine scale/bias)
# ----------------------------------------------------------------------------
def init_params(key, cin=3, c=128, bottleneck=128):
    ks = jax.random.split(key, 8)

    def w(k, shape):
        return (0.05 * jax.random.normal(k, shape)).astype(jnp.float32)

    def bn(k, cout):
        k1, k2 = jax.random.split(k)
        scale = (1.0 + 0.1 * jax.random.normal(k1, (1, cout))).astype(jnp.float32)
        bias = (0.1 * jax.random.normal(k2, (1, cout))).astype(jnp.float32)
        return scale, bias

    stem_s, stem_b = bn(ks[1], c)
    s1, b1 = bn(ks[3], bottleneck)
    s2, b2 = bn(ks[5], bottleneck)
    s3, b3 = bn(ks[7], c)
    return {
        # detectron2 default pixel stats (BGR), viewed as (3,1,1) in reference
        "pixel_mean": jnp.array([103.53, 116.28, 123.675], jnp.float32),
        "pixel_inv_std": jnp.array([1.0, 1.0, 1.0], jnp.float32),
        "stem_w": w(ks[0], (3, 3, cin, c)),          # (kh, kw, cin, cout)
        "stem_s": stem_s, "stem_b": stem_b,
        "block": {
            "w1": w(ks[2], (c, bottleneck)), "s1": s1, "b1": b1,
            "w2": w(ks[4], (3, 3, bottleneck, bottleneck)), "s2": s2, "b2": b2,
            "w3": w(ks[6], (bottleneck, c)), "s3": s3, "b3": b3,
        },
    }


if __name__ == "__main__":
    key = jax.random.PRNGKey(0)
    k_img, k_par = jax.random.split(key)
    # batched image tensor, NCHW like the PyTorch reference
    x = jax.random.uniform(k_img, (2, 3, 16, 16), jnp.float32,
                           minval=0.0, maxval=255.0)
    params = init_params(k_par)

    out = jax.jit(resnet_forward)(x, params)
    out = jax.block_until_ready(out)

    assert out.shape == (2, 128) and out.dtype == jnp.float32
    assert bool(jnp.all(jnp.isfinite(out)))

    # Correctness self-check vs. lax.conv reference at matching precision
    # (catches any receptive-field / padding / residual mistakes).
    ref = jax.block_until_ready(jax.jit(_reference_forward)(x, params))
    assert bool(jnp.allclose(out, ref, rtol=3e-2, atol=3e-2)), (
        "Pallas output mismatches lax.conv reference")

    print("KERNEL_OK")
</pallas_src>

<mosaic_0001>
module attributes {stable_mosaic.version = 11 : i64} {
  func.func @_fused_resnet_kernel(%arg0: i32, %arg1: memref<1x256x27xbf16, #tpu.memory_space<vmem>>, %arg2: memref<27x128xbf16, #tpu.memory_space<vmem>>, %arg3: memref<1x128xf32, #tpu.memory_space<vmem>>, %arg4: memref<1x128xf32, #tpu.memory_space<vmem>>, %arg5: memref<128x128xbf16, #tpu.memory_space<vmem>>, %arg6: memref<1x128xf32, #tpu.memory_space<vmem>>, %arg7: memref<1x128xf32, #tpu.memory_space<vmem>>, %arg8: memref<1152x128xbf16, #tpu.memory_space<vmem>>, %arg9: memref<1x128xf32, #tpu.memory_space<vmem>>, %arg10: memref<1x128xf32, #tpu.memory_space<vmem>>, %arg11: memref<128x128xbf16, #tpu.memory_space<vmem>>, %arg12: memref<1x128xf32, #tpu.memory_space<vmem>>, %arg13: memref<1x128xf32, #tpu.memory_space<vmem>>, %arg14: memref<1x1x128xf32, #tpu.memory_space<vmem>>) attributes {dimension_semantics = [#tpu.dimension_semantics<parallel>], iteration_bounds = array<i64: 2>, scalar_prefetch = 0 : i64, scratch_operands = 0 : i64, tpu.core_type = #tpu.core_type<tc>, window_params = [{transform_indices = @transform_0, window_bounds = array<i64: 1, 256, 27>}, {pipeline_mode = #tpu.pipeline_mode<synchronous>, transform_indices = @transform_1, window_bounds = array<i64: 27, 128>}, {pipeline_mode = #tpu.pipeline_mode<synchronous>, transform_indices = @transform_2, window_bounds = array<i64: 1, 128>}, {pipeline_mode = #tpu.pipeline_mode<synchronous>, transform_indices = @transform_3, window_bounds = array<i64: 1, 128>}, {pipeline_mode = #tpu.pipeline_mode<synchronous>, transform_indices = @transform_4, window_bounds = array<i64: 128, 128>}, {pipeline_mode = #tpu.pipeline_mode<synchronous>, transform_indices = @transform_5, window_bounds = array<i64: 1, 128>}, {pipeline_mode = #tpu.pipeline_mode<synchronous>, transform_indices = @transform_6, window_bounds = array<i64: 1, 128>}, {pipeline_mode = #tpu.pipeline_mode<synchronous>, transform_indices = @transform_7, window_bounds = array<i64: 1152, 128>}, {pipeline_mode = #tpu.pipeline_mode<synchronous>, transform_indices = @transform_8, window_bounds = array<i64: 1, 128>}, {pipeline_mode = #tpu.pipeline_mode<synchronous>, transform_indices = @transform_9, window_bounds = array<i64: 1, 128>}, {pipeline_mode = #tpu.pipeline_mode<synchronous>, transform_indices = @transform_10, window_bounds = array<i64: 128, 128>}, {pipeline_mode = #tpu.pipeline_mode<synchronous>, transform_indices = @transform_11, window_bounds = array<i64: 1, 128>}, {pipeline_mode = #tpu.pipeline_mode<synchronous>, transform_indices = @transform_12, window_bounds = array<i64: 1, 128>}, {transform_indices = @transform_13, window_bounds = array<i64: 1, 1, 128>}]} {
    %c0 = arith.constant 0 : index
    %c0_0 = arith.constant 0 : index
    %c0_1 = arith.constant 0 : index
    %0 = vector.load %arg1[%c0, %c0_0, %c0_1] : memref<1x256x27xbf16, #tpu.memory_space<vmem>>, vector<1x256x27xbf16>
    %1 = vector.shape_cast %0 : vector<1x256x27xbf16> to vector<256x27xbf16>
    %c0_2 = arith.constant 0 : index
    %c0_3 = arith.constant 0 : index
    %2 = vector.load %arg2[%c0_2, %c0_3] : memref<27x128xbf16, #tpu.memory_space<vmem>>, vector<27x128xbf16>
    %cst = arith.constant dense<0.000000e+00> : vector<256x128xf32>
    %3 = tpu.matmul %1, %2, %cst {dimension_numbers = #tpu.dot_dimension_numbers<[1], [0], [0], [1], [0, 0, 1, 1], [], []>} : vector<256x27xbf16>, vector<27x128xbf16>, vector<256x128xf32> -> vector<256x128xf32>
    %c0_4 = arith.constant 0 : index
    %c0_5 = arith.constant 0 : index
    %4 = vector.load %arg3[%c0_4, %c0_5] : memref<1x128xf32, #tpu.memory_space<vmem>>, vector<1x128xf32>
    %5 = vector.broadcast %4 : vector<1x128xf32> to vector<256x128xf32>
    %6 = arith.mulf %3, %5 : vector<256x128xf32>
    %c0_6 = arith.constant 0 : index
    %c0_7 = arith.constant 0 : index
    %7 = vector.load %arg4[%c0_6, %c0_7] : memref<1x128xf32, #tpu.memory_space<vmem>>, vector<1x128xf32>
    %8 = vector.broadcast %7 : vector<1x128xf32> to vector<256x128xf32>
    %9 = arith.addf %6, %8 : vector<256x128xf32>
    %cst_8 = arith.constant 0.000000e+00 : f32
    %10 = vector.broadcast %cst_8 : f32 to vector<256x128xf32>
    %11 = arith.maximumf %9, %10 : vector<256x128xf32>
    %12 = arith.truncf %11 : vector<256x128xf32> to vector<256x128xbf16>
    %c0_9 = arith.constant 0 : index
    %c0_10 = arith.constant 0 : index
    %13 = vector.load %arg5[%c0_9, %c0_10] : memref<128x128xbf16, #tpu.memory_space<vmem>>, vector<128x128xbf16>
    %cst_11 = arith.constant dense<0.000000e+00> : vector<256x128xf32>
    %14 = tpu.matmul %12, %13, %cst_11 {dimension_numbers = #tpu.dot_dimension_numbers<[1], [0], [0], [1], [0, 0, 1, 1], [], []>} : vector<256x128xbf16>, vector<128x128xbf16>, vector<256x128xf32> -> vector<256x128xf32>
    %c0_12 = arith.constant 0 : index
    %c0_13 = arith.constant 0 : index
    %15 = vector.load %arg6[%c0_12, %c0_13] : memref<1x128xf32, #tpu.memory_space<vmem>>, vector<1x128xf32>
    %16 = vector.broadcast %15 : vector<1x128xf32> to vector<256x128xf32>
    %17 = arith.mulf %14, %16 : vector<256x128xf32>
    %c0_14 = arith.constant 0 : index
    %c0_15 = arith.constant 0 : index
    %18 = vector.load %arg7[%c0_14, %c0_15] : memref<1x128xf32, #tpu.memory_space<vmem>>, vector<1x128xf32>
    %19 = vector.broadcast %18 : vector<1x128xf32> to vector<256x128xf32>
    %20 = arith.addf %17, %19 : vector<256x128xf32>
    %cst_16 = arith.constant 0.000000e+00 : f32
    %21 = vector.broadcast %cst_16 : f32 to vector<256x128xf32>
    %22 = arith.maximumf %20, %21 : vector<256x128xf32>
    %23 = arith.truncf %22 : vector<256x128xf32> to vector<256x128xbf16>
    %24 = vector.shape_cast %23 : vector<256x128xbf16> to vector<16x16x128xbf16>
    %cst_17 = arith.constant 0.000000e+00 : bf16
    %25 = vector.broadcast %cst_17 : bf16 to vector<16x1x128xbf16>
    %cst_18 = arith.constant 0.000000e+00 : bf16
    %26 = vector.broadcast %cst_18 : bf16 to vector<1x18x128xbf16>
    %27 = tpu.concatenate %25, %24, %25 in 1 : vector<16x1x128xbf16>, vector<16x16x128xbf16>, vector<16x1x128xbf16> -> vector<16x18x128xbf16>
    %28 = tpu.concatenate %26, %27, %26 in 0 : vector<1x18x128xbf16>, vector<16x18x128xbf16>, vector<1x18x128xbf16> -> vector<18x18x128xbf16>
    %29 = vector.extract_strided_slice %28 {offsets = [0, 0, 0], sizes = [16, 16, 128], strides = [1, 1, 1]} : vector<18x18x128xbf16> to vector<16x16x128xbf16>
    %30 = vector.extract_strided_slice %28 {offsets = [0, 1, 0], sizes = [16, 16, 128], strides = [1, 1, 1]} : vector<18x18x128xbf16> to vector<16x16x128xbf16>
    %31 = vector.extract_strided_slice %28 {offsets = [0, 2, 0], sizes = [16, 16, 128], strides = [1, 1, 1]} : vector<18x18x128xbf16> to vector<16x16x128xbf16>
    %32 = vector.extract_strided_slice %28 {offsets = [1, 0, 0], sizes = [16, 16, 128], strides = [1, 1, 1]} : vector<18x18x128xbf16> to vector<16x16x128xbf16>
    %33 = vector.extract_strided_slice %28 {offsets = [1, 1, 0], sizes = [16, 16, 128], strides = [1, 1, 1]} : vector<18x18x128xbf16> to vector<16x16x128xbf16>
    %34 = vector.extract_strided_slice %28 {offsets = [1, 2, 0], sizes = [16, 16, 128], strides = [1, 1, 1]} : vector<18x18x128xbf16> to vector<16x16x128xbf16>
    %35 = vector.extract_strided_slice %28 {offsets = [2, 0, 0], sizes = [16, 16, 128], strides = [1, 1, 1]} : vector<18x18x128xbf16> to vector<16x16x128xbf16>
    %36 = vector.extract_strided_slice %28 {offsets = [2, 1, 0], sizes = [16, 16, 128], strides = [1, 1, 1]} : vector<18x18x128xbf16> to vector<16x16x128xbf16>
    %37 = vector.extract_strided_slice %28 {offsets = [2, 2, 0], sizes = [16, 16, 128], strides = [1, 1, 1]} : vector<18x18x128xbf16> to vector<16x16x128xbf16>
    %38 = tpu.concatenate %29, %30, %31, %32, %33, %34, %35, %36, %37 in 2 : vector<16x16x128xbf16>, vector<16x16x128xbf16>, vector<16x16x128xbf16>, vector<16x16x128xbf16>, vector<16x16x128xbf16>, vector<16x16x128xbf16>, vector<16x16x128xbf16>, vector<16x16x128xbf16>, vector<16x16x128xbf16> -> vector<16x16x1152xbf16>
    %39 = vector.shape_cast %38 : vector<16x16x1152xbf16> to vector<256x1152xbf16>
    %c0_19 = arith.constant 0 : index
    %c0_20 = arith.constant 0 : index
    %40 = vector.load %arg8[%c0_19, %c0_20] : memref<1152x128xbf16, #tpu.memory_space<vmem>>, vector<1152x128xbf16>
    %cst_21 = arith.constant dense<0.000000e+00> : vector<256x128xf32>
    %41 = tpu.matmul %39, %40, %cst_21 {dimension_numbers = #tpu.dot_dimension_numbers<[1], [0], [0], [1], [0, 0, 1, 1], [], []>} : vector<256x1152xbf16>, vector<1152x128xbf16>, vector<256x128xf32> -> vector<256x128xf32>
    %c0_22 = arith.constant 0 : index
    %c0_23 = arith.constant 0 : index
    %42 = vector.load %arg9[%c0_22, %c0_23] : memref<1x128xf32, #tpu.memory_space<vmem>>, vector<1x128xf32>
    %43 = vector.broadcast %42 : vector<1x128xf32> to vector<256x128xf32>
    %44 = arith.mulf %41, %43 : vector<256x128xf32>
    %c0_24 = arith.constant 0 : index
    %c0_25 = arith.constant 0 : index
    %45 = vector.load %arg10[%c0_24, %c0_25] : memref<1x128xf32, #tpu.memory_space<vmem>>, vector<1x128xf32>
    %46 = vector.broadcast %45 : vector<1x128xf32> to vector<256x128xf32>
    %47 = arith.addf %44, %46 : vector<256x128xf32>
    %cst_26 = arith.constant 0.000000e+00 : f32
    %48 = vector.broadcast %cst_26 : f32 to vector<256x128xf32>
    %49 = arith.maximumf %47, %48 : vector<256x128xf32>
    %50 = arith.truncf %49 : vector<256x128xf32> to vector<256x128xbf16>
    %c0_27 = arith.constant 0 : index
    %c0_28 = arith.constant 0 : index
    %51 = vector.load %arg11[%c0_27, %c0_28] : memref<128x128xbf16, #tpu.memory_space<vmem>>, vector<128x128xbf16>
    %cst_29 = arith.constant dense<0.000000e+00> : vector<256x128xf32>
    %52 = tpu.matmul %50, %51, %cst_29 {dimension_numbers = #tpu.dot_dimension_numbers<[1], [0], [0], [1], [0, 0, 1, 1], [], []>} : vector<256x128xbf16>, vector<128x128xbf16>, vector<256x128xf32> -> vector<256x128xf32>
    %c0_30 = arith.constant 0 : index
    %c0_31 = arith.constant 0 : index
    %53 = vector.load %arg12[%c0_30, %c0_31] : memref<1x128xf32, #tpu.memory_space<vmem>>, vector<1x128xf32>
    %54 = vector.broadcast %53 : vector<1x128xf32> to vector<256x128xf32>
    %55 = arith.mulf %52, %54 : vector<256x128xf32>
    %c0_32 = arith.constant 0 : index
    %c0_33 = arith.constant 0 : index
    %56 = vector.load %arg13[%c0_32, %c0_33] : memref<1x128xf32, #tpu.memory_space<vmem>>, vector<1x128xf32>
    %57 = vector.broadcast %56 : vector<1x128xf32> to vector<256x128xf32>
    %58 = arith.addf %55, %57 : vector<256x128xf32>
    %59 = arith.addf %58, %11 : vector<256x128xf32>
    %cst_34 = arith.constant 0.000000e+00 : f32
    %60 = vector.broadcast %cst_34 : f32 to vector<256x128xf32>
    %61 = arith.maximumf %59, %60 : vector<256x128xf32>
    %cst_35 = arith.constant dense<0.000000e+00> : vector<128xf32>
    %62 = vector.multi_reduction <add>, %61, %cst_35 [0] : vector<256x128xf32> to vector<128xf32>
    %63 = vector.shape_cast %62 : vector<128xf32> to vector<1x128xf32>
    %cst_36 = arith.constant 3.906250e-03 : f32
    %64 = vector.broadcast %cst_36 : f32 to vector<1x128xf32>
    %65 = arith.mulf %63, %64 : vector<1x128xf32>
    %66 = vector.shape_cast %65 : vector<1x128xf32> to vector<1x1x128xf32>
    %c0_37 = arith.constant 0 : index
    %c0_38 = arith.constant 0 : index
    %c0_39 = arith.constant 0 : index
    %67 = vector.load %arg14[%c0_37, %c0_38, %c0_39] : memref<1x1x128xf32, #tpu.memory_space<vmem>>, vector<1x1x128xf32>
    tpu.vector_store %arg14[%c0_37, %c0_38, %c0_39], %66 {strides = array<i32>} : memref<1x1x128xf32, #tpu.memory_space<vmem>>, vector<1x1x128xf32>,
    return
  }
  func.func @transform_0(%arg0: i32) -> (i32, i32, i32) {
    %c0_i32 = arith.constant 0 : i32
    %c0_i32_0 = arith.constant 0 : i32
    %c0_i32_1 = arith.constant 0 : i32
    return %arg0, %c0_i32, %c0_i32_0 : i32, i32, i32
  }
  func.func @transform_1(%arg0: i32) -> (i32, i32) {
    %c0_i32 = arith.constant 0 : i32
    %c0_i32_0 = arith.constant 0 : i32
    %c0_i32_1 = arith.constant 0 : i32
    return %c0_i32, %c0_i32_0 : i32, i32
  }
  func.func @transform_2(%arg0: i32) -> (i32, i32) {
    %c0_i32 = arith.constant 0 : i32
    %c0_i32_0 = arith.constant 0 : i32
    %c0_i32_1 = arith.constant 0 : i32
    return %c0_i32, %c0_i32_0 : i32, i32
  }
  func.func @transform_3(%arg0: i32) -> (i32, i32) {
    %c0_i32 = arith.constant 0 : i32
    %c0_i32_0 = arith.constant 0 : i32
    %c0_i32_1 = arith.constant 0 : i32
    return %c0_i32, %c0_i32_0 : i32, i32
  }
  func.func @transform_4(%arg0: i32) -> (i32, i32) {
    %c0_i32 = arith.constant 0 : i32
    %c0_i32_0 = arith.constant 0 : i32
    %c0_i32_1 = arith.constant 0 : i32
    return %c0_i32, %c0_i32_0 : i32, i32
  }
  func.func @transform_5(%arg0: i32) -> (i32, i32) {
    %c0_i32 = arith.constant 0 : i32
    %c0_i32_0 = arith.constant 0 : i32
    %c0_i32_1 = arith.constant 0 : i32
    return %c0_i32, %c0_i32_0 : i32, i32
  }
  func.func @transform_6(%arg0: i32) -> (i32, i32) {
    %c0_i32 = arith.constant 0 : i32
    %c0_i32_0 = arith.constant 0 : i32
    %c0_i32_1 = arith.constant 0 : i32
    return %c0_i32, %c0_i32_0 : i32, i32
  }
  func.func @transform_7(%arg0: i32) -> (i32, i32) {
    %c0_i32 = arith.constant 0 : i32
    %c0_i32_0 = arith.constant 0 : i32
    %c0_i32_1 = arith.constant 0 : i32
    return %c0_i32, %c0_i32_0 : i32, i32
  }
  func.func @transform_8(%arg0: i32) -> (i32, i32) {
    %c0_i32 = arith.constant 0 : i32
    %c0_i32_0 = arith.constant 0 : i32
    %c0_i32_1 = arith.constant 0 : i32
    return %c0_i32, %c0_i32_0 : i32, i32
  }
  func.func @transform_9(%arg0: i32) -> (i32, i32) {
    %c0_i32 = arith.constant 0 : i32
    %c0_i32_0 = arith.constant 0 : i32
    %c0_i32_1 = arith.constant 0 : i32
    return %c0_i32, %c0_i32_0 : i32, i32
  }
  func.func @transform_10(%arg0: i32) -> (i32, i32) {
    %c0_i32 = arith.constant 0 : i32
    %c0_i32_0 = arith.constant 0 : i32
    %c0_i32_1 = arith.constant 0 : i32
    return %c0_i32, %c0_i32_0 : i32, i32
  }
  func.func @transform_11(%arg0: i32) -> (i32, i32) {
    %c0_i32 = arith.constant 0 : i32
    %c0_i32_0 = arith.constant 0 : i32
    %c0_i32_1 = arith.constant 0 : i32
    return %c0_i32, %c0_i32_0 : i32, i32
  }
  func.func @transform_12(%arg0: i32) -> (i32, i32) {
    %c0_i32 = arith.constant 0 : i32
    %c0_i32_0 = arith.constant 0 : i32
    %c0_i32_1 = arith.constant 0 : i32
    return %c0_i32, %c0_i32_0 : i32, i32
  }
  func.func @transform_13(%arg0: i32) -> (i32, i32, i32) {
    %c0_i32 = arith.constant 0 : i32
    %c0_i32_0 = arith.constant 0 : i32
    %c0_i32_1 = arith.constant 0 : i32
    return %arg0, %c0_i32, %c0_i32_0 : i32, i32, i32
  }
}

</mosaic_0001>

<bundles_post_ra>
// kernel: resnet_forward.1
= control target key start
LH: loop header
LB: loop body
LE: loop exit
PB: predicated region body
PF: predicated region fallthrough
CT: control target
= control target key end

     0   :  { %s6527_s0 = inlined_call_operand.vmem [shape: bf16[2,256,27], index: 0, kind: input, shape index: {}]   ;;  %s6528_s1 = inlined_call_operand.vmem [shape: bf16[27,128], index: 1, kind: input, shape index: {}]   ;;  %s6529_s2 = inlined_call_operand.vmem [shape: f32[1,128], index: 2, kind: input, shape index: {}]   ;;  %s6530_s3 = inlined_call_operand.vmem [shape: f32[1,128], index: 3, kind: input, shape index: {}]   ;;  %s6531_s4 = inlined_call_operand.vmem [shape: bf16[128,128], index: 4, kind: input, shape index: {}]   ;;  %s6532_s5 = inlined_call_operand.vmem [shape: f32[1,128], index: 5, kind: input, shape index: {}]   ;;  %s6533_s6 = inlined_call_operand.vmem [shape: f32[1,128], index: 6, kind: input, shape index: {}]   ;;  %s6534_s7 = inlined_call_operand.vmem [shape: bf16[1152,128], index: 7, kind: input, shape index: {}]   ;;  %s6535_s8 = inlined_call_operand.vmem [shape: f32[1,128], index: 8, kind: input, shape index: {}]   ;;  %s6536_s9 = inlined_call_operand.vmem [shape: f32[1,128], index: 9, kind: input, shape index: {}]   ;;  %s6537_s10 = inlined_call_operand.vmem [shape: bf16[128,128], index: 10, kind: input, shape index: {}]   ;;  %s6538_s11 = inlined_call_operand.vmem [shape: f32[1,128], index: 11, kind: input, shape index: {}]   ;;  %s6539_s12 = inlined_call_operand.vmem [shape: f32[1,128], index: 12, kind: input, shape index: {}]   ;;  %s6540_s13 = inlined_call_operand.hbm [shape: f32[2,1,128], index: 13, kind: output, shape index: {}]  }
   0x1   :  { %6604 = sst [smem:[#allocation35_spill]] %s6527_s0 }
   0x2   :  { %6605 = sst [smem:[#allocation36_spill]] %s6528_s1 }
   0x3   :  { %6606 = sst [smem:[#allocation37_spill]] %s6529_s2 }
   0x4   :  { %18 = vsyncpa [#allocation3], 0 }
   0x5   :  { %20 = vsyncpa [#allocation3 + $0x1], 0  ;;  %s4897_s25 = smov 0   ;;  %s4899_s26 = smov 0  }
   0x6   :  { %s4901_s27 = smov 0   ;;  %s4903_s28 = smov 0  }
   0x7 LB: > { %s4918_s29 = sadd.s32 4294967295, %s4822_s28   ;;  %s3739_s30 = sadd.s32 4294967294, %s4822_s28   ;;  %s4822_s28 = sphi %s4903_s28, %s6710_s28   ;;  %s4818_s27 = sphi %s4901_s27, %s6709_s27   ;;  %s4814_s26 = sphi %s4899_s26, %s6708_s26   ;;  %s4810_s25 = sphi %s4897_s25, %s6707_s25  }
   0x8   : > { %s4922_s14 = sadd.s32 1, %s4822_s28   ;;  %s311_s15 = sadd.s32 1, %s4818_s27 }
   0x9   : > { %s308_s16 = ssub.s32 %s4822_s28, %s4922_s14  ;;  %p321_p0 = scmp.ne.s32.totalorder %s4818_s27, %s4814_s26 }
   0xa   : > { %p309_p1 = scmp.eq.s32.totalorder %s308_s16, 0  ;;  %p322_p2 = scmp.eq.s32.totalorder %s4918_s29, 1 }
   0xb   : > { %p327_p3 = scmp.ne.s32.totalorder %s4814_s26, %s4810_s25  ;;  %p328_p4 = scmp.eq.s32.totalorder %s3739_s30, 1 }
   0xc   : > { %s4933_s17 = scalar_select %p309_p1, %s4818_s27, %s311_s15  }
   0xd   : > { %p4935_p5 = por %p322_p2, %p321_p0  ;;  %p4939_p6 = por %p328_p4, %p327_p3 }
   0xe   : > { %p3742_p7 = scmp.ge.s32.totalorder %s4822_s28, 1  ;;  %p390_p8 = scmp.lt.s32.totalorder %s4822_s28, 3 }
  0x10   : > { %p391_p9 = pnand %p3742_p7, %p390_p8 }
  0x12   : > { %394 = sbr.rel (%p391_p9) target bundleno = 1291 (0x50b), region = 72 }
  0x19   : > { %s6609_s1 = sld [smem:[#allocation36_spill]]  ;;  %vm615_vm0 = vcmask 1044480   ;;  %vm616_vm1 = vcmask 1045504   ;;  %p433_p10 = scmp.lt.s32.totalorder %s4918_s29, 1  ;;  %v4824_v2 = vmov 65535   ;;  %v4672_v4 = vld [vmem:[%s6531_s4] sm:$0xff]  }
  0x1a   : > { %v617_v3 = vsel %vm615_vm0, 4294967295, %v4824_v2  ;;  %v4673_v6 = vld [vmem:[%s6531_s4 + $0x8] sm:$0xff]   ;;  %4453 = vmatprep.subr.bf16.mxu1 %v4672_v4  ;;  %s6610_s0 = sld [smem:[#allocation35_spill]]  ;;  %vm566_vm2 = vcmask 220160   ;;  %v4674_v8 = vld [vmem:[%s6531_s4 + $0x10] sm:$0xff]   ;;  %v4675_v12 = vld [vmem:[%s6531_s4 + $0x18] sm:$0xff]  }
  0x1b   : > { %v618_v5 = vsel %vm616_vm1, %v617_v3, 0  ;;  %s434_s15 = scalar_select %p433_p10, %s4918_s29, 1  ;;  %4454 = vmatpush3.bf16.msra.mxu1 %v4672_v4  ;;  %v4676_v13 = vld [vmem:[%s6531_s4 + $0x20] sm:$0xff]   ;;  %v4677_v27 = vld [vmem:[%s6531_s4 + $0x28] sm:$0xff]   ;;  %v4678_v28 = vld [vmem:[%s6531_s4 + $0x30] sm:$0xff]   ;;  %vm1404_vm3 = vcmask 1040384  }
  0x1c   : > { %4455 = vmatprep.subr.bf16.mxu1 %v4673_v6  ;;  %v4679_v29 = vld [vmem:[%s6531_s4 + $0x38] sm:$0xff]   ;;  %v4680_v30 = vld [vmem:[%s6534_s7 + $0x40] sm:$0xff]   ;;  %v4682_v32 = vld [vmem:[%s6534_s7 + $0x48] sm:$0xff]   ;;  %s6611_s2 = sld [smem:[#allocation37_spill]]  ;;  %vm1405_vm4 = vsmask.f32 256 }
  0x1d   : > { %s3878_s21 = sshll.u32 %s434_s15, 7  ;;  %v4681_v31 = vld [vmem:[%s6534_s7] sm:$0xff]   ;;  %v4683_v33 = vld [vmem:[%s6534_s7 + $0x8] sm:$0xff]   ;;  %v4684_v35 = vld [vmem:[%s6534_s7 + $0x50] sm:$0xff]   ;;  %vm1439_vm6 = vsmask.f32 7424 }
  0x1e   : > { %v4690_v34 = vld [vmem:[%s6534_s7 + $0xc0] sm:$0xff]   ;;  %v4685_v36 = vld [vmem:[%s6534_s7 + $0x10] sm:$0xff]   ;;  %v4686_v37 = vld [vmem:[%s6534_s7 + $0x58] sm:$0xff]   ;;  %vm1675_vm7 = vcmask 1046528   ;;  %s431_s24 = sand.u32 1, %s4814_s26   ;;  %s3875_s30 = sshll.u32 %s4918_s29, 4 }
  0x1f   : > { %v4654_v0 = vld [vmem:[%s6609_s1] sm:$0xff]   ;;  %v4655_v1 = vld [vmem:[%s6609_s1 + $0x8] sm:$0x3f]   ;;  %4456 = vmatpush3.bf16.msra.mxu1 %v4673_v6  ;;  %v4687_v38 = vld [vmem:[%s6534_s7 + $0x18] sm:$0xff]   ;;  %s432_s15 = scalar_lea.vmem [#allocation2], %s431_s24  ;;  %s4826_s29 = smov [#allocation2]  }
  0x20   : > { %4417 = vmatprep.subr.bf16.mxu0 %v4654_v0  ;;  %v620_v7 = vand.u32 %v4655_v1, %v618_v5  ;;  %s4962_s1 = scalar_lea.vmem %s6610_s0, %s3878_s21  ;;  %4457 = vmatprep.subr.bf16.mxu1 %v4674_v8  ;;  %v4688_v39 = vld [vmem:[%s6534_s7 + $0x60] sm:$0xff]   ;;  %v4694_v41 = vld [vmem:[%s6534_s7 + $0x68] sm:$0xff]   ;;  %vm5425_vm5 = vmand %vm1404_vm3, %vm1405_vm4  ;;  %s3684_s16 = sshll.u32 %s432_s15, 4  ;;  %s6487_s16 = int_to_ptr.vmem [resolvable:$true] %s3684_s16 }
  0x21   : > { %4418 = vmatpush3.bf16.msra.mxu0 %v4654_v0  ;;  %v4656_v9 = vld [vmem:[%s4962_s1] sm:$0xff]   ;;  %v4657_v10 = vld [vmem:[%s4962_s1 + $0x8] sm:$0xff]   ;;  %v4658_v11 = vld [vmem:[%s4962_s1 + $0x10] sm:$0xff]   ;;  %s6485_s21 = scalar_lea.hbm %s6540_s13, %s3875_s30  ;;  %s3672_s0 = scalar_lea.sflag [#allocation3], %s431_s24 }
  0x22   : > { %4419 = vmatprep.subr.bf16.mxu0 %v620_v7  ;;  %4421 = vmatprep.mubr.msk.bf16.mxu0 %vm566_vm2, %v4656_v9  ;;  %v4659_v14 = vld [vmem:[%s4962_s1 + $0x18] sm:$0xff]   ;;  %v4660_v15 = vld [vmem:[%s4962_s1 + $0x20] sm:$0xff]   ;;  %v4661_v16 = vld [vmem:[%s4962_s1 + $0x28] sm:$0xff]   ;;  %s4760_s22 = scalar_lea.vmem %s6487_s16, 16  ;;  %s4764_s23 = sshll.u32 %s4826_s29, 4  ;;  %s4765_s23 = int_to_ptr.vmem [resolvable:$false] %s4764_s23 }
  0x23   : > { %4458 = vmatpush3.bf16.msra.mxu1 %v4674_v8  ;;  %v4662_v17 = vld [vmem:[%s4962_s1 + $0x30] sm:$0xff]   ;;  %v4663_v18 = vld [vmem:[%s4962_s1 + $0x38] sm:$0xff]   ;;  %v4664_v19 = vld [vmem:[%s4962_s1 + $0x40] sm:$0xff]   ;;  %p4761_p11 = scmp.ne.s32.totalorder %s6487_s16, %s4760_s22  ;;  %p4767_p0 = scmp.lt.s32.totalorder %s6487_s16, %s4765_s23 }
  0x24   : > { %4459 = vmatprep.subr.bf16.mxu1 %v4675_v12  ;;  %v4665_v20 = vld [vmem:[%s4962_s1 + $0x48] sm:$0xff]   ;;  %v4666_v21 = vld [vmem:[%s4962_s1 + $0x50] sm:$0xff]   ;;  %v4667_v22 = vld [vmem:[%s4962_s1 + $0x58] sm:$0xff]  }
  0x25   : > { %4420 = vmatpush3.bf16.msra.mxu0 %v620_v7  ;;  %v4668_v23 = vld [vmem:[%s4962_s1 + $0x60] sm:$0xff]   ;;  %v4669_v24 = vld [vmem:[%s4962_s1 + $0x68] sm:$0xff]   ;;  %v4670_v25 = vld [vmem:[%s4962_s1 + $0x70] sm:$0xff]   ;;  %p4762_p12 = pnand %p4761_p11, %p4935_p5 }
  0x26   : > { %v4671_v26 = vld [vmem:[%s4962_s1 + $0x78] sm:$0xff]   ;;  %3921 = vmatprep.subr.bf16.mxu0 %v4680_v30  ;;  %v4689_v40 = vld [vmem:[%s6534_s7 + $0x20] sm:$0xff]   ;;  %v4695_v42 = vld [vmem:[%s6534_s7 + $0x28] sm:$0xff]  }
  0x27   : > { %4460 = vmatpush3.bf16.msra.mxu1 %v4675_v12  ;;  %v5056_v43 = vld [vmem:[%s6611_s2] ss:$0 sm:$0xff]  ;;  %v4692_v8 = vld [vmem:[%s6534_s7 + $0xc8] sm:$0xff]   ;;  %p4763_p13 = pneg %p4762_p12  ;;  %s4766_s2 = scalar_lea.vmem %s4765_s23, 32 }
  0x28   : > { %4422 = vmatmul.mubr.msk.bf16.vlgmr.msra.gmra.mrb[0].mxu0 %vm566_vm2, %v4657_v10  ;;  %4461 = vmatprep.subr.bf16.mxu1 %v4676_v13  ;;  %v5062_v46 = vld [vmem:[%s6530_s3] ss:$0 sm:$0xff]  ;;  %p4768_p1 = scmp.lt.s32.totalorder %s4766_s2, %s4760_s22 }
  0x29   : > { %4425 = vmatprep.mubr.msk.bf16.mxu0 %vm566_vm2, %v4658_v11  ;;  %3922 = vmatpush3.bf16.msra.mxu0 %v4681_v31  ;;  %v4691_v3 = vld [vmem:[%s6534_s7 + $0x80] sm:$0xff]  }
  0x2a   : > { %3923 = vmatprep.subr.bf16.mxu0 %v4682_v32  ;;  %p4769_p2 = por %p4768_p1, %p4767_p0 }
  0x2b   : > { %4462 = vmatpush3.bf16.msra.mxu1 %v4676_v13 }
  0x2c   : > { %4463 = vmatprep.subr.bf16.mxu1 %v4677_v27  ;;  %p4770_p3 = pnand %p4769_p2, %p4763_p13 }
  0x2d   : > { %3924 = vmatpush3.bf16.msra.mxu0 %v4683_v33 }
  0x2e   : > { %3925 = vmatprep.subr.bf16.mxu0 %v4684_v35 }
  0x2f   : > { %4464 = vmatpush3.bf16.msra.mxu1 %v4677_v27 }
  0x30   : > { %4426 = vmatmul.mubr.msk.bf16.gmra.mrb[4].mxu0 %vm566_vm2, %v4659_v14  ;;  %4465 = vmatprep.subr.bf16.mxu1 %v4678_v28 }
  0x31   : > { %4429 = vmatprep.mubr.msk.bf16.mxu0 %vm566_vm2, %v4660_v15  ;;  %3926 = vmatpush3.bf16.msra.mxu0 %v4685_v36  ;;  %v4693_v15 = vld [vmem:[%s6534_s7 + $0x88] sm:$0xff]  }
  0x32   : > { %3927 = vmatprep.subr.bf16.mxu0 %v4686_v37 }
  0x33   : > { %4466 = vmatpush3.bf16.msra.mxu1 %v4678_v28 }
  0x34   : > { %4467 = vmatprep.subr.bf16.mxu1 %v4679_v29 }
  0x35   : > { %3928 = vmatpush3.bf16.msra.mxu0 %v4687_v38 }
  0x36   : > { %3929 = vmatprep.subr.bf16.mxu0 %v4688_v39 }
  0x37   : > { %4468 = vmatpush3.bf16.msra.mxu1 %v4679_v29 }
  0x38   : > { %4430 = vmatmul.mubr.msk.bf16.gmra.mrb[8].mxu0 %vm566_vm2, %v4661_v16  ;;  %4033 = vmatprep.subr.bf16.mxu1 %v4690_v34 }
  0x39   : > { %4433 = vmatprep.mubr.msk.bf16.mxu0 %vm566_vm2, %v4662_v17  ;;  %3930 = vmatpush3.bf16.msra.mxu0 %v4689_v40  ;;  %v4696_v17 = vld [vmem:[%s6534_s7 + $0xd0] sm:$0xff]  }
  0x3a   : > { %3931 = vmatprep.subr.bf16.mxu0 %v4694_v41 }
  0x3d   : > { %3932 = vmatpush3.bf16.msra.mxu0 %v4695_v42 }
  0x40   : > { %4434 = vmatmul.mubr.msk.bf16.gmra.mrb[12].mxu0 %vm566_vm2, %v4663_v18 }
  0x41   : > { %4437 = vmatprep.mubr.msk.bf16.mxu0 %vm566_vm2, %v4664_v19 }
  0x48   : > { %4438 = vmatmul.mubr.msk.bf16.gmra.mrb[16].mxu0 %vm566_vm2, %v4665_v20 }
  0x49   : > { %4441 = vmatprep.mubr.msk.bf16.mxu0 %vm566_vm2, %v4666_v21 }
  0x50   : > { %4442 = vmatmul.mubr.msk.bf16.gmra.mrb[20].mxu0 %vm566_vm2, %v4667_v22 }
  0x51   : > { %4445 = vmatprep.mubr.msk.bf16.mxu0 %vm566_vm2, %v4668_v23 }
  0x58   : > { %4446 = vmatmul.mubr.msk.bf16.gmra.mrb[24].mxu0 %vm566_vm2, %v4669_v24 }
  0x59   : > { %4449 = vmatprep.mubr.msk.bf16.mxu0 %vm566_vm2, %v4670_v25 }
  0x60   : > { %4450 = vmatmul.mubr.msk.bf16.gmra.mrb[28].mxu0 %vm566_vm2, %v4671_v26  ;;  %v4697_v26 = vld [vmem:[%s6534_s7 + $0x90] sm:$0xff]  }
  0xfb   : > { %v4423_v44 = vpop.f32.mrb[0].mxu0 }
  0xfc   : > { %v792_v45 = vmul.f32 %v4423_v44, %v5056_v43  ;;  %v656_v47 = vpop.f32.mrb[1].mxu0 }
  0xfd   : > { %v790_v48 = vmul.f32 %v5056_v43, %v656_v47  ;;  %v4424_v49 = vpop.f32.mrb[2].mxu0 }
  0xfe   : > { %v793_v50 = vmul.f32 %v4424_v49, %v5056_v43  ;;  %v659_v51 = vpop.f32.mrb[3].mxu0  ;;  %v5071_v54 = vadd.f32 %v5062_v46, %v792_v45 }
  0xff   : > { %v791_v52 = vmul.f32 %v5056_v43, %v659_v51  ;;  %v5068_v53 = vadd.f32 %v5062_v46, %v790_v48 }
 0x100   : > { %v5074_v55 = vadd.f32 %v5062_v46, %v793_v50  ;;  %v6571_v61 = vmax.f32 %v5071_v54, 0.0 }
 0x101   : > { %v5077_v56 = vadd.f32 %v5062_v46, %v791_v52  ;;  %v6572_v59 = vmax.f32 %v5068_v53, 0.0 }
 0x102   : > { %6612 = vst [vmem:[#allocation5_spill] sm:$0xff] %v5074_v55  ;;  %v6569_v57 = vmax.f32 %v5074_v55, 0.0 }
 0x103   : > { %6613 = vst [vmem:[#allocation6_spill] sm:$0xff] %v5077_v56  ;;  %v4427_v58 = vpop.f32.mrb[4].mxu0  ;;  %v6570_v60 = vmax.f32 %v5077_v56, 0.0 }
 0x104   : > { %v796_v62 = vmul.f32 %v4427_v58, %v5056_v43  ;;  %v672_v63 = vpop.f32.mrb[5].mxu0  ;;  %v894_v7 = vpack.c.bf16 %v6569_v57, %v6571_v61 }
 0x105   : > { %v794_v0 = vmul.f32 %v5056_v43, %v672_v63  ;;  %v4428_v1 = vpop.f32.mrb[6].mxu0  ;;  %v893_v2 = vpack.c.bf16 %v6570_v60, %v6572_v59 }
 0x106   : > { %v5093_v4 = vadd.f32 %v5062_v46, %v796_v62  ;;  %v797_v5 = vmul.f32 %v4428_v1, %v5056_v43  ;;  %v675_v6 = vpop.f32.mrb[7].mxu0 }
 0x107   : > { %v5104_v9 = vadd.f32 %v5062_v46, %v794_v0  ;;  %v795_v10 = vmul.f32 %v5056_v43, %v675_v6  ;;  %4469 = vmatprep.mubr.bf16.mxu1 %v893_v2 }
 0x108   : > { %6614 = vst [vmem:[#allocation7_spill] sm:$0xff] %v5093_v4  ;;  %v6567_v11 = vmax.f32 %v5093_v4, 0.0  ;;  %v5109_v12 = vadd.f32 %v5062_v46, %v797_v5  ;;  %4470 = vmatmul.mubr.bf16.vlgmr.msra.gmra.mrb[0].mxu1 %v894_v7 }
 0x109   : > { %6615 = vst [vmem:[#allocation8_spill] sm:$0xff] %v5104_v9  ;;  %v6568_v13 = vmax.f32 %v5104_v9, 0.0  ;;  %v5113_v14 = vadd.f32 %v5062_v46, %v795_v10  ;;  %4034 = vmatpush3.bf16.msra.mxu1 %v4691_v3 }
 0x10a   : > { %6616 = vst [vmem:[#allocation9_spill] sm:$0xff] %v5109_v12  ;;  %v6565_v16 = vmax.f32 %v5109_v12, 0.0  ;;  %4035 = vmatprep.subr.bf16.mxu1 %v4692_v8 }
 0x10b   : > { %6617 = vst [vmem:[#allocation10_spill] sm:$0xff] %v5113_v14  ;;  %v6566_v18 = vmax.f32 %v5113_v14, 0.0  ;;  %v4431_v19 = vpop.f32.mrb[8].mxu0 }
 0x10c   : > { %v800_v20 = vmul.f32 %v4431_v19, %v5056_v43  ;;  %v896_v21 = vpack.c.bf16 %v6565_v16, %v6567_v11  ;;  %v688_v22 = vpop.f32.mrb[9].mxu0 }
 0x10d   : > { %v895_v23 = vpack.c.bf16 %v6566_v18, %v6568_v13  ;;  %v798_v24 = vmul.f32 %v5056_v43, %v688_v22  ;;  %v4432_v25 = vpop.f32.mrb[10].mxu0  ;;  %4036 = vmatpush3.bf16.msra.mxu1 %v4693_v15 }
 0x10e   : > { %v5137_v27 = vadd.f32 %v5062_v46, %v800_v20  ;;  %v801_v28 = vmul.f32 %v4432_v25, %v5056_v43  ;;  %v691_v29 = vpop.f32.mrb[11].mxu0  ;;  %4037 = vmatprep.subr.bf16.mxu1 %v4696_v17 }
 0x10f   : > { %4473 = vmatprep.mubr.bf16.mxu1 %v895_v23  ;;  %v5141_v30 = vadd.f32 %v5062_v46, %v798_v24  ;;  %v799_v31 = vmul.f32 %v5056_v43, %v691_v29 }
 0x110   : > { %6618 = vst [vmem:[#allocation11_spill] sm:$0xff] %v5137_v27  ;;  %v6563_v32 = vmax.f32 %v5137_v27, 0.0  ;;  %4474 = vmatmul.mubr.bf16.gmra.mrb[4].mxu1 %v896_v21  ;;  %v5146_v33 = vadd.f32 %v5062_v46, %v801_v28 }
 0x111   : > { %6619 = vst [vmem:[#allocation12_spill] sm:$0xff] %v5141_v30  ;;  %v6564_v34 = vmax.f32 %v5141_v30, 0.0  ;;  %v5150_v35 = vadd.f32 %v5062_v46, %v799_v31  ;;  %4038 = vmatpush3.bf16.msra.mxu1 %v4697_v26 }
 0x112   : > { %6620 = vst [vmem:[#allocation13_spill] sm:$0xff] %v5146_v33  ;;  %v6561_v36 = vmax.f32 %v5146_v33, 0.0 }
 0x113   : > { %6621 = vst [vmem:[#allocation14_spill] sm:$0xff] %v5150_v35  ;;  %v6562_v37 = vmax.f32 %v5150_v35, 0.0  ;;  %v4435_v38 = vpop.f32.mrb[12].mxu0 }
 0x114   : > { %v898_v39 = vpack.c.bf16 %v6561_v36, %v6563_v32  ;;  %v804_v40 = vmul.f32 %v4435_v38, %v5056_v43  ;;  %v704_v41 = vpop.f32.mrb[13].mxu0 }
 0x115   : > { %v897_v42 = vpack.c.bf16 %v6562_v37, %v6564_v34  ;;  %v802_v44 = vmul.f32 %v5056_v43, %v704_v41  ;;  %v4436_v45 = vpop.f32.mrb[14].mxu0 }
 0x116   : > { %v5165_v47 = vadd.f32 %v5062_v46, %v804_v40  ;;  %v805_v48 = vmul.f32 %v4436_v45, %v5056_v43  ;;  %v707_v49 = vpop.f32.mrb[15].mxu0 }
 0x117   : > { %4477 = vmatprep.mubr.bf16.mxu1 %v897_v42  ;;  %v5169_v50 = vadd.f32 %v5062_v46, %v802_v44  ;;  %v803_v51 = vmul.f32 %v5056_v43, %v707_v49 }
 0x118   : > { %6622 = vst [vmem:[#allocation15_spill] sm:$0xff] %v5165_v47  ;;  %4478 = vmatmul.mubr.bf16.gmra.mrb[8].mxu1 %v898_v39  ;;  %v6559_v52 = vmax.f32 %v5165_v47, 0.0  ;;  %v5174_v58 = vadd.f32 %v5062_v46, %v805_v48 }
 0x119   : > { %6623 = vst [vmem:[#allocation16_spill] sm:$0xff] %v5169_v50  ;;  %v6560_v62 = vmax.f32 %v5169_v50, 0.0  ;;  %v5178_v63 = vadd.f32 %v5062_v46, %v803_v51 }
 0x11a   : > { %6624 = vst [vmem:[#allocation17_spill] sm:$0xff] %v5174_v58  ;;  %v6557_v0 = vmax.f32 %v5174_v58, 0.0 }
 0x11b   : > { %6625 = vst [vmem:[#allocation18_spill] sm:$0xff] %v5178_v63  ;;  %v6558_v1 = vmax.f32 %v5178_v63, 0.0  ;;  %v4439_v2 = vpop.f32.mrb[16].mxu0 }
 0x11c   : > { %v900_v3 = vpack.c.bf16 %v6557_v0, %v6559_v52  ;;  %v808_v5 = vmul.f32 %v4439_v2, %v5056_v43  ;;  %v720_v6 = vpop.f32.mrb[17].mxu0 }
 0x11d   : > { %v899_v7 = vpack.c.bf16 %v6558_v1, %v6560_v62  ;;  %v806_v8 = vmul.f32 %v5056_v43, %v720_v6  ;;  %v4440_v10 = vpop.f32.mrb[18].mxu0 }
 0x11e   : > { %v5193_v15 = vadd.f32 %v5062_v46, %v808_v5  ;;  %v809_v17 = vmul.f32 %v4440_v10, %v5056_v43  ;;  %v723_v19 = vpop.f32.mrb[19].mxu0 }
 0x11f   : > { %4481 = vmatprep.mubr.bf16.mxu1 %v899_v7  ;;  %v5197_v20 = vadd.f32 %v5062_v46, %v806_v8  ;;  %v807_v21 = vmul.f32 %v5056_v43, %v723_v19 }
 0x120   : > { %6626 = vst [vmem:[#allocation19_spill] sm:$0xff] %v5193_v15  ;;  %4482 = vmatmul.mubr.bf16.gmra.mrb[12].mxu1 %v900_v3  ;;  %v6555_v22 = vmax.f32 %v5193_v15, 0.0  ;;  %v5202_v23 = vadd.f32 %v5062_v46, %v809_v17 }
 0x121   : > { %6627 = vst [vmem:[#allocation20_spill] sm:$0xff] %v5197_v20  ;;  %v6556_v24 = vmax.f32 %v5197_v20, 0.0  ;;  %v5206_v25 = vadd.f32 %v5062_v46, %v807_v21 }
 0x122   : > { %6628 = vst [vmem:[#allocation21_spill] sm:$0xff] %v5202_v23  ;;  %v6553_v26 = vmax.f32 %v5202_v23, 0.0 }
 0x123   : > { %6629 = vst [vmem:[#allocation22_spill] sm:$0xff] %v5206_v25  ;;  %v6554_v28 = vmax.f32 %v5206_v25, 0.0  ;;  %v4443_v29 = vpop.f32.mrb[20].mxu0 }
 0x124   : > { %v902_v31 = vpack.c.bf16 %v6553_v26, %v6555_v22  ;;  %v812_v38 = vmul.f32 %v4443_v29, %v5056_v43  ;;  %v736_v39 = vpop.f32.mrb[21].mxu0 }
 0x125   : > { %v901_v40 = vpack.c.bf16 %v6554_v28, %v6556_v24  ;;  %v810_v41 = vmul.f32 %v5056_v43, %v736_v39  ;;  %v4444_v42 = vpop.f32.mrb[22].mxu0 }
 0x126   : > { %v5221_v44 = vadd.f32 %v5062_v46, %v812_v38  ;;  %v813_v45 = vmul.f32 %v4444_v42, %v5056_v43  ;;  %v739_v48 = vpop.f32.mrb[23].mxu0 }
 0x127   : > { %4485 = vmatprep.mubr.bf16.mxu1 %v901_v40  ;;  %v5225_v49 = vadd.f32 %v5062_v46, %v810_v41  ;;  %v811_v51 = vmul.f32 %v5056_v43, %v739_v48 }
 0x128   : > { %6630 = vst [vmem:[#allocation23_spill] sm:$0xff] %v5221_v44  ;;  %4486 = vmatmul.mubr.bf16.gmra.mrb[16].mxu1 %v902_v31  ;;  %v6543_v2 = vmax.f32 %v5221_v44, 0.0  ;;  %v5230_v3 = vadd.f32 %v5062_v46, %v813_v45 }
 0x129   : > { %6631 = vst [vmem:[#allocation24_spill] sm:$0xff] %v5225_v49  ;;  %v6544_v5 = vmax.f32 %v5225_v49, 0.0  ;;  %v5234_v6 = vadd.f32 %v5062_v46, %v811_v51 }
 0x12a   : > { %6632 = vst [vmem:[#allocation25_spill] sm:$0xff] %v5230_v3  ;;  %v6541_v7 = vmax.f32 %v5230_v3, 0.0 }
 0x12b   : > { %6633 = vst [vmem:[#allocation26_spill] sm:$0xff] %v5234_v6  ;;  %v6542_v8 = vmax.f32 %v5234_v6, 0.0  ;;  %v4447_v10 = vpop.f32.mrb[24].mxu0 }
 0x12c   : > { %v904_v17 = vpack.c.bf16 %v6541_v7, %v6543_v2  ;;  %v816_v19 = vmul.f32 %v4447_v10, %v5056_v43  ;;  %v752_v21 = vpop.f32.mrb[25].mxu0 }
 0x12d   : > { %v903_v29 = vpack.c.bf16 %v6542_v8, %v6544_v5  ;;  %v814_v31 = vmul.f32 %v5056_v43, %v752_v21  ;;  %v4448_v38 = vpop.f32.mrb[26].mxu0 }
 0x12e   : > { %v5249_v39 = vadd.f32 %v5062_v46, %v816_v19  ;;  %v817_v40 = vmul.f32 %v4448_v38, %v5056_v43  ;;  %v755_v41 = vpop.f32.mrb[27].mxu0 }
 0x12f   : > { %4489 = vmatprep.mubr.bf16.mxu1 %v903_v29  ;;  %v5253_v42 = vadd.f32 %v5062_v46, %v814_v31  ;;  %v815_v45 = vmul.f32 %v5056_v43, %v755_v41 }
 0x130   : > { %6634 = vst [vmem:[#allocation27_spill] sm:$0xff] %v5249_v39  ;;  %4490 = vmatmul.mubr.bf16.gmra.mrb[20].mxu1 %v904_v17  ;;  %v6546_v48 = vmax.f32 %v5249_v39, 0.0  ;;  %v5258_v51 = vadd.f32 %v5062_v46, %v817_v40 }
 0x131   : > { %6635 = vst [vmem:[#allocation28_spill] sm:$0xff] %v5253_v42  ;;  %v6552_v10 = vmax.f32 %v5253_v42, 0.0  ;;  %v5262_v19 = vadd.f32 %v5062_v46, %v815_v45 }
 0x132   : > { %6636 = vst [vmem:[#allocation29_spill] sm:$0xff] %v5258_v51  ;;  %v6545_v21 = vmax.f32 %v5258_v51, 0.0 }
 0x133   : > { %6637 = vst [vmem:[#allocation30_spill] sm:$0xff] %v5262_v19  ;;  %v6547_v29 = vmax.f32 %v5262_v19, 0.0  ;;  %v4451_v38 = vpop.f32.mrb[28].mxu0 }
 0x134   : > { %v906_v17 = vpack.c.bf16 %v6545_v21, %v6546_v48  ;;  %v820_v31 = vmul.f32 %v4451_v38, %v5056_v43  ;;  %v768_v41 = vpop.f32.mrb[29].mxu0 }
 0x135   : > { %v905_v40 = vpack.c.bf16 %v6547_v29, %v6552_v10  ;;  %v818_v45 = vmul.f32 %v5056_v43, %v768_v41  ;;  %v4452_v7 = vpop.f32.mrb[30].mxu0 }
 0x136   : > { %v5277_v8 = vadd.f32 %v5062_v46, %v820_v31  ;;  %v821_v2 = vmul.f32 %v4452_v7, %v5056_v43  ;;  %v771_v5 = vpop.f32.mrb[31].mxu0 }
 0x137   : > { %4493 = vmatprep.mubr.bf16.mxu1 %v905_v40  ;;  %v5281_v21 = vadd.f32 %v5062_v46, %v818_v45  ;;  %v819_v38 = vmul.f32 %v5056_v43, %v771_v5  ;;  %v4699_v5 = vld [vmem:[%s6534_s7 + $0x98] sm:$0xff]   ;;  %v4703_v45 = vld [vmem:[%s6534_s7 + $0xa0] sm:$0xff]  }
 0x138   : > { %6638 = vst [vmem:[#allocation31_spill] sm:$0xff] %v5277_v8  ;;  %4494 = vmatmul.mubr.bf16.gmra.mrb[24].mxu1 %v906_v17  ;;  %v6550_v48 = vmax.f32 %v5277_v8, 0.0  ;;  %v5286_v29 = vadd.f32 %v5062_v46, %v821_v2  ;;  %v4702_v17 = vld [vmem:[%s6534_s7 + $0xe0] sm:$0xff]  }
 0x139   : > { %6639 = vst [vmem:[#allocation32_spill] sm:$0xff] %v5281_v21  ;;  %v6551_v41 = vmax.f32 %v5281_v21, 0.0  ;;  %v5290_v31 = vadd.f32 %v5062_v46, %v819_v38  ;;  %v4698_v46 = vld [vmem:[%s6534_s7 + $0xd8] sm:$0xff]   ;;  %v4700_v38 = vld [vmem:[%s6534_s7 + $0x70] sm:$0xff]  }
 0x13a   : > { %6640 = vst [vmem:[#allocation33_spill] sm:$0xff] %v5286_v29  ;;  %v6548_v7 = vmax.f32 %v5286_v29, 0.0  ;;  %4039 = vmatprep.subr.bf16.mxu1 %v4698_v46  ;;  %v4705_v46 = vld [vmem:[%s6534_s7 + $0xa8] sm:$0xff]   ;;  %3933 = vmatprep.subr.bf16.mxu0 %v4700_v38  ;;  %v6573_v38 = vmov 0  }
 0x13b   : > { %6641 = vst [vmem:[#allocation34_spill] sm:$0xff] %v5290_v31  ;;  %v6549_v40 = vmax.f32 %v5290_v31, 0.0  ;;  %4040 = vmatpush3.bf16.msra.mxu1 %v4699_v5  ;;  %v4706_v5 = vld [vmem:[%s6534_s7 + $0x78] sm:$0xff]  }
 0x13c   : > { %v908_v43 = vpack.c.bf16 %v6548_v7, %v6550_v48  ;;  %4041 = vmatprep.subr.bf16.mxu1 %v4702_v17  ;;  %v4708_v17 = vld [vmem:[%s6534_s7 + $0xf0] sm:$0xff]  }
 0x13d   : > { %v907_v2 = vpack.c.bf16 %v6549_v40, %v6551_v41  ;;  %v4709_v7 = vld [vmem:[%s6534_s7 + $0xb0] sm:$0xff]  }
 0x13f   : > { %4497 = vmatprep.mubr.bf16.mxu1 %v907_v2  ;;  %4042 = vmatpush3.bf16.msra.mxu1 %v4703_v45  ;;  %v4701_v2 = vld [vmem:[%s6534_s7 + $0x30] sm:$0xff]   ;;  %v4707_v45 = vld [vmem:[%s6534_s7 + $0x38] sm:$0xff]  }
 0x140   : > { %4498 = vmatmul.mubr.bf16.gmra.mrb[28].mxu1 %v908_v43  ;;  %v4704_v43 = vld [vmem:[%s6534_s7 + $0xe8] sm:$0xff]   ;;  %3934 = vmatpush3.bf16.msra.mxu0 %v4701_v2  ;;  %v4710_v2 = vld [vmem:[%s6534_s7 + $0xf8] sm:$0xff]  }
 0x141   : > { %4043 = vmatprep.subr.bf16.mxu1 %v4704_v43  ;;  %3935 = vmatprep.subr.bf16.mxu0 %v4706_v5  ;;  %v5339_v43 = vrot.slane %v6573_v38, 1  ;;  %v4713_v5 = vld [vmem:[%s6534_s7 + $0x100] sm:$0xff]  }
 0x143   : > { %4044 = vmatpush3.bf16.msra.mxu1 %v4705_v46  ;;  %2366 = vmatprep.mubr.bf16.mxu0 %v5339_v43  ;;  %v4711_v46 = vld [vmem:[%s6534_s7 + $0xb8] sm:$0xff]  }
 0x144   : > { %4045 = vmatprep.subr.bf16.mxu1 %v4708_v17  ;;  %3936 = vmatpush3.bf16.msra.mxu0 %v4707_v45  ;;  %v4714_v17 = vld [vmem:[%s6534_s7 + $0x148] sm:$0xff]  }
 0x145   : > { %v4715_v45 = vld [vmem:[%s6534_s7 + $0x108] sm:$0xff]  }
 0x147   : > { %4046 = vmatpush3.bf16.msra.mxu1 %v4709_v7  ;;  %2367 = vmatmul.mubr.bf16.vlgmr.msra.gmra.mrb[32].mxu0 %v6573_v38  ;;  %v4712_v7 = vld [vmem:[%s6534_s7 + $0x140] sm:$0xff]  }
 0x148   : > { %4047 = vmatprep.subr.bf16.mxu1 %v4710_v2  ;;  %4145 = vmatprep.subr.bf16.mxu0 %v4712_v7  ;;  %v4716_v2 = vld [vmem:[%s6534_s7 + $0x150] sm:$0xff]   ;;  %v4718_v7 = vld [vmem:[%s6534_s7 + $0x158] sm:$0xff]  }
 0x149   : > { %4146 = vmatpush3.bf16.msra.mxu0 %v4713_v5  ;;  %v4719_v5 = vld [vmem:[%s6534_s7 + $0x118] sm:$0xff]  }
 0x14a   : > { %4147 = vmatprep.subr.bf16.mxu0 %v4714_v17  ;;  %v4720_v17 = vld [vmem:[%s6534_s7 + $0x1c0] sm:$0xff]  }
 0x14b   : > { %4048 = vmatpush3.bf16.msra.mxu1 %v4711_v46  ;;  %v4717_v46 = vld [vmem:[%s6534_s7 + $0x110] sm:$0xff]  }
 0x14c   : > { %4257 = vmatprep.subr.bf16.mxu1 %v4720_v17  ;;  %v4731_v17 = vld [vmem:[%s6534_s7 + $0x130] sm:$0xff]  }
 0x14d   : > { %4148 = vmatpush3.bf16.msra.mxu0 %v4715_v45  ;;  %v4722_v45 = vld [vmem:[%s6534_s7 + $0x160] sm:$0xff]  }
 0x14e   : > { %4149 = vmatprep.subr.bf16.mxu0 %v4716_v2  ;;  %v4723_v2 = vld [vmem:[%s6534_s7 + $0x120] sm:$0xff]  }
 0x151   : > { %4150 = vmatpush3.bf16.msra.mxu0 %v4717_v46  ;;  %v4726_v46 = vld [vmem:[%s6534_s7 + $0x168] sm:$0xff]  }
 0x152   : > { %4151 = vmatprep.subr.bf16.mxu0 %v4718_v7  ;;  %v4727_v7 = vld [vmem:[%s6534_s7 + $0x128] sm:$0xff]  }
 0x155   : > { %4152 = vmatpush3.bf16.msra.mxu0 %v4719_v5  ;;  %v4730_v5 = vld [vmem:[%s6534_s7 + $0x170] sm:$0xff]  }
 0x156   : > { %4153 = vmatprep.subr.bf16.mxu0 %v4722_v45  ;;  %v5397_v45 = vld [vmem:[%s6532_s5] ss:$0 sm:$0xff] }
 0x159   : > { %4154 = vmatpush3.bf16.msra.mxu0 %v4723_v2  ;;  %v4734_v2 = vld [vmem:[%s6534_s7 + $0x178] sm:$0xff]  }
 0x15a   : > { %4155 = vmatprep.subr.bf16.mxu0 %v4726_v46 }
 0x15d   : > { %4156 = vmatpush3.bf16.msra.mxu0 %v4727_v7  ;;  %v5405_v7 = vld [vmem:[%s6533_s6] ss:$0 sm:$0xff] }
 0x15e   : > { %4157 = vmatprep.subr.bf16.mxu0 %v4730_v5 }
 0x161   : > { %4158 = vmatpush3.bf16.msra.mxu0 %v4731_v17 }
 0x162   : > { %4159 = vmatprep.subr.bf16.mxu0 %v4734_v2  ;;  %v4735_v2 = vld [vmem:[%s6534_s7 + $0x138] sm:$0xff]  }
 0x165   : > { %4160 = vmatpush3.bf16.msra.mxu0 %v4735_v2 }
 0x1db   : > { %v4471_v46 = vpop.f32.mrb[0].mxu1 }
 0x1dc   : > { %v1143_v5 = vmul.f32 %v4471_v46, %v5397_v45  ;;  %v1007_v40 = vpop.f32.mrb[1].mxu1 }
 0x1dd   : > { %v1141_v17 = vmul.f32 %v5397_v45, %v1007_v40  ;;  %v4472_v48 = vpop.f32.mrb[2].mxu1 }
 0x1de   : > { %v1182_v41 = vadd.f32 %v5405_v7, %v1143_v5  ;;  %v1144_v10 = vmul.f32 %v4472_v48, %v5397_v45  ;;  %v1010_v26 = vpop.f32.mrb[3].mxu1 }
 0x1df   : > { %v1180_v28 = vadd.f32 %v5405_v7, %v1141_v17  ;;  %v1142_v22 = vmul.f32 %v5397_v45, %v1010_v26 }
 0x1e0   : > { %v1183_v24 = vadd.f32 %v5405_v7, %v1144_v10  ;;  %v1214_v46 = vmax.f32 %v1182_v41, 0.0 }
 0x1e1   : > { %v1181_v0 = vadd.f32 %v5405_v7, %v1142_v22  ;;  %v1212_v1 = vmax.f32 %v1180_v28, 0.0 }
 0x1e2   : > { %v1215_v40 = vmax.f32 %v1183_v24, 0.0 }
 0x1e3   : > { %v1213_v52 = vmax.f32 %v1181_v0, 0.0  ;;  %v4475_v5 = vpop.f32.mrb[4].mxu1 }
 0x1e4   : > { %v1245_v48 = vpack.c.bf16 %v1215_v40, %v1214_v46  ;;  %v1147_v62 = vmul.f32 %v4475_v5, %v5397_v45  ;;  %v1023_v17 = vpop.f32.mrb[5].mxu1 }
 0x1e5   : > { %v1244_v36 = vpack.c.bf16 %v1213_v52, %v1212_v1  ;;  %v1145_v26 = vmul.f32 %v5397_v45, %v1023_v17  ;;  %v4476_v10 = vpop.f32.mrb[6].mxu1 }
 0x1e6   : > { %v1268_v22 = vshrl.u32 %v1245_v48, 16  ;;  %v1186_v37 = vadd.f32 %v5405_v7, %v1147_v62  ;;  %v1148_v41 = vmul.f32 %v4476_v10, %v5397_v45  ;;  %v1026_v24 = vpop.f32.mrb[7].mxu1  ;;  %v1271_v40 = vshll.u32 %v1245_v48, 16 }
 0x1e7   : > { %v1261_v28 = vshrl.u32 %v1244_v36, 16  ;;  %v1184_v0 = vadd.f32 %v5405_v7, %v1145_v26  ;;  %v1146_v2 = vmul.f32 %v5397_v45, %v1026_v24  ;;  %v1264_v32 = vshll.u32 %v1244_v36, 16 }
 0x1e8   : > { %v1270_v46 = vrot.slane %v1268_v22, 7  ;;  %v1218_v5 = vmax.f32 %v1186_v37, 0.0  ;;  %v1187_v52 = vadd.f32 %v5405_v7, %v1148_v41  ;;  %v5437_v37 = vld [vmem:[%s6534_s7 + $0x200] sm:$0xff]  }
 0x1e9   : > { %v1263_v17 = vrot.slane %v1261_v28, 7  ;;  %v1216_v62 = vmax.f32 %v1184_v0, 0.0  ;;  %v1185_v10 = vadd.f32 %v5405_v7, %v1146_v2  ;;  %4501 = vmatprep.subr.bf16.mxu0 %v5437_v37 }
 0x1ea   : > { %v1273_v34 = vor.u32 %v1271_v40, %v1270_v46  ;;  %v1219_v16 = vmax.f32 %v1187_v52, 0.0  ;;  %v5432_v48 = vsel %vm5425_vm5, %v1270_v46, 0  ;;  %v4724_v46 = vld [vmem:[%s6534_s7 + $0x1c8] sm:$0xff]  }
 0x1eb   : > { %v1217_v18 = vmax.f32 %v1185_v10, 0.0  ;;  %v1266_v26 = vor.u32 %v1264_v32, %v1263_v17  ;;  %v4479_v11 = vpop.f32.mrb[8].mxu1  ;;  %v1423_v24 = vsel %vm5425_vm5, %v1263_v17, 0  ;;  %v4721_v32 = vld [vmem:[%s6534_s7 + $0x180] sm:$0xff]  }
 0x1ec   : > { %v1247_v22 = vpack.c.bf16 %v1219_v16, %v1218_v5  ;;  %v1151_v36 = vmul.f32 %v4479_v11, %v5397_v45  ;;  %v1039_v41 = vpop.f32.mrb[9].mxu1  ;;  %v5451_v16 = vsel %vm5425_vm5, 0, %v1273_v34  ;;  %v1468_v34 = vshll.u32 %v5432_v48, 16 }
 0x1ed   : > { %v1246_v28 = vpack.c.bf16 %v1217_v18, %v1216_v62  ;;  %v5447_v0 = vsel %vm5425_vm5, 0, %v1266_v26  ;;  %v1149_v11 = vmul.f32 %v5397_v45, %v1039_v41  ;;  %v4480_v2 = vpop.f32.mrb[10].mxu1  ;;  %v1456_v57 = vshll.u32 %v1423_v24, 16 }
 0x1ee   : > { %v1282_v40 = vshrl.u32 %v1247_v22, 16  ;;  %2527 = vmatprep.mubr.bf16.mxu1 %v5447_v0  ;;  %v1190_v18 = vadd.f32 %v5405_v7, %v1151_v36  ;;  %v1152_v5 = vmul.f32 %v4480_v2, %v5397_v45  ;;  %v1042_v52 = vpop.f32.mrb[11].mxu1  ;;  %v1461_v36 = vshrl.u32 %v5451_v16, 16  ;;  %v4725_v2 = vld [vmem:[%s6534_s7 + $0x188] sm:$0xff]  }
 0x1ef   : > { %v1275_v17 = vshrl.u32 %v1246_v28, 16  ;;  %v1278_v62 = vshll.u32 %v1246_v28, 16  ;;  %2528 = vmatmul.mubr.bf16.vlgmr.msra.gmra.mrb[32].mxu1 %v5339_v43  ;;  %v1188_v10 = vadd.f32 %v5405_v7, %v1149_v11  ;;  %v1150_v26 = vmul.f32 %v5397_v45, %v1042_v52 }
 0x1f0   : > { %v1222_v41 = vmax.f32 %v1190_v18, 0.0  ;;  %2535 = vmatprep.mubr.bf16.mxu1 %v5451_v16  ;;  %v1191_v13 = vadd.f32 %v5405_v7, %v1152_v5  ;;  %4258 = vmatpush3.bf16.msra.mxu1 %v4721_v32  ;;  %v1451_v11 = vshll.u32 %v5447_v0, 16  ;;  %v4728_v18 = vld [vmem:[%s6534_s7 + $0x1d0] sm:$0xff]   ;;  %v5476_v5 = vrot.slane %v1282_v40, 7 }
 0x1f1   : > { %v1277_v28 = vrot.slane %v1275_v17, 7  ;;  %v1220_v60 = vmax.f32 %v1188_v10, 0.0  ;;  %v1189_v61 = vadd.f32 %v5405_v7, %v1150_v26  ;;  %4259 = vmatprep.subr.bf16.mxu1 %v4724_v46  ;;  %v1285_v52 = vshll.u32 %v1247_v22, 16 }
 0x1f2   : > { %v1223_v59 = vmax.f32 %v1191_v13, 0.0  ;;  %v1463_v32 = vshll.u32 %v5451_v16, 16  ;;  %v1449_v17 = vshrl.u32 %v5447_v0, 16  ;;  %v1453_v10 = vrot.slane %v1451_v11, 1 }
 0x1f3   : > { %v1280_v38 = vor.u32 %v1278_v62, %v1277_v28  ;;  %v1221_v29 = vmax.f32 %v1189_v61, 0.0  ;;  %v4483_v31 = vpop.f32.mrb[12].mxu1  ;;  %v1678_v46 = vrot.slane %v5447_v0, 1  ;;  %v1679_v21 = vrot.slane %v1423_v24, 1 }
 0x1f4   : > { %v5480_v26 = vpack.c.bf16 %v1223_v59, %v1222_v41  ;;  %v1465_v8 = vrot.slane %v1463_v32, 1  ;;  %v1055_v51 = vpop.f32.mrb[13].mxu1  ;;  %4260 = vmatpush3.bf16.msra.mxu1 %v4725_v2  ;;  %v1454_v19 = vor.u32 %v1453_v10, %v1449_v17  ;;  %v1458_v22 = vrot.slane %v1456_v57, 1  ;;  %v4729_v59 = vld [vmem:[%s6534_s7 + $0x190] sm:$0xff]   ;;  %v4732_v57 = vld [vmem:[%s6534_s7 + $0x1d8] sm:$0xff]   ;;  %v4736_v17 = vld [vmem:[%s6534_s7 + $0x1e0] sm:$0xff]  }
 0x1f5   : > { %v1248_v40 = vpack.c.bf16 %v1221_v29, %v1220_v60  ;;  %v5485_v13 = vsel %vm5425_vm5, 0, %v1280_v38  ;;  %v4484_v61 = vpop.f32.mrb[14].mxu1  ;;  %4261 = vmatprep.subr.bf16.mxu1 %v4728_v18  ;;  %v1287_v62 = vor.u32 %v1285_v52, %v5476_v5  ;;  %v5492_v24 = vsel %vm1675_vm7, %v1678_v46, %v1679_v21  ;;  %v4733_v52 = vld [vmem:[%s6534_s7 + $0x198] sm:$0xff]  }
 0x1f6   : > { %v1466_v41 = vor.u32 %v1465_v8, %v1461_v36  ;;  %v1058_v2 = vpop.f32.mrb[15].mxu1  ;;  %v5498_v29 = vsel %vm1439_vm6, %v1454_v19, %v1458_v22  ;;  %v1470_v38 = vrot.slane %v1468_v34, 1  ;;  %v5505_v8 = vsel %vm5425_vm5, %v1277_v28, 0 }
 0x1f7   : > { %v1289_v60 = vshrl.u32 %v1248_v40, 16  ;;  %2536 = vmatmul.mubr.bf16.gmra.mrb[36].mxu1 %v5492_v24  ;;  %v1292_v11 = vshll.u32 %v1248_v40, 16  ;;  %2374 = vmatprep.mubr.bf16.mxu0 %v5498_v29  ;;  %v1475_v21 = vshll.u32 %v5485_v13, 16  ;;  %v1681_v34 = vrot.slane %v5451_v16, 1 }
 0x1f8   : > { %2543 = vmatprep.mubr.bf16.mxu1 %v5485_v13  ;;  %2375 = vmatmul.mubr.bf16.gmra.mrb[36].mxu0 %v5447_v0  ;;  %v5512_v19 = vsel %vm1439_vm6, %v1466_v41, %v1470_v38  ;;  %v1155_v18 = vmul.f32 %v4483_v31, %v5397_v45  ;;  %v1473_v28 = vshrl.u32 %v5485_v13, 16  ;;  %v5523_v0 = vsel %vm5425_vm5, 0, %v1287_v62 }
 0x1f9   : > { %v5508_v36 = vrot.slane %v1289_v60, 7  ;;  %4262 = vmatpush3.bf16.msra.mxu1 %v4729_v59  ;;  %2382 = vmatprep.mubr.bf16.mxu0 %v5512_v19  ;;  %v1477_v32 = vrot.slane %v1475_v21, 1  ;;  %v1480_v31 = vshll.u32 %v5505_v8, 16  ;;  %v1682_v10 = vrot.slane %v5432_v48, 1 }
 0x1fa   : > { %4263 = vmatprep.subr.bf16.mxu1 %v4732_v57  ;;  %v1194_v46 = vadd.f32 %v5405_v7, %v1155_v18  ;;  %v1153_v40 = vmul.f32 %v5397_v45, %v1055_v51  ;;  %v1296_v59 = vshrl.u32 %v5480_v26, 16  ;;  %v1156_v62 = vmul.f32 %v4484_v61, %v5397_v45  ;;  %v4737_v51 = vld [vmem:[%s6534_s7 + $0x1a0] sm:$0xff]  }
 0x1fb   : > { %v4487_v22 = vpop.f32.mrb[16].mxu1  ;;  %v1294_v41 = vor.u32 %v1292_v11, %v5508_v36  ;;  %v1154_v57 = vmul.f32 %v5397_v45, %v1058_v2  ;;  %v1478_v38 = vor.u32 %v1477_v32, %v1473_v28  ;;  %v5537_v21 = vsel %vm1675_vm7, %v1681_v34, %v1682_v10 }
 0x1fc   : > { %v1071_v60 = vpop.f32.mrb[17].mxu1  ;;  %v1192_v48 = vadd.f32 %v5405_v7, %v1153_v40  ;;  %v1487_v18 = vshll.u32 %v5523_v0, 16  ;;  %v1226_v11 = vmax.f32 %v1194_v46, 0.0  ;;  %v1195_v61 = vadd.f32 %v5405_v7, %v1156_v62 }
 0x1fd   : > { %v4488_v39 = vpop.f32.mrb[18].mxu1  ;;  %4264 = vmatpush3.bf16.msra.mxu1 %v4733_v52  ;;  %v1193_v2 = vadd.f32 %v5405_v7, %v1154_v57  ;;  %v5549_v34 = vsel %vm5425_vm5, %v5476_v5, 0  ;;  %v4738_v52 = vld [vmem:[%s6534_s7 + $0x1e8] sm:$0xff]   ;;  %v1482_v32 = vrot.slane %v1480_v31, 1  ;;  %v5555_v46 = vrot.slane %v1296_v59, 7 }
 0x1fe   : > { %v1074_v28 = vpop.f32.mrb[19].mxu1  ;;  %4265 = vmatprep.subr.bf16.mxu1 %v4736_v17  ;;  %v1224_v10 = vmax.f32 %v1192_v48, 0.0  ;;  %v1299_v40 = vshll.u32 %v5480_v26, 16  ;;  %v1227_v62 = vmax.f32 %v1195_v61, 0.0  ;;  %v1489_v17 = vrot.slane %v1487_v18, 1  ;;  %v4739_v26 = vld [vmem:[%s6534_s7 + $0x1a8] sm:$0xff]  }
 0x1ff   : > { %2544 = vmatmul.mubr.bf16.gmra.mrb[40].mxu1 %v5537_v21  ;;  %v1225_v57 = vmax.f32 %v1193_v2, 0.0  ;;  %v5561_v5 = vsel %vm1439_vm6, %v1478_v38, %v1482_v32  ;;  %v1492_v42 = vshll.u32 %v5549_v34, 16  ;;  %v5566_v31 = vsel %vm5425_vm5, 0, %v1294_v41  ;;  %v4740_v41 = vld [vmem:[%s6534_s7 + $0x1f0] sm:$0xff]  }
 0x200   : > { %2551 = vmatprep.mubr.bf16.mxu1 %v5523_v0  ;;  %2383 = vmatmul.mubr.bf16.gmra.mrb[40].mxu0 %v5451_v16  ;;  %v5572_v59 = vpack.c.bf16 %v1227_v62, %v1226_v11  ;;  %v1684_v38 = vrot.slane %v5485_v13, 1  ;;  %v1685_v18 = vrot.slane %v5505_v8, 1  ;;  %v1159_v61 = vmul.f32 %v4487_v22, %v5397_v45  ;;  %v4741_v22 = vld [vmem:[%s6534_s7 + $0x1b0] sm:$0xff]  }
 0x201   : > { %4266 = vmatpush3.bf16.msra.mxu1 %v4737_v51  ;;  %2390 = vmatprep.mubr.bf16.mxu0 %v5561_v5  ;;  %v1250_v48 = vpack.c.bf16 %v1225_v57, %v1224_v10  ;;  %v1485_v51 = vshrl.u32 %v5523_v0, 16  ;;  %v5586_v11 = vsel %vm5425_vm5, %v5508_v36, 0  ;;  %v1499_v10 = vshll.u32 %v5566_v31, 16 }
 0x202   : > { %4267 = vmatprep.subr.bf16.mxu1 %v4738_v52  ;;  %v1198_v62 = vadd.f32 %v5405_v7, %v1159_v61  ;;  %v1301_v3 = vor.u32 %v1299_v40, %v5555_v46  ;;  %v1494_v6 = vrot.slane %v1492_v42, 1  ;;  %v5599_v36 = vsel %vm1675_vm7, %v1684_v38, %v1685_v18 }
 0x203   : > { %v5581_v2 = vpop.f32.mrb[20].mxu1  ;;  %v1303_v32 = vshrl.u32 %v1250_v48, 16  ;;  %v1490_v52 = vor.u32 %v1489_v17, %v1485_v51  ;;  %v1157_v44 = vmul.f32 %v5397_v45, %v1071_v60  ;;  %v4742_v17 = vld [vmem:[%s6534_s7 + $0x1f8] sm:$0xff]   ;;  %v1504_v51 = vshll.u32 %v5586_v11, 16 }
 0x204   : > { %v5589_v8 = vpop.f32.mrb[21].mxu1  ;;  %v1160_v40 = vmul.f32 %v4488_v39, %v5397_v45  ;;  %v1158_v42 = vmul.f32 %v5397_v45, %v1074_v28  ;;  %v1306_v18 = vshll.u32 %v1250_v48, 16  ;;  %v1501_v60 = vrot.slane %v1499_v10, 1  ;;  %v4743_v39 = vld [vmem:[%s6534_s7 + $0x1b8] sm:$0xff]  }
 0x205   : > { %v5592_v57 = vpop.f32.mrb[22].mxu1  ;;  %4268 = vmatpush3.bf16.msra.mxu1 %v4739_v26  ;;  %v1497_v26 = vshrl.u32 %v5566_v31, 16  ;;  %v1305_v38 = vrot.slane %v1303_v32, 7  ;;  %v5614_v61 = vsel %vm1439_vm6, %v1490_v52, %v1494_v6  ;;  %v1230_v23 = vmax.f32 %v1198_v62, 0.0 }
 0x206   : > { %v1090_v49 = vpop.f32.mrb[23].mxu1  ;;  %4269 = vmatprep.subr.bf16.mxu1 %v4740_v41  ;;  %v1196_v41 = vadd.f32 %v5405_v7, %v1157_v44  ;;  %v1199_v25 = vadd.f32 %v5405_v7, %v1160_v40  ;;  %v1197_v15 = vadd.f32 %v5405_v7, %v1158_v42  ;;  %v1687_v28 = vrot.slane %v5523_v0, 1 }
 0x207   : > { %2552 = vmatmul.mubr.bf16.gmra.mrb[44].mxu1 %v5599_v36  ;;  %v1688_v44 = vrot.slane %v5549_v34, 1  ;;  %v5626_v6 = vsel %vm5425_vm5, 0, %v1301_v3  ;;  %v1310_v32 = vshrl.u32 %v5572_v59, 16  ;;  %v1502_v40 = vor.u32 %v1501_v60, %v1497_v26 }
 0x208   : > { %2559 = vmatprep.mubr.bf16.mxu1 %v5566_v31  ;;  %2391 = vmatmul.mubr.bf16.gmra.mrb[44].mxu0 %v5485_v13  ;;  %v1228_v48 = vmax.f32 %v1196_v41, 0.0  ;;  %v1231_v10 = vmax.f32 %v1199_v25, 0.0  ;;  %v1229_v52 = vmax.f32 %v1197_v15, 0.0  ;;  %v1506_v42 = vrot.slane %v1504_v51, 1 }
 0x209   : > { %4270 = vmatpush3.bf16.msra.mxu1 %v4741_v22  ;;  %2398 = vmatprep.mubr.bf16.mxu0 %v5614_v61  ;;  %v1308_v22 = vor.u32 %v1306_v18, %v1305_v38  ;;  %v1511_v3 = vshll.u32 %v5626_v6, 16  ;;  %v5646_v15 = vsel %vm5425_vm5, %v5555_v46, 0  ;;  %v1312_v26 = vrot.slane %v1310_v32, 7 }
 0x20a   : > { %4271 = vmatprep.subr.bf16.mxu1 %v4742_v17  ;;  %v5633_v58 = vpack.c.bf16 %v1231_v10, %v1230_v23  ;;  %v5635_v34 = vpack.c.bf16 %v1229_v52, %v1228_v48  ;;  %v5641_v17 = vsel %vm1675_vm7, %v1687_v28, %v1688_v44  ;;  %v1313_v23 = vshll.u32 %v5572_v59, 16 }
 0x20b   : > { %v5629_v62 = vpop.f32.mrb[24].mxu1  ;;  %v5653_v51 = vsel %vm1439_vm6, %v1502_v40, %v1506_v42  ;;  %v1509_v18 = vshrl.u32 %v5626_v6, 16  ;;  %v5659_v60 = vsel %vm5425_vm5, 0, %v1308_v22  ;;  %v1513_v46 = vrot.slane %v1511_v3, 1 }
 0x20c   : > { %v5631_v20 = vpop.f32.mrb[25].mxu1  ;;  %v1516_v41 = vshll.u32 %v5646_v15, 16  ;;  %v1690_v59 = vrot.slane %v5566_v31, 1  ;;  %v1691_v28 = vrot.slane %v5586_v11, 1  ;;  %v1161_v44 = vmul.f32 %v5397_v45, %v5589_v8 }
 0x20d   : > { %v5638_v63 = vpop.f32.mrb[26].mxu1  ;;  %4272 = vmatpush3.bf16.msra.mxu1 %v4743_v39  ;;  %v1163_v39 = vmul.f32 %v5581_v2, %v5397_v45  ;;  %v1164_v48 = vmul.f32 %v5592_v57, %v5397_v45  ;;  %v1162_v32 = vmul.f32 %v5397_v45, %v1090_v49  ;;  %v1315_v10 = vor.u32 %v1313_v23, %v1312_v26 }
 0x20e   : > { %v5648_v25 = vpop.f32.mrb[27].mxu1  ;;  %v1523_v52 = vshll.u32 %v5659_v60, 16  ;;  %v5679_v2 = vsel %vm5425_vm5, %v1305_v38, 0  ;;  %v1200_v11 = vadd.f32 %v5405_v7, %v1161_v44  ;;  %v1317_v49 = vshrl.u32 %v5635_v34, 16 }
 0x20f   : > { %2560 = vmatmul.mubr.bf16.gmra.mrb[48].mxu1 %v5641_v17  ;;  %v1202_v22 = vadd.f32 %v5405_v7, %v1163_v39  ;;  %v1203_v8 = vadd.f32 %v5405_v7, %v1164_v48  ;;  %v1201_v42 = vadd.f32 %v5405_v7, %v1162_v32  ;;  %v1514_v3 = vor.u32 %v1513_v46, %v1509_v18 }
 0x210   : > { %2567 = vmatprep.mubr.bf16.mxu1 %v5626_v6  ;;  %2399 = vmatmul.mubr.bf16.gmra.mrb[48].mxu0 %v5523_v0  ;;  %v1518_v23 = vrot.slane %v1516_v41, 1  ;;  %v5690_v50 = vsel %vm1675_vm7, %v1690_v59, %v1691_v28  ;;  %v1232_v38 = vmax.f32 %v1200_v11, 0.0  ;;  %v1521_v48 = vshrl.u32 %v5659_v60, 16 }
 0x211   : > { %2406 = vmatprep.mubr.bf16.mxu0 %v5653_v51  ;;  %v1234_v47 = vmax.f32 %v1202_v22, 0.0  ;;  %v1235_v33 = vmax.f32 %v1203_v8, 0.0  ;;  %v1233_v35 = vmax.f32 %v1201_v42, 0.0  ;;  %v1525_v32 = vrot.slane %v1523_v52, 1 }
 0x212   : > { %v1528_v27 = vshll.u32 %v5679_v2, 16  ;;  %v1319_v41 = vrot.slane %v1317_v49, 7  ;;  %v1320_v59 = vshll.u32 %v5635_v34, 16  ;;  %v5705_v28 = vsel %vm1439_vm6, %v1514_v3, %v1518_v23 }
 0x213   : > { %v5675_v40 = vpop.f32.mrb[28].mxu1  ;;  %v5698_v18 = vpack.c.bf16 %v1235_v33, %v1234_v47  ;;  %v5700_v46 = vpack.c.bf16 %v1233_v35, %v1232_v38  ;;  %v5709_v22 = vsel %vm5425_vm5, 0, %v1315_v10  ;;  %v1693_v52 = vrot.slane %v5626_v6, 1 }
 0x214   : > { %v5684_v57 = vpop.f32.mrb[29].mxu1  ;;  %v1694_v33 = vrot.slane %v5646_v15, 1  ;;  %v1526_v35 = vor.u32 %v1525_v32, %v1521_v48  ;;  %v1530_v47 = vrot.slane %v1528_v27, 1  ;;  %v1535_v11 = vshll.u32 %v5709_v22, 16 }
 0x215   : > { %v5687_v39 = vpop.f32.mrb[30].mxu1  ;;  %v1167_v34 = vmul.f32 %v5629_v62, %v5397_v45  ;;  %v1322_v8 = vor.u32 %v1320_v59, %v1319_v41  ;;  %v5719_v42 = vsel %vm5425_vm5, %v1312_v26, 0  ;;  %v1165_v10 = vmul.f32 %v5397_v45, %v5631_v20 }
 0x216   : > { %v5692_v44 = vpop.f32.mrb[31].mxu1  ;;  %v1168_v49 = vmul.f32 %v5638_v63, %v5397_v45  ;;  %v1324_v15 = vshrl.u32 %v5633_v58, 16  ;;  %v5727_v27 = vsel %vm1675_vm7, %v1693_v52, %v1694_v33  ;;  %v5731_v62 = vsel %vm1439_vm6, %v1526_v35, %v1530_v47 }
 0x217   : > { %2568 = vmatmul.mubr.bf16.gmra.mrb[52].mxu1 %v5690_v50  ;;  %v1206_v3 = vadd.f32 %v5405_v7, %v1167_v34  ;;  %v1204_v26 = vadd.f32 %v5405_v7, %v1165_v10  ;;  %v1166_v20 = vmul.f32 %v5397_v45, %v5648_v25  ;;  %v1533_v63 = vshrl.u32 %v5709_v22, 16 }
 0x218   : > { %2575 = vmatprep.mubr.bf16.mxu1 %v5659_v60  ;;  %2407 = vmatmul.mubr.bf16.gmra.mrb[52].mxu0 %v5566_v31  ;;  %v1207_v23 = vadd.f32 %v5405_v7, %v1168_v49  ;;  %v1537_v38 = vrot.slane %v1535_v11, 1  ;;  %v1540_v48 = vshll.u32 %v5719_v42, 16  ;;  %v5744_v59 = vsel %vm5425_vm5, 0, %v1322_v8 }
 0x219   : > { %2414 = vmatprep.mubr.bf16.mxu0 %v5705_v28  ;;  %v1238_v32 = vmax.f32 %v1206_v3, 0.0  ;;  %v1236_v52 = vmax.f32 %v1204_v26, 0.0  ;;  %v1205_v35 = vadd.f32 %v5405_v7, %v1166_v20  ;;  %v1326_v47 = vrot.slane %v1324_v15, 7 }
 0x21a   : > { %v1239_v33 = vmax.f32 %v1207_v23, 0.0  ;;  %v1327_v25 = vshll.u32 %v5633_v58, 16  ;;  %v1696_v11 = vrot.slane %v5659_v60, 1  ;;  %v1697_v34 = vrot.slane %v5679_v2, 1 }
 0x21b   : > { %v1237_v49 = vmax.f32 %v1205_v35, 0.0  ;;  %v1538_v3 = vor.u32 %v1537_v38, %v1533_v63  ;;  %v1542_v30 = vrot.slane %v1540_v48, 1  ;;  %v1431_v8 = vsel %vm5425_vm5, %v1319_v41, 0 }
 0x21c   : > { %v5751_v10 = vpack.c.bf16 %v1239_v33, %v1238_v32  ;;  %v1547_v26 = vshll.u32 %v5744_v59, 16  ;;  %v1331_v15 = vshrl.u32 %v5700_v46, 16  ;;  %v1329_v58 = vor.u32 %v1327_v25, %v1326_v47 }
 0x21d   : > { %v5757_v23 = vpack.c.bf16 %v1237_v49, %v1236_v52  ;;  %v5760_v20 = vsel %vm1675_vm7, %v1696_v11, %v1697_v34  ;;  %v1545_v2 = vshrl.u32 %v5744_v59, 16  ;;  %v1552_v32 = vshll.u32 %v1431_v8, 16 }
 0x21e   : > { %v1334_v63 = vshll.u32 %v5700_v46, 16  ;;  %v5766_v38 = vsel %vm1439_vm6, %v1538_v3, %v1542_v30  ;;  %v1549_v41 = vrot.slane %v1547_v26, 1  ;;  %v1171_v48 = vmul.f32 %v5675_v40, %v5397_v45 }
 0x21f   : > { %2576 = vmatmul.mubr.bf16.gmra.mrb[56].mxu1 %v5727_v27  ;;  %v1333_v52 = vrot.slane %v1331_v15, 7  ;;  %v1699_v33 = vrot.slane %v5709_v22, 1  ;;  %v1169_v35 = vmul.f32 %v5397_v45, %v5684_v57  ;;  %v1172_v46 = vmul.f32 %v5687_v39, %v5397_v45 }
 0x220   : > { %2583 = vmatprep.mubr.bf16.mxu1 %v5709_v22  ;;  %2415 = vmatmul.mubr.bf16.gmra.mrb[56].mxu0 %v5626_v6  ;;  %v1700_v30 = vrot.slane %v5719_v42, 1  ;;  %v5781_v25 = vsel %vm5425_vm5, 0, %v1329_v58  ;;  %v1210_v40 = vadd.f32 %v5405_v7, %v1171_v48  ;;  %v1170_v11 = vmul.f32 %v5397_v45, %v5692_v44 }
 0x221   : > { %2422 = vmatprep.mubr.bf16.mxu0 %v5731_v62  ;;  %v1208_v34 = vadd.f32 %v5405_v7, %v1169_v35  ;;  %v1211_v57 = vadd.f32 %v5405_v7, %v1172_v46  ;;  %v1338_v49 = vshrl.u32 %v5698_v18, 16  ;;  %v1554_v39 = vrot.slane %v1552_v32, 1 }
 0x222   : > { %v1242_v3 = vmax.f32 %v1210_v40, 0.0  ;;  %v1209_v26 = vadd.f32 %v5405_v7, %v1170_v11  ;;  %v1550_v42 = vor.u32 %v1549_v41, %v1545_v2  ;;  %v1559_v15 = vshll.u32 %v5781_v25, 16 }
 0x223   : > { %v1240_v58 = vmax.f32 %v1208_v34, 0.0  ;;  %v1243_v12 = vmax.f32 %v1211_v57, 0.0  ;;  %v1336_v14 = vor.u32 %v1334_v63, %v1333_v52  ;;  %v5792_v48 = vsel %vm1675_vm7, %v1699_v33, %v1700_v30 }
 0x224   : > { %v1432_v45 = vsel %vm5425_vm5, %v1326_v47, 0  ;;  %v1241_v44 = vmax.f32 %v1209_v26, 0.0  ;;  %v1341_v32 = vshll.u32 %v5698_v18, 16  ;;  %v5805_v2 = vsel %vm1439_vm6, %v1550_v42, %v1554_v39 }
 0x225   : > { %v5797_v35 = vpack.c.bf16 %v1243_v12, %v1242_v3  ;;  %v1557_v63 = vshrl.u32 %v5781_v25, 16  ;;  %v1561_v41 = vrot.slane %v1559_v15, 1  ;;  %v1564_v47 = vshll.u32 %v1432_v45, 16 }
 0x226   : > { %v5801_v7 = vpack.c.bf16 %v1241_v44, %v1240_v58  ;;  %v1340_v33 = vrot.slane %v1338_v49, 7  ;;  %v1702_v12 = vrot.slane %v5744_v59, 1  ;;  %v1703_v46 = vrot.slane %v1431_v8, 1 }
 0x227   : > { %2584 = vmatmul.mubr.bf16.gmra.mrb[60].mxu1 %v5760_v20  ;;  %v5812_v18 = vsel %vm5425_vm5, 0, %v1336_v14  ;;  %v1562_v30 = vor.u32 %v1561_v41, %v1557_v63  ;;  %v1566_v40 = vrot.slane %v1564_v47, 1  ;;  %v1345_v57 = vshrl.u32 %v5757_v23, 16 }
 0x228   : > { %2591 = vmatprep.mubr.bf16.mxu1 %v5744_v59  ;;  %2423 = vmatmul.mubr.bf16.gmra.mrb[60].mxu0 %v5659_v60  ;;  %v1571_v11 = vshll.u32 %v5812_v18, 16  ;;  %v1343_v34 = vor.u32 %v1341_v32, %v1340_v33  ;;  %v5817_v39 = vsel %vm1675_vm7, %v1702_v12, %v1703_v46  ;;  %v1433_v49 = vsel %vm5425_vm5, %v1333_v52, 0 }
 0x229   : > { %2430 = vmatprep.mubr.bf16.mxu0 %v5766_v38  ;;  %v1569_v14 = vshrl.u32 %v5812_v18, 16  ;;  %v5826_v8 = vsel %vm1439_vm6, %v1562_v30, %v1566_v40  ;;  %v1576_v26 = vshll.u32 %v1433_v49, 16  ;;  %v1705_v42 = vrot.slane %v5781_v25, 1  ;;  %v3937_v30 = vpop.f32.mrb[32].mxu0 }
 0x22a   : > { %v1573_v3 = vrot.slane %v1571_v11, 1  ;;  %v1347_v15 = vrot.slane %v1345_v57, 7  ;;  %v1348_v58 = vshll.u32 %v5757_v23, 16  ;;  %v1706_v52 = vrot.slane %v1432_v45, 1 }
 0x22b   : > { %v5833_v44 = vsel %vm5425_vm5, 0, %v1343_v34  ;;  %v1352_v32 = vshrl.u32 %v5751_v10, 16  ;;  %v1578_v41 = vrot.slane %v1576_v26, 1  ;;  %v1434_v23 = vsel %vm5425_vm5, %v1340_v33, 0 }
 0x22c   : > { %v1574_v63 = vor.u32 %v1573_v3, %v1569_v14  ;;  %v1583_v47 = vshll.u32 %v5833_v44, 16  ;;  %v1350_v12 = vor.u32 %v1348_v58, %v1347_v15  ;;  %v5838_v46 = vsel %vm1675_vm7, %v1705_v42, %v1706_v52  ;;  %v3938_v3 = vpop.f32.mrb[33].mxu0 }
 0x22d   : > { %v1354_v45 = vrot.slane %v1352_v32, 7  ;;  %v1355_v40 = vshll.u32 %v5751_v10, 16  ;;  %v1581_v34 = vshrl.u32 %v5833_v44, 16  ;;  %v1588_v14 = vshll.u32 %v1434_v23, 16  ;;  %v3940_v58 = vpop.f32.mrb[34].mxu0 }
 0x22e   : > { %v5847_v11 = vsel %vm1439_vm6, %v1574_v63, %v1578_v41  ;;  %v1585_v57 = vrot.slane %v1583_v47, 1  ;;  %v1708_v33 = vrot.slane %v5812_v18, 1  ;;  %v1709_v26 = vrot.slane %v1433_v49, 1  ;;  %v3941_v52 = vpop.f32.mrb[35].mxu0 }
 0x22f   : > { %2592 = vmatmul.mubr.bf16.gmra.mrb[64].mxu1 %v5792_v48  ;;  %v5854_v10 = vsel %vm5425_vm5, 0, %v1350_v12  ;;  %v5856_v42 = vadd.f32 %v3938_v3, %v3937_v30  ;;  %v5858_v32 = vadd.f32 %v3941_v52, %v3940_v58  ;;  %v1590_v41 = vrot.slane %v1588_v14, 1 }
 0x230   : > { %2599 = vmatprep.mubr.bf16.mxu1 %v5781_v25  ;;  %2431 = vmatmul.mubr.bf16.gmra.mrb[64].mxu0 %v5709_v22  ;;  %v1586_v63 = vor.u32 %v1585_v57, %v1581_v34  ;;  %v1595_v47 = vshll.u32 %v5854_v10, 16  ;;  %v1357_v4 = vor.u32 %v1355_v40, %v1354_v45  ;;  %v1359_v9 = vshrl.u32 %v5801_v7, 16 }
 0x231   : > { %2438 = vmatprep.mubr.bf16.mxu0 %v5805_v2  ;;  %v5863_v55 = vsel %vm1675_vm7, %v1708_v33, %v1709_v26  ;;  %v1435_v49 = vsel %vm5425_vm5, %v1347_v15, 0  ;;  %v1593_v12 = vshrl.u32 %v5854_v10, 16  ;;  %v1711_v57 = vrot.slane %v5833_v44, 1 }
 0x232   : > { %v5872_v30 = vsel %vm1439_vm6, %v1586_v63, %v1590_v41  ;;  %v1597_v40 = vrot.slane %v1595_v47, 1  ;;  %v1600_v34 = vshll.u32 %v1435_v49, 16  ;;  %v1361_v14 = vrot.slane %v1359_v9, 7 }
 0x233   : > { %v1362_v3 = vshll.u32 %v5801_v7, 16  ;;  %v1712_v15 = vrot.slane %v1434_v23, 1  ;;  %v5879_v33 = vsel %vm5425_vm5, 0, %v1357_v4  ;;  %v1436_v9 = vsel %vm5425_vm5, %v1354_v45, 0 }
 0x234   : > { %v1598_v26 = vor.u32 %v1597_v40, %v1593_v12  ;;  %v1602_v58 = vrot.slane %v1600_v34, 1  ;;  %v1607_v52 = vshll.u32 %v5879_v33, 16  ;;  %v1605_v7 = vshrl.u32 %v5879_v33, 16 }
 0x235   : > { %v1364_v63 = vor.u32 %v1362_v3, %v1361_v14  ;;  %v5883_v41 = vsel %vm1675_vm7, %v1711_v57, %v1712_v15  ;;  %v1612_v47 = vshll.u32 %v1436_v9, 16  ;;  %v1714_v12 = vrot.slane %v5854_v10, 1 }
 0x236   : > { %v5891_v4 = vsel %vm1439_vm6, %v1598_v26, %v1602_v58  ;;  %v1609_v23 = vrot.slane %v1607_v52, 1  ;;  %v1715_v40 = vrot.slane %v1435_v49, 1  ;;  %v1366_v34 = vshrl.u32 %v5797_v35, 16 }
 0x237   : > { %2600 = vmatmul.mubr.bf16.gmra.mrb[68].mxu1 %v5817_v39  ;;  %v5898_v45 = vsel %vm5425_vm5, 0, %v1364_v63  ;;  %v1614_v3 = vrot.slane %v1612_v47, 1  ;;  %v1437_v58 = vsel %vm5425_vm5, %v1361_v14, 0  ;;  %v1369_v49 = vshll.u32 %v5797_v35, 16 }
 0x238   : > { %2607 = vmatprep.mubr.bf16.mxu1 %v5812_v18  ;;  %2439 = vmatmul.mubr.bf16.gmra.mrb[68].mxu0 %v5744_v59  ;;  %v1610_v57 = vor.u32 %v1609_v23, %v1605_v7  ;;  %v1619_v15 = vshll.u32 %v5898_v45, 16  ;;  %v5903_v26 = vsel %vm1675_vm7, %v1714_v12, %v1715_v40  ;;  %v5907_v52 = vrot.slane %v1366_v34, 7 }
 0x239   : > { %2446 = vmatprep.mubr.bf16.mxu0 %v5826_v8  ;;  %v1617_v7 = vshrl.u32 %v5898_v45, 16  ;;  %v1624_v47 = vshll.u32 %v1437_v58, 16  ;;  %v1717_v14 = vrot.slane %v5879_v33, 1  ;;  %v1718_v12 = vrot.slane %v1436_v9, 1 }
 0x23a   : > { %v5914_v63 = vsel %vm1439_vm6, %v1610_v57, %v1614_v3  ;;  %v1621_v23 = vrot.slane %v1619_v15, 1  ;;  %v1371_v35 = vor.u32 %v1369_v49, %v5907_v52  ;;  %v1720_v9 = vrot.slane %v5898_v45, 1 }
 0x23b   : > { %v1626_v34 = vrot.slane %v1624_v47, 1  ;;  %v5921_v56 = vsel %vm1675_vm7, %v1717_v14, %v1718_v12  ;;  %v1721_v15 = vrot.slane %v1437_v58, 1  ;;  %v4746_v58 = vld [vmem:[%s6534_s7 + $0x210] sm:$0xff]  }
 0x23c   : > { %v1622_v40 = vor.u32 %v1621_v23, %v1617_v7  ;;  %v5926_v57 = vsel %vm5425_vm5, 0, %v1371_v35  ;;  %v4745_v7 = vld [vmem:[%s6534_s7 + $0x208] sm:$0xff]  }
 0x23d   : > { %v5936_v49 = vsel %vm1675_vm7, %v1720_v9, %v1721_v15 }
 0x23e   : > { %v5931_v3 = vsel %vm1439_vm6, %v1622_v40, %v1626_v34 }
 0x23f   : > { %2608 = vmatmul.mubr.bf16.gmra.mrb[72].mxu1 %v5838_v46 }
 0x240   : > { %2615 = vmatprep.mubr.bf16.mxu1 %v5833_v44  ;;  %2447 = vmatmul.mubr.bf16.gmra.mrb[72].mxu0 %v5781_v25 }
 0x241   : > { %2454 = vmatprep.mubr.bf16.mxu0 %v5847_v11 }
 0x247   : > { %2616 = vmatmul.mubr.bf16.gmra.mrb[76].mxu1 %v5863_v55 }
 0x248   : > { %2623 = vmatprep.mubr.bf16.mxu1 %v5854_v10  ;;  %2455 = vmatmul.mubr.bf16.gmra.mrb[76].mxu0 %v5812_v18 }
 0x249   : > { %2462 = vmatprep.mubr.bf16.mxu0 %v5872_v30 }
 0x24f   : > { %2624 = vmatmul.mubr.bf16.gmra.mrb[80].mxu1 %v5883_v41 }
 0x250   : > { %2631 = vmatprep.mubr.bf16.mxu1 %v5879_v33  ;;  %2463 = vmatmul.mubr.bf16.gmra.mrb[80].mxu0 %v5833_v44 }
 0x251   : > { %2470 = vmatprep.mubr.bf16.mxu0 %v5891_v4 }
 0x257   : > { %2632 = vmatmul.mubr.bf16.gmra.mrb[84].mxu1 %v5903_v26 }
 0x258   : > { %2639 = vmatprep.mubr.bf16.mxu1 %v5898_v45  ;;  %2471 = vmatmul.mubr.bf16.gmra.mrb[84].mxu0 %v5854_v10 }
 0x259   : > { %2478 = vmatprep.mubr.bf16.mxu0 %v5914_v63 }
 0x25f   : > { %2640 = vmatmul.mubr.bf16.gmra.mrb[88].mxu1 %v5921_v56 }
 0x260   : > { %2647 = vmatprep.mubr.bf16.mxu1 %v5926_v57  ;;  %2479 = vmatmul.mubr.bf16.gmra.mrb[88].mxu0 %v5879_v33 }
 0x261   : > { %2486 = vmatprep.mubr.bf16.mxu0 %v5931_v3 }
 0x267   : > { %2648 = vmatmul.mubr.bf16.gmra.mrb[92].mxu1 %v5936_v49 }
 0x268   : > { %2849 = vmatprep.mubr.bf16.mxu1 %v5512_v19  ;;  %2487 = vmatmul.mubr.bf16.gmra.mrb[92].mxu0 %v5898_v45 }
 0x269   : > { %2688 = vmatprep.mubr.bf16.mxu0 %v5492_v24  ;;  %v4750_v24 = vld [vmem:[%s6534_s7 + $0x230] sm:$0xff]  }
 0x26f   : > { %2850 = vmatmul.mubr.bf16.vlgmr.msra.gmra.mrb[96].mxu1 %v5451_v16  ;;  %v4747_v16 = vld [vmem:[%s6534_s7 + $0x218] sm:$0xff]  }
 0x270   : > { %2857 = vmatprep.mubr.bf16.mxu1 %v5561_v5  ;;  %2689 = vmatmul.mubr.bf16.vlgmr.msra.gmra.mrb[96].mxu0 %v5498_v29  ;;  %v4751_v29 = vld [vmem:[%s6534_s7 + $0x238] sm:$0xff]  }
 0x271   : > { %4502 = vmatpush3.bf16.msra.mxu0 %v5437_v37  ;;  %2696 = vmatprep.mubr.bf16.mxu0 %v5537_v21  ;;  %v4748_v37 = vld [vmem:[%s6534_s7 + $0x220] sm:$0xff]  }
 0x272   : > { %4503 = vmatprep.subr.bf16.mxu0 %v4745_v7 }
 0x275   : > { %4504 = vmatpush3.bf16.msra.mxu0 %v4745_v7 }
 0x276   : > { %4505 = vmatprep.subr.bf16.mxu0 %v4746_v58 }
 0x277   : > { %2858 = vmatmul.mubr.bf16.gmra.mrb[100].mxu1 %v5485_v13  ;;  %v4749_v13 = vld [vmem:[%s6534_s7 + $0x228] sm:$0xff]  }
 0x278   : > { %2865 = vmatprep.mubr.bf16.mxu1 %v5614_v61  ;;  %2697 = vmatmul.mubr.bf16.gmra.mrb[100].mxu0 %v5512_v19 }
 0x279   : > { %2704 = vmatprep.mubr.bf16.mxu0 %v5599_v36  ;;  %4506 = vmatpush3.bf16.msra.mxu0 %v4746_v58 }
 0x27a   : > { %4507 = vmatprep.subr.bf16.mxu0 %v4747_v16 }
 0x27d   : > { %4508 = vmatpush3.bf16.msra.mxu0 %v4747_v16 }
 0x27e   : > { %4509 = vmatprep.subr.bf16.mxu0 %v4748_v37 }
 0x27f   : > { %2866 = vmatmul.mubr.bf16.gmra.mrb[104].mxu1 %v5523_v0 }
 0x280   : > { %2873 = vmatprep.mubr.bf16.mxu1 %v5653_v51  ;;  %2705 = vmatmul.mubr.bf16.gmra.mrb[104].mxu0 %v5561_v5 }
 0x281   : > { %2712 = vmatprep.mubr.bf16.mxu0 %v5641_v17  ;;  %4510 = vmatpush3.bf16.msra.mxu0 %v4748_v37 }
 0x282   : > { %4511 = vmatprep.subr.bf16.mxu0 %v4749_v13 }
 0x285   : > { %4512 = vmatpush3.bf16.msra.mxu0 %v4749_v13 }
 0x286   : > { %4513 = vmatprep.subr.bf16.mxu0 %v4750_v24 }
 0x287   : > { %2874 = vmatmul.mubr.bf16.gmra.mrb[108].mxu1 %v5566_v31 }
 0x288   : > { %2881 = vmatprep.mubr.bf16.mxu1 %v5705_v28  ;;  %2713 = vmatmul.mubr.bf16.gmra.mrb[108].mxu0 %v5614_v61 }
 0x289   : > { %2720 = vmatprep.mubr.bf16.mxu0 %v5690_v50  ;;  %4514 = vmatpush3.bf16.msra.mxu0 %v4750_v24 }
 0x28a   : > { %4515 = vmatprep.subr.bf16.mxu0 %v4751_v29 }
 0x28d   : > { %4516 = vmatpush3.bf16.msra.mxu0 %v4751_v29 }
 0x28f   : > { %2882 = vmatmul.mubr.bf16.gmra.mrb[112].mxu1 %v5626_v6 }
 0x290   : > { %2889 = vmatprep.mubr.bf16.mxu1 %v5731_v62  ;;  %2721 = vmatmul.mubr.bf16.gmra.mrb[112].mxu0 %v5653_v51 }
 0x291   : > { %2728 = vmatprep.mubr.bf16.mxu0 %v5727_v27 }
 0x297   : > { %2890 = vmatmul.mubr.bf16.gmra.mrb[116].mxu1 %v5659_v60 }
 0x298   : > { %2897 = vmatprep.mubr.bf16.mxu1 %v5766_v38  ;;  %2729 = vmatmul.mubr.bf16.gmra.mrb[116].mxu0 %v5705_v28 }
 0x299   : > { %2736 = vmatprep.mubr.bf16.mxu0 %v5760_v20 }
 0x29f   : > { %2898 = vmatmul.mubr.bf16.gmra.mrb[120].mxu1 %v5709_v22 }
 0x2a0   : > { %2905 = vmatprep.mubr.bf16.mxu1 %v5805_v2  ;;  %2737 = vmatmul.mubr.bf16.gmra.mrb[120].mxu0 %v5731_v62  ;;  %v1742_v62 = vshll.u32 %v5926_v57, 16 }
 0x2a1   : > { %2744 = vmatprep.mubr.bf16.mxu0 %v5792_v48 }
 0x2a7   : > { %2906 = vmatmul.mubr.bf16.gmra.mrb[124].mxu1 %v5744_v59 }
 0x2a8   : > { %2913 = vmatprep.mubr.bf16.mxu1 %v5826_v8  ;;  %2745 = vmatmul.mubr.bf16.gmra.mrb[124].mxu0 %v5766_v38 }
 0x2a9   : > { %2752 = vmatprep.mubr.bf16.mxu0 %v5817_v39 }
 0x2af   : > { %2914 = vmatmul.mubr.bf16.gmra.mrb[128].mxu1 %v5781_v25 }
 0x2b0   : > { %2921 = vmatprep.mubr.bf16.mxu1 %v5847_v11  ;;  %2753 = vmatmul.mubr.bf16.gmra.mrb[128].mxu0 %v5805_v2  ;;  %v1438_v2 = vsel %vm5425_vm5, %v5907_v52, 0 }
 0x2b1   : > { %2760 = vmatprep.mubr.bf16.mxu0 %v5838_v46  ;;  %v1747_v23 = vshll.u32 %v1438_v2, 16 }
 0x2b3   : > { %v1749_v40 = vrot.slane %v1747_v23, 1 }
 0x2b7   : > { %2922 = vmatmul.mubr.bf16.gmra.mrb[132].mxu1 %v5812_v18 }
 0x2b8   : > { %2929 = vmatprep.mubr.bf16.mxu1 %v5872_v30  ;;  %2761 = vmatmul.mubr.bf16.gmra.mrb[132].mxu0 %v5826_v8 }
 0x2b9   : > { %2768 = vmatprep.mubr.bf16.mxu0 %v5863_v55 }
 0x2bf   : > { %2930 = vmatmul.mubr.bf16.gmra.mrb[136].mxu1 %v5833_v44 }
 0x2c0   : > { %2937 = vmatprep.mubr.bf16.mxu1 %v5891_v4  ;;  %2769 = vmatmul.mubr.bf16.gmra.mrb[136].mxu0 %v5847_v11 }
 0x2c1   : > { %2776 = vmatprep.mubr.bf16.mxu0 %v5883_v41 }
 0x2c2   : > { %v4049_v19 = vpop.f32.mrb[32].mxu1 }
 0x2c3   : > { %v4050_v0 = vpop.f32.mrb[33].mxu1 }
 0x2c4   : > { %v4051_v5 = vadd.f32 %v4050_v0, %v4049_v19  ;;  %v4052_v31 = vpop.f32.mrb[34].mxu1 }
 0x2c5   : > { %v4053_v61 = vpop.f32.mrb[35].mxu1 }
 0x2c6   : > { %v6009_v6 = vadd.f32 %v4051_v5, %v5856_v42  ;;  %v4054_v51 = vadd.f32 %v4053_v61, %v4052_v31  ;;  %v4752_v5 = vld [vmem:[%s6537_s10] sm:$0xff]  }
 0x2c7   : > { %2938 = vmatmul.mubr.bf16.gmra.mrb[140].mxu1 %v5854_v10  ;;  %4597 = vmatprep.subr.bf16.mxu1 %v4752_v5 }
 0x2c8   : > { %v6013_v60 = vadd.f32 %v4054_v51, %v5858_v32  ;;  %2945 = vmatprep.mubr.bf16.mxu1 %v5914_v63  ;;  %2777 = vmatmul.mubr.bf16.gmra.mrb[140].mxu0 %v5872_v30  ;;  %v1740_v32 = vshrl.u32 %v5926_v57, 16  ;;  %v1744_v30 = vrot.slane %v1742_v62, 1  ;;  %v1754_v62 = vrot.slane %v5926_v57, 1 }
 0x2c9   : > { %2784 = vmatprep.mubr.bf16.mxu0 %v5903_v26  ;;  %4549 = vmatprep.subr.bf16.mxu0 %v4752_v5 }
 0x2ca   : > { %v4055_v28 = vpop.f32.mrb[36].mxu1  ;;  %v1745_v35 = vor.u32 %v1744_v30, %v1740_v32  ;;  %4605 = vmatpush3.bf16.msra.mxu1 %v4752_v5 }
 0x2cb   : > { %v4056_v22 = vpop.f32.mrb[37].mxu1  ;;  %v3943_v59 = vpop.f32.mrb[36].mxu0 }
 0x2cc   : > { %v4057_v38 = vadd.f32 %v4056_v22, %v4055_v28  ;;  %v4058_v25 = vpop.f32.mrb[38].mxu1  ;;  %v3944_v18 = vpop.f32.mrb[37].mxu0 }
 0x2cd   : > { %v4059_v8 = vpop.f32.mrb[39].mxu1  ;;  %v3945_v44 = vadd.f32 %v3944_v18, %v3943_v59  ;;  %v3946_v11 = vpop.f32.mrb[38].mxu0 }
 0x2ce   : > { %v4060_v10 = vadd.f32 %v4059_v8, %v4058_v25  ;;  %v3947_v42 = vpop.f32.mrb[39].mxu0 }
 0x2cf   : > { %2946 = vmatmul.mubr.bf16.gmra.mrb[144].mxu1 %v5879_v33  ;;  %v6024_v47 = vadd.f32 %v4057_v38, %v3945_v44  ;;  %v3948_v14 = vadd.f32 %v3947_v42, %v3946_v11 }
 0x2d0   : > { %2953 = vmatprep.mubr.bf16.mxu1 %v5931_v3  ;;  %2785 = vmatmul.mubr.bf16.gmra.mrb[144].mxu0 %v5891_v4  ;;  %v1750_v4 = vsel %vm1439_vm6, %v1745_v35, %v1749_v40 }
 0x2d1   : > { %v6028_v1 = vadd.f32 %v4060_v10, %v3948_v14  ;;  %2792 = vmatprep.mubr.bf16.mxu0 %v5921_v56 }
 0x2d2   : > { %v4061_v52 = vpop.f32.mrb[40].mxu1 }
 0x2d3   : > { %v4062_v12 = vpop.f32.mrb[41].mxu1  ;;  %v3949_v33 = vpop.f32.mrb[40].mxu0 }
 0x2d4   : > { %v4063_v34 = vadd.f32 %v4062_v12, %v4061_v52  ;;  %v4064_v9 = vpop.f32.mrb[42].mxu1  ;;  %v3950_v15 = vpop.f32.mrb[41].mxu0 }
 0x2d5   : > { %v4065_v7 = vpop.f32.mrb[43].mxu1  ;;  %v3951_v58 = vadd.f32 %v3950_v15, %v3949_v33  ;;  %v3952_v16 = vpop.f32.mrb[42].mxu0  ;;  %v6644_v33 = vmov 0  }
 0x2d6   : > { %v4066_v37 = vadd.f32 %v4065_v7, %v4064_v9  ;;  %v3953_v13 = vpop.f32.mrb[43].mxu0  ;;  %v4753_v7 = vld [vmem:[%s6537_s10 + $0x8] sm:$0xff]  }
 0x2d7   : > { %2954 = vmatmul.mubr.bf16.gmra.mrb[148].mxu1 %v5898_v45  ;;  %v6033_v24 = vadd.f32 %v4063_v34, %v3951_v58  ;;  %v3954_v29 = vadd.f32 %v3953_v13, %v3952_v16  ;;  %4598 = vmatprep.subr.bf16.mxu1 %v4753_v7 }
 0x2d8   : > { %2961 = vmatprep.mubr.bf16.mxu1 %v1750_v4  ;;  %2793 = vmatmul.mubr.bf16.gmra.mrb[148].mxu0 %v5914_v63  ;;  %v1755_v63 = vrot.slane %v1438_v2, 1 }
 0x2d9   : > { %v6036_v19 = vadd.f32 %v4066_v37, %v3954_v29  ;;  %2800 = vmatprep.mubr.bf16.mxu0 %v5936_v49  ;;  %4606 = vmatpush3.bf16.msra.mxu1 %v4753_v7 }
 0x2da   : > { %v4067_v0 = vpop.f32.mrb[44].mxu1  ;;  %v6049_v11 = vsel %vm1675_vm7, %v1754_v62, %v1755_v63 }
 0x2db   : > { %v4068_v31 = vpop.f32.mrb[45].mxu1  ;;  %v3955_v61 = vpop.f32.mrb[44].mxu0 }
 0x2dc   : > { %v4069_v45 = vadd.f32 %v4068_v31, %v4067_v0  ;;  %v4070_v51 = vpop.f32.mrb[46].mxu1  ;;  %v3956_v28 = vpop.f32.mrb[45].mxu0 }
 0x2dd   : > { %v4071_v22 = vpop.f32.mrb[47].mxu1  ;;  %v3957_v59 = vadd.f32 %v3956_v28, %v3955_v61  ;;  %v3958_v38 = vpop.f32.mrb[46].mxu0 }
 0x2de   : > { %v4072_v25 = vadd.f32 %v4071_v22, %v4070_v51  ;;  %v3959_v18 = vpop.f32.mrb[47].mxu0 }
 0x2df   : > { %2962 = vmatmul.mubr.bf16.gmra.mrb[152].mxu1 %v5926_v57  ;;  %v6044_v8 = vadd.f32 %v4069_v45, %v3957_v59  ;;  %v3960_v44 = vadd.f32 %v3959_v18, %v3958_v38 }
 0x2e0   : > { %2969 = vmatprep.mubr.bf16.mxu1 %v5339_v43  ;;  %2801 = vmatmul.mubr.bf16.gmra.mrb[152].mxu0 %v5931_v3 }
 0x2e1   : > { %v6051_v10 = vadd.f32 %v4072_v25, %v3960_v44  ;;  %2808 = vmatprep.mubr.bf16.mxu0 %v6049_v11 }
 0x2e2   : > { %v4073_v2 = vpop.f32.mrb[48].mxu1 }
 0x2e3   : > { %v4074_v42 = vpop.f32.mrb[49].mxu1  ;;  %v3961_v32 = vpop.f32.mrb[48].mxu0 }
 0x2e4   : > { %v4075_v30 = vadd.f32 %v4074_v42, %v4073_v2  ;;  %v4076_v23 = vpop.f32.mrb[50].mxu1  ;;  %v3962_v57 = vpop.f32.mrb[49].mxu0 }
 0x2e5   : > { %v4077_v14 = vpop.f32.mrb[51].mxu1  ;;  %v3963_v52 = vadd.f32 %v3962_v57, %v3961_v32  ;;  %v3964_v12 = vpop.f32.mrb[50].mxu0 }
 0x2e6   : > { %v4078_v35 = vadd.f32 %v4077_v14, %v4076_v23  ;;  %v3965_v40 = vpop.f32.mrb[51].mxu0  ;;  %v4754_v23 = vld [vmem:[%s6537_s10 + $0x10] sm:$0xff]  }
 0x2e7   : > { %2970 = vmatmul.mubr.bf16.gmra.mrb[156].mxu1 %v6644_v33  ;;  %v6055_v3 = vadd.f32 %v4075_v30, %v3963_v52  ;;  %v3966_v34 = vadd.f32 %v3965_v40, %v3964_v12  ;;  %4599 = vmatprep.subr.bf16.mxu1 %v4754_v23 }
 0x2e8   : > { %2809 = vmatmul.mubr.bf16.gmra.mrb[156].mxu0 %v1750_v4  ;;  %4607 = vmatpush3.bf16.msra.mxu1 %v4754_v23 }
 0x2e9   : > { %v6057_v9 = vadd.f32 %v4078_v35, %v3966_v34  ;;  %4517 = vmatprep.mubr.bf16.mxu0 %v5537_v21 }
 0x2ea   : > { %v4079_v15 = vpop.f32.mrb[52].mxu1 }
 0x2eb   : > { %v4080_v58 = vpop.f32.mrb[53].mxu1  ;;  %v3967_v16 = vpop.f32.mrb[52].mxu0 }
 0x2ec   : > { %v4081_v37 = vadd.f32 %v4080_v58, %v4079_v15  ;;  %v4082_v13 = vpop.f32.mrb[54].mxu1  ;;  %v3968_v29 = vpop.f32.mrb[53].mxu0 }
 0x2ed   : > { %v4083_v0 = vpop.f32.mrb[55].mxu1  ;;  %v3969_v31 = vadd.f32 %v3968_v29, %v3967_v16  ;;  %v3970_v61 = vpop.f32.mrb[54].mxu0 }
 0x2ee   : > { %v4084_v4 = vadd.f32 %v4083_v0, %v4082_v13  ;;  %v3971_v45 = vpop.f32.mrb[55].mxu0 }
 0x2ef   : > { %v6063_v51 = vadd.f32 %v4081_v37, %v3969_v31  ;;  %v3972_v21 = vadd.f32 %v3971_v45, %v3970_v61 }
 0x2f0   : > { %4518 = vmatmul.mubr.bf16.vlgmr.msra.gmra.mrb[160].mxu0 %v5599_v36 }
 0x2f1   : > { %v6066_v28 = vadd.f32 %v4084_v4, %v3972_v21  ;;  %4521 = vmatprep.mubr.bf16.mxu0 %v5641_v17  ;;  %4550 = vmatpush3.bf16.msra.mxu0 %v4752_v5 }
 0x2f2   : > { %v4085_v22 = vpop.f32.mrb[56].mxu1  ;;  %4551 = vmatprep.subr.bf16.mxu0 %v4753_v7 }
 0x2f3   : > { %v4086_v62 = vpop.f32.mrb[57].mxu1  ;;  %v3973_v63 = vpop.f32.mrb[56].mxu0 }
 0x2f4   : > { %v4087_v59 = vadd.f32 %v4086_v62, %v4085_v22  ;;  %v4088_v38 = vpop.f32.mrb[58].mxu1  ;;  %v3974_v25 = vpop.f32.mrb[57].mxu0 }
 0x2f5   : > { %v4089_v18 = vpop.f32.mrb[59].mxu1  ;;  %v3975_v44 = vadd.f32 %v3974_v25, %v3973_v63  ;;  %v3976_v2 = vpop.f32.mrb[58].mxu0  ;;  %4552 = vmatpush3.bf16.msra.mxu0 %v4753_v7 }
 0x2f6   : > { %v4090_v42 = vadd.f32 %v4089_v18, %v4088_v38  ;;  %v3977_v32 = vpop.f32.mrb[59].mxu0  ;;  %4553 = vmatprep.subr.bf16.mxu0 %v4754_v23 }
 0x2f7   : > { %v6069_v30 = vadd.f32 %v4087_v59, %v3975_v44  ;;  %v3978_v36 = vadd.f32 %v3977_v32, %v3976_v2  ;;  %v4755_v59 = vld [vmem:[%s6537_s10 + $0x18] sm:$0xff]  }
 0x2f8   : > { %4522 = vmatmul.mubr.bf16.gmra.mrb[164].mxu0 %v5690_v50  ;;  %4600 = vmatprep.subr.bf16.mxu1 %v4755_v59 }
 0x2f9   : > { %v6072_v17 = vadd.f32 %v4090_v42, %v3978_v36  ;;  %4525 = vmatprep.mubr.bf16.mxu0 %v5727_v27  ;;  %4554 = vmatpush3.bf16.msra.mxu0 %v4754_v23 }
 0x2fa   : > { %v4091_v5 = vpop.f32.mrb[60].mxu1  ;;  %4555 = vmatprep.subr.bf16.mxu0 %v4755_v59  ;;  %4608 = vmatpush3.bf16.msra.mxu1 %v4755_v59 }
 0x2fb   : > { %v4092_v57 = vpop.f32.mrb[61].mxu1  ;;  %v3979_v14 = vpop.f32.mrb[60].mxu0 }
 0x2fc   : > { %v4093_v52 = vadd.f32 %v4092_v57, %v4091_v5  ;;  %v4094_v12 = vpop.f32.mrb[62].mxu1  ;;  %v3980_v35 = vpop.f32.mrb[61].mxu0 }
 0x2fd   : > { %v4095_v40 = vpop.f32.mrb[63].mxu1  ;;  %v3981_v50 = vadd.f32 %v3980_v35, %v3979_v14  ;;  %v3982_v33 = vpop.f32.mrb[62].mxu0  ;;  %4556 = vmatpush3.bf16.msra.mxu0 %v4755_v59 }
 0x2fe   : > { %v4096_v34 = vadd.f32 %v4095_v40, %v4094_v12  ;;  %v3983_v15 = vpop.f32.mrb[63].mxu0 }
 0x2ff   : > { %v6078_v27 = vadd.f32 %v4093_v52, %v3981_v50  ;;  %v3984_v7 = vadd.f32 %v3983_v15, %v3982_v33 }
 0x300   : > { %4526 = vmatmul.mubr.bf16.gmra.mrb[168].mxu0 %v5760_v20 }
 0x301   : > { %v6081_v58 = vadd.f32 %v4096_v34, %v3984_v7  ;;  %4529 = vmatprep.mubr.bf16.mxu0 %v5792_v48 }
 0x302   : > { %v4097_v16 = vpop.f32.mrb[64].mxu1 }
 0x303   : > { %v4098_v37 = vpop.f32.mrb[65].mxu1  ;;  %v3985_v13 = vpop.f32.mrb[64].mxu0 }
 0x304   : > { %v4099_v29 = vadd.f32 %v4098_v37, %v4097_v16  ;;  %v4100_v0 = vpop.f32.mrb[66].mxu1  ;;  %v3986_v31 = vpop.f32.mrb[65].mxu0 }
 0x305   : > { %v4101_v61 = vpop.f32.mrb[67].mxu1  ;;  %v3987_v4 = vadd.f32 %v3986_v31, %v3985_v13  ;;  %v3988_v45 = vpop.f32.mrb[66].mxu0 }
 0x306   : > { %v4102_v21 = vadd.f32 %v4101_v61, %v4100_v0  ;;  %v3989_v22 = vpop.f32.mrb[67].mxu0 }
 0x307   : > { %v6084_v62 = vadd.f32 %v4099_v29, %v3987_v4  ;;  %v3990_v63 = vadd.f32 %v3989_v22, %v3988_v45  ;;  %v4756_v29 = vld [vmem:[%s6537_s10 + $0x20] sm:$0xff]  }
 0x308   : > { %4530 = vmatmul.mubr.bf16.gmra.mrb[172].mxu0 %v5817_v39  ;;  %4601 = vmatprep.subr.bf16.mxu1 %v4756_v29 }
 0x309   : > { %v6087_v20 = vadd.f32 %v4102_v21, %v3990_v63  ;;  %4533 = vmatprep.mubr.bf16.mxu0 %v5838_v46  ;;  %4557 = vmatprep.subr.bf16.mxu0 %v4756_v29 }
 0x30a   : > { %v4103_v48 = vpop.f32.mrb[68].mxu1  ;;  %4609 = vmatpush3.bf16.msra.mxu1 %v4756_v29  ;;  %4558 = vmatpush3.bf16.msra.mxu0 %v4756_v29 }
 0x30b   : > { %v4104_v38 = vpop.f32.mrb[69].mxu1  ;;  %v3991_v25 = vpop.f32.mrb[68].mxu0 }
 0x30c   : > { %v4105_v18 = vadd.f32 %v4104_v38, %v4103_v48  ;;  %v4106_v44 = vpop.f32.mrb[70].mxu1  ;;  %v3992_v2 = vpop.f32.mrb[69].mxu0 }
 0x30d   : > { %v4107_v42 = vpop.f32.mrb[71].mxu1  ;;  %v3993_v39 = vadd.f32 %v3992_v2, %v3991_v25  ;;  %v3994_v32 = vpop.f32.mrb[70].mxu0 }
 0x30e   : > { %v4108_v36 = vadd.f32 %v4107_v42, %v4106_v44  ;;  %v3995_v5 = vpop.f32.mrb[71].mxu0 }
 0x30f   : > { %v6093_v46 = vadd.f32 %v4105_v18, %v3993_v39  ;;  %v3996_v23 = vadd.f32 %v3995_v5, %v3994_v32 }
 0x310   : > { %4534 = vmatmul.mubr.bf16.gmra.mrb[176].mxu0 %v5863_v55 }
 0x311   : > { %v6096_v57 = vadd.f32 %v4108_v36, %v3996_v23  ;;  %4537 = vmatprep.mubr.bf16.mxu0 %v5883_v41 }
 0x312   : > { %v4109_v14 = vpop.f32.mrb[72].mxu1 }
 0x313   : > { %v4110_v52 = vpop.f32.mrb[73].mxu1  ;;  %v3997_v12 = vpop.f32.mrb[72].mxu0 }
 0x314   : > { %v4111_v35 = vadd.f32 %v4110_v52, %v4109_v14  ;;  %v4112_v40 = vpop.f32.mrb[74].mxu1  ;;  %v3998_v50 = vpop.f32.mrb[73].mxu0 }
 0x315   : > { %v4113_v33 = vpop.f32.mrb[75].mxu1  ;;  %v3999_v34 = vadd.f32 %v3998_v50, %v3997_v12  ;;  %v4000_v15 = vpop.f32.mrb[74].mxu0 }
 0x316   : > { %v4114_v7 = vadd.f32 %v4113_v33, %v4112_v40  ;;  %v4001_v16 = vpop.f32.mrb[75].mxu0 }
 0x317   : > { %v6099_v37 = vadd.f32 %v4111_v35, %v3999_v34  ;;  %v4002_v13 = vadd.f32 %v4001_v16, %v4000_v15 }
 0x318   : > { %4538 = vmatmul.mubr.bf16.gmra.mrb[180].mxu0 %v5903_v26 }
 0x319   : > { %v6102_v55 = vadd.f32 %v4114_v7, %v4002_v13  ;;  %4541 = vmatprep.mubr.bf16.mxu0 %v5921_v56 }
 0x31a   : > { %v4115_v41 = vpop.f32.mrb[76].mxu1 }
 0x31b   : > { %v4116_v0 = vpop.f32.mrb[77].mxu1  ;;  %v4003_v31 = vpop.f32.mrb[76].mxu0 }
 0x31c   : > { %v4117_v61 = vadd.f32 %v4116_v0, %v4115_v41  ;;  %v4118_v4 = vpop.f32.mrb[78].mxu1  ;;  %v4004_v45 = vpop.f32.mrb[77].mxu0 }
 0x31d   : > { %v4119_v21 = vpop.f32.mrb[79].mxu1  ;;  %v4005_v26 = vadd.f32 %v4004_v45, %v4003_v31  ;;  %v4006_v22 = vpop.f32.mrb[78].mxu0 }
 0x31e   : > { %v4120_v63 = vadd.f32 %v4119_v21, %v4118_v4  ;;  %v4007_v48 = vpop.f32.mrb[79].mxu0 }
 0x31f   : > { %v6108_v56 = vadd.f32 %v4117_v61, %v4005_v26  ;;  %v4008_v59 = vadd.f32 %v4007_v48, %v4006_v22 }
 0x320   : > { %4542 = vmatmul.mubr.bf16.gmra.mrb[184].mxu0 %v5936_v49 }
 0x321   : > { %v6111_v38 = vadd.f32 %v4120_v63, %v4008_v59  ;;  %4545 = vmatprep.mubr.bf16.mxu0 %v6049_v11  ;;  %v4757_v11 = vld [vmem:[%s6537_s10 + $0x28] sm:$0xff]  }
 0x322   : > { %v4121_v25 = vpop.f32.mrb[80].mxu1  ;;  %4602 = vmatprep.subr.bf16.mxu1 %v4757_v11  ;;  %4559 = vmatprep.subr.bf16.mxu0 %v4757_v11 }
 0x323   : > { %v4122_v18 = vpop.f32.mrb[81].mxu1  ;;  %v4009_v44 = vpop.f32.mrb[80].mxu0  ;;  %4610 = vmatpush3.bf16.msra.mxu1 %v4757_v11  ;;  %4560 = vmatpush3.bf16.msra.mxu0 %v4757_v11 }
 0x324   : > { %v4123_v2 = vadd.f32 %v4122_v18, %v4121_v25  ;;  %v4124_v42 = vpop.f32.mrb[82].mxu1  ;;  %v4010_v39 = vpop.f32.mrb[81].mxu0 }
 0x325   : > { %v4125_v32 = vpop.f32.mrb[83].mxu1  ;;  %v4011_v36 = vadd.f32 %v4010_v39, %v4009_v44  ;;  %v4012_v5 = vpop.f32.mrb[82].mxu0 }
 0x326   : > { %v4126_v23 = vadd.f32 %v4125_v32, %v4124_v42  ;;  %v4013_v14 = vpop.f32.mrb[83].mxu0  ;;  %v4758_v32 = vld [vmem:[%s6537_s10 + $0x30] sm:$0xff]  }
 0x327   : > { %v6114_v52 = vadd.f32 %v4123_v2, %v4011_v36  ;;  %v4014_v12 = vadd.f32 %v4013_v14, %v4012_v5  ;;  %4603 = vmatprep.subr.bf16.mxu1 %v4758_v32  ;;  %4561 = vmatprep.subr.bf16.mxu0 %v4758_v32 }
 0x328   : > { %4546 = vmatmul.mubr.bf16.gmra.mrb[188].mxu0 %v5339_v43  ;;  %4611 = vmatpush3.bf16.msra.mxu1 %v4758_v32 }
 0x329   : > { %v6117_v49 = vadd.f32 %v4126_v23, %v4014_v12  ;;  %4562 = vmatpush3.bf16.msra.mxu0 %v4758_v32 }
 0x32a   : > { %v4127_v35 = vpop.f32.mrb[84].mxu1 }
 0x32b   : > { %v4128_v40 = vpop.f32.mrb[85].mxu1  ;;  %v4015_v50 = vpop.f32.mrb[84].mxu0 }
 0x32c   : > { %v4129_v33 = vadd.f32 %v4128_v40, %v4127_v35  ;;  %v4130_v34 = vpop.f32.mrb[86].mxu1  ;;  %v4016_v15 = vpop.f32.mrb[85].mxu0 }
 0x32d   : > { %v4131_v7 = vpop.f32.mrb[87].mxu1  ;;  %v4017_v16 = vadd.f32 %v4016_v15, %v4015_v50  ;;  %v4018_v13 = vpop.f32.mrb[86].mxu0 }
 0x32e   : > { %v4132_v43 = vadd.f32 %v4131_v7, %v4130_v34  ;;  %v4019_v41 = vpop.f32.mrb[87].mxu0 }
 0x32f   : > { %v6122_v29 = vadd.f32 %v4129_v33, %v4017_v16  ;;  %v4020_v0 = vadd.f32 %v4019_v41, %v4018_v13 }
 0x331   : > { %v6124_v31 = vadd.f32 %v4132_v43, %v4020_v0 }
 0x332   : > { %v4133_v61 = vpop.f32.mrb[88].mxu1 }
 0x333   : > { %v4134_v4 = vpop.f32.mrb[89].mxu1  ;;  %v4021_v45 = vpop.f32.mrb[88].mxu0 }
 0x334   : > { %v4135_v21 = vadd.f32 %v4134_v4, %v4133_v61  ;;  %v4136_v26 = vpop.f32.mrb[90].mxu1  ;;  %v4022_v22 = vpop.f32.mrb[89].mxu0 }
 0x335   : > { %v4137_v63 = vpop.f32.mrb[91].mxu1  ;;  %v4023_v48 = vadd.f32 %v4022_v22, %v4021_v45  ;;  %v4024_v59 = vpop.f32.mrb[90].mxu0 }
 0x336   : > { %v4138_v25 = vadd.f32 %v4137_v63, %v4136_v26  ;;  %v4025_v18 = vpop.f32.mrb[91].mxu0 }
 0x337   : > { %v6126_v44 = vadd.f32 %v4135_v21, %v4023_v48  ;;  %v4026_v2 = vadd.f32 %v4025_v18, %v4024_v59 }
 0x339   : > { %v6128_v42 = vadd.f32 %v4138_v25, %v4026_v2 }
 0x33a   : > { %v4139_v39 = vpop.f32.mrb[92].mxu1 }
 0x33b   : > { %v4140_v36 = vpop.f32.mrb[93].mxu1  ;;  %v4027_v5 = vpop.f32.mrb[92].mxu0 }
 0x33c   : > { %v4141_v23 = vadd.f32 %v4140_v36, %v4139_v39  ;;  %v4142_v14 = vpop.f32.mrb[94].mxu1  ;;  %v4028_v12 = vpop.f32.mrb[93].mxu0 }
 0x33d   : > { %v4143_v35 = vpop.f32.mrb[95].mxu1  ;;  %v4029_v11 = vadd.f32 %v4028_v12, %v4027_v5  ;;  %v4030_v40 = vpop.f32.mrb[94].mxu0 }
 0x33e   : > { %v4144_v50 = vadd.f32 %v4143_v35, %v4142_v14  ;;  %v4031_v33 = vpop.f32.mrb[95].mxu0 }
 0x33f   : > { %v6133_v34 = vadd.f32 %v4141_v23, %v4029_v11  ;;  %v4032_v15 = vadd.f32 %v4031_v33, %v4030_v40 }
 0x341   : > { %v6135_v7 = vadd.f32 %v4144_v50, %v4032_v15 }
 0x342   : > { %v4273_v16 = vpop.f32.mrb[96].mxu1 }
 0x343   : > { %v4274_v13 = vpop.f32.mrb[97].mxu1  ;;  %v4161_v43 = vpop.f32.mrb[96].mxu0 }
 0x344   : > { %v4275_v41 = vadd.f32 %v4274_v13, %v4273_v16  ;;  %v4276_v0 = vpop.f32.mrb[98].mxu1  ;;  %v4162_v61 = vpop.f32.mrb[97].mxu0 }
 0x345   : > { %v4277_v4 = vpop.f32.mrb[99].mxu1  ;;  %v4163_v45 = vadd.f32 %v4162_v61, %v4161_v43  ;;  %v4164_v21 = vpop.f32.mrb[98].mxu0 }
 0x346   : > { %v4278_v26 = vadd.f32 %v4277_v4, %v4276_v0  ;;  %v4165_v22 = vpop.f32.mrb[99].mxu0 }
 0x347   : > { %v2691_v63 = vadd.f32 %v4163_v45, %v6009_v6  ;;  %v4166_v48 = vadd.f32 %v4165_v22, %v4164_v21  ;;  %v4759_v6 = vld [vmem:[%s6537_s10 + $0x38] sm:$0xff]  }
 0x348   : > { %4563 = vmatprep.subr.bf16.mxu0 %v4759_v6  ;;  %4604 = vmatprep.subr.bf16.mxu1 %v4759_v6 }
 0x349   : > { %v2694_v59 = vadd.f32 %v4166_v48, %v6013_v60  ;;  %v6139_v18 = vadd.f32 %v4275_v41, %v2691_v63  ;;  %4564 = vmatpush3.bf16.msra.mxu0 %v4759_v6  ;;  %4612 = vmatpush3.bf16.msra.mxu1 %v4759_v6 }
 0x34a   : > { %v4279_v25 = vpop.f32.mrb[100].mxu1 }
 0x34b   : > { %v4280_v2 = vpop.f32.mrb[101].mxu1  ;;  %v4167_v39 = vpop.f32.mrb[100].mxu0  ;;  %v6141_v5 = vadd.f32 %v4278_v26, %v2694_v59 }
 0x34c   : > { %v4281_v32 = vadd.f32 %v4280_v2, %v4279_v25  ;;  %v4282_v36 = vpop.f32.mrb[102].mxu1  ;;  %v4168_v23 = vpop.f32.mrb[101].mxu0 }
 0x34d   : > { %v4283_v14 = vpop.f32.mrb[103].mxu1  ;;  %v4169_v12 = vadd.f32 %v4168_v23, %v4167_v39  ;;  %v4170_v35 = vpop.f32.mrb[102].mxu0 }
 0x34e   : > { %v4284_v11 = vadd.f32 %v4283_v14, %v4282_v36  ;;  %v4171_v40 = vpop.f32.mrb[103].mxu0 }
 0x34f   : > { %v2699_v60 = vadd.f32 %v4169_v12, %v6024_v47  ;;  %v4172_v50 = vadd.f32 %v4171_v40, %v4170_v35 }
 0x351   : > { %v2702_v33 = vadd.f32 %v4172_v50, %v6028_v1  ;;  %v6148_v16 = vadd.f32 %v4281_v32, %v2699_v60 }
 0x352   : > { %v4285_v15 = vpop.f32.mrb[104].mxu1 }
 0x353   : > { %v4286_v13 = vpop.f32.mrb[105].mxu1  ;;  %v4173_v43 = vpop.f32.mrb[104].mxu0  ;;  %v6150_v61 = vadd.f32 %v4284_v11, %v2702_v33 }
 0x354   : > { %v4287_v41 = vadd.f32 %v4286_v13, %v4285_v15  ;;  %v4288_v0 = vpop.f32.mrb[106].mxu1  ;;  %v4174_v4 = vpop.f32.mrb[105].mxu0 }
 0x355   : > { %v4289_v45 = vpop.f32.mrb[107].mxu1  ;;  %v4175_v21 = vadd.f32 %v4174_v4, %v4173_v43  ;;  %v4176_v47 = vpop.f32.mrb[106].mxu0 }
 0x356   : > { %v4290_v26 = vadd.f32 %v4289_v45, %v4288_v0  ;;  %v4177_v22 = vpop.f32.mrb[107].mxu0 }
 0x357   : > { %v2707_v63 = vadd.f32 %v4175_v21, %v6033_v24  ;;  %v4178_v1 = vadd.f32 %v4177_v22, %v4176_v47 }
 0x359   : > { %v2710_v48 = vadd.f32 %v4178_v1, %v6036_v19  ;;  %v6154_v25 = vadd.f32 %v4287_v41, %v2707_v63 }
 0x35a   : > { %v4291_v59 = vpop.f32.mrb[108].mxu1 }
 0x35b   : > { %v4292_v2 = vpop.f32.mrb[109].mxu1  ;;  %v4179_v39 = vpop.f32.mrb[108].mxu0  ;;  %v6156_v23 = vadd.f32 %v4290_v26, %v2710_v48 }
 0x35c   : > { %v4293_v32 = vadd.f32 %v4292_v2, %v4291_v59  ;;  %v4294_v36 = vpop.f32.mrb[110].mxu1  ;;  %v4180_v14 = vpop.f32.mrb[109].mxu0 }
 0x35d   : > { %v4295_v12 = vpop.f32.mrb[111].mxu1  ;;  %v4181_v35 = vadd.f32 %v4180_v14, %v4179_v39  ;;  %v4182_v11 = vpop.f32.mrb[110].mxu0 }
 0x35e   : > { %v4296_v40 = vadd.f32 %v4295_v12, %v4294_v36  ;;  %v4183_v6 = vpop.f32.mrb[111].mxu0 }
 0x35f   : > { %v2715_v24 = vadd.f32 %v4181_v35, %v6044_v8  ;;  %v4184_v60 = vadd.f32 %v4183_v6, %v4182_v11 }
 0x361   : > { %v2718_v19 = vadd.f32 %v4184_v60, %v6051_v10  ;;  %v6160_v33 = vadd.f32 %v4293_v32, %v2715_v24 }
 0x362   : > { %v4297_v50 = vpop.f32.mrb[112].mxu1 }
 0x363   : > { %v4298_v15 = vpop.f32.mrb[113].mxu1  ;;  %v4185_v13 = vpop.f32.mrb[112].mxu0  ;;  %v6162_v0 = vadd.f32 %v4296_v40, %v2718_v19 }
 0x364   : > { %v4299_v43 = vadd.f32 %v4298_v15, %v4297_v50  ;;  %v4300_v41 = vpop.f32.mrb[114].mxu1  ;;  %v4186_v4 = vpop.f32.mrb[113].mxu0 }
 0x365   : > { %v4301_v45 = vpop.f32.mrb[115].mxu1  ;;  %v4187_v21 = vadd.f32 %v4186_v4, %v4185_v13  ;;  %v4188_v47 = vpop.f32.mrb[114].mxu0 }
 0x366   : > { %v4302_v26 = vadd.f32 %v4301_v45, %v4300_v41  ;;  %v4189_v22 = vpop.f32.mrb[115].mxu0 }
 0x367   : > { %v2723_v8 = vadd.f32 %v4187_v21, %v6055_v3  ;;  %v4190_v63 = vadd.f32 %v4189_v22, %v4188_v47 }
 0x369   : > { %v2726_v10 = vadd.f32 %v4190_v63, %v6057_v9  ;;  %v6166_v48 = vadd.f32 %v4299_v43, %v2723_v8 }
 0x36a   : > { %v4303_v1 = vpop.f32.mrb[116].mxu1 }
 0x36b   : > { %v4304_v59 = vpop.f32.mrb[117].mxu1  ;;  %v4191_v2 = vpop.f32.mrb[116].mxu0  ;;  %v6168_v36 = vadd.f32 %v4302_v26, %v2726_v10 }
 0x36c   : > { %v4305_v39 = vadd.f32 %v4304_v59, %v4303_v1  ;;  %v4306_v32 = vpop.f32.mrb[118].mxu1  ;;  %v4192_v14 = vpop.f32.mrb[117].mxu0 }
 0x36d   : > { %v4307_v12 = vpop.f32.mrb[119].mxu1  ;;  %v4193_v35 = vadd.f32 %v4192_v14, %v4191_v2  ;;  %v4194_v11 = vpop.f32.mrb[118].mxu0 }
 0x36e   : > { %v4308_v40 = vadd.f32 %v4307_v12, %v4306_v32  ;;  %v4195_v6 = vpop.f32.mrb[119].mxu0 }
 0x36f   : > { %v2731_v3 = vadd.f32 %v4193_v35, %v6063_v51  ;;  %v4196_v24 = vadd.f32 %v4195_v6, %v4194_v11 }
 0x371   : > { %v2734_v9 = vadd.f32 %v4196_v24, %v6066_v28  ;;  %v6172_v19 = vadd.f32 %v4305_v39, %v2731_v3 }
 0x372   : > { %v4309_v60 = vpop.f32.mrb[120].mxu1 }
 0x373   : > { %v4310_v50 = vpop.f32.mrb[121].mxu1  ;;  %v4197_v15 = vpop.f32.mrb[120].mxu0  ;;  %v6174_v41 = vadd.f32 %v4308_v40, %v2734_v9 }
 0x374   : > { %v4311_v13 = vadd.f32 %v4310_v50, %v4309_v60  ;;  %v4312_v43 = vpop.f32.mrb[122].mxu1  ;;  %v4198_v4 = vpop.f32.mrb[121].mxu0 }
 0x375   : > { %v4313_v45 = vpop.f32.mrb[123].mxu1  ;;  %v4199_v21 = vadd.f32 %v4198_v4, %v4197_v15  ;;  %v4200_v47 = vpop.f32.mrb[122].mxu0 }
 0x376   : > { %v4314_v26 = vadd.f32 %v4313_v45, %v4312_v43  ;;  %v4201_v22 = vpop.f32.mrb[123].mxu0 }
 0x377   : > { %v2739_v51 = vadd.f32 %v4199_v21, %v6069_v30  ;;  %v4202_v8 = vadd.f32 %v4201_v22, %v4200_v47 }
 0x379   : > { %v2742_v28 = vadd.f32 %v4202_v8, %v6072_v17  ;;  %v6178_v10 = vadd.f32 %v4311_v13, %v2739_v51 }
 0x37a   : > { %v4315_v63 = vpop.f32.mrb[124].mxu1 }
 0x37b   : > { %v4316_v1 = vpop.f32.mrb[125].mxu1  ;;  %v4203_v59 = vpop.f32.mrb[124].mxu0  ;;  %v6180_v32 = vadd.f32 %v4314_v26, %v2742_v28 }
 0x37c   : > { %v4317_v2 = vadd.f32 %v4316_v1, %v4315_v63  ;;  %v4318_v39 = vpop.f32.mrb[126].mxu1  ;;  %v4204_v14 = vpop.f32.mrb[125].mxu0 }
 0x37d   : > { %v4319_v12 = vpop.f32.mrb[127].mxu1  ;;  %v4205_v35 = vadd.f32 %v4204_v14, %v4203_v59  ;;  %v4206_v11 = vpop.f32.mrb[126].mxu0 }
 0x37e   : > { %v4320_v40 = vadd.f32 %v4319_v12, %v4318_v39  ;;  %v4207_v6 = vpop.f32.mrb[127].mxu0 }
 0x37f   : > { %v2747_v30 = vadd.f32 %v4205_v35, %v6078_v27  ;;  %v4208_v3 = vadd.f32 %v4207_v6, %v4206_v11 }
 0x381   : > { %v2750_v17 = vadd.f32 %v4208_v3, %v6081_v58  ;;  %v6184_v9 = vadd.f32 %v4317_v2, %v2747_v30 }
 0x382   : > { %v4321_v24 = vpop.f32.mrb[128].mxu1 }
 0x383   : > { %v4322_v60 = vpop.f32.mrb[129].mxu1  ;;  %v4209_v50 = vpop.f32.mrb[128].mxu0  ;;  %v6186_v43 = vadd.f32 %v4320_v40, %v2750_v17 }
 0x384   : > { %v4323_v15 = vadd.f32 %v4322_v60, %v4321_v24  ;;  %v4324_v13 = vpop.f32.mrb[130].mxu1  ;;  %v4210_v4 = vpop.f32.mrb[129].mxu0 }
 0x385   : > { %v4325_v45 = vpop.f32.mrb[131].mxu1  ;;  %v4211_v21 = vadd.f32 %v4210_v4, %v4209_v50  ;;  %v4212_v47 = vpop.f32.mrb[130].mxu0 }
 0x386   : > { %v4326_v26 = vadd.f32 %v4325_v45, %v4324_v13  ;;  %v4213_v22 = vpop.f32.mrb[131].mxu0 }
 0x387   : > { %v2755_v27 = vadd.f32 %v4211_v21, %v6084_v62  ;;  %v4214_v51 = vadd.f32 %v4213_v22, %v4212_v47 }
 0x389   : > { %v2758_v58 = vadd.f32 %v4214_v51, %v6087_v20  ;;  %v6190_v28 = vadd.f32 %v4323_v15, %v2755_v27 }
 0x38a   : > { %v4327_v8 = vpop.f32.mrb[132].mxu1 }
 0x38b   : > { %v4328_v63 = vpop.f32.mrb[133].mxu1  ;;  %v4215_v1 = vpop.f32.mrb[132].mxu0  ;;  %v6192_v39 = vadd.f32 %v4326_v26, %v2758_v58 }
 0x38c   : > { %v4329_v59 = vadd.f32 %v4328_v63, %v4327_v8  ;;  %v4330_v2 = vpop.f32.mrb[134].mxu1  ;;  %v4216_v14 = vpop.f32.mrb[133].mxu0 }
 0x38d   : > { %v4331_v12 = vpop.f32.mrb[135].mxu1  ;;  %v4217_v35 = vadd.f32 %v4216_v14, %v4215_v1  ;;  %v4218_v11 = vpop.f32.mrb[134].mxu0 }
 0x38e   : > { %v4332_v40 = vadd.f32 %v4331_v12, %v4330_v2  ;;  %v4219_v6 = vpop.f32.mrb[135].mxu0 }
 0x38f   : > { %v2763_v62 = vadd.f32 %v4217_v35, %v6093_v46  ;;  %v4220_v30 = vadd.f32 %v4219_v6, %v4218_v11 }
 0x391   : > { %v2766_v20 = vadd.f32 %v4220_v30, %v6096_v57  ;;  %v6196_v17 = vadd.f32 %v4329_v59, %v2763_v62 }
 0x392   : > { %v4333_v3 = vpop.f32.mrb[136].mxu1 }
 0x393   : > { %v4334_v24 = vpop.f32.mrb[137].mxu1  ;;  %v4221_v60 = vpop.f32.mrb[136].mxu0  ;;  %v6198_v13 = vadd.f32 %v4332_v40, %v2766_v20 }
 0x394   : > { %v4335_v50 = vadd.f32 %v4334_v24, %v4333_v3  ;;  %v4336_v15 = vpop.f32.mrb[138].mxu1  ;;  %v4222_v4 = vpop.f32.mrb[137].mxu0 }
 0x395   : > { %v4337_v45 = vpop.f32.mrb[139].mxu1  ;;  %v4223_v21 = vadd.f32 %v4222_v4, %v4221_v60  ;;  %v4224_v47 = vpop.f32.mrb[138].mxu0 }
 0x396   : > { %v4338_v26 = vadd.f32 %v4337_v45, %v4336_v15  ;;  %v4225_v22 = vpop.f32.mrb[139].mxu0 }
 0x397   : > { %v2771_v46 = vadd.f32 %v4223_v21, %v6099_v37  ;;  %v4226_v27 = vadd.f32 %v4225_v22, %v4224_v47 }
 0x399   : > { %v2774_v57 = vadd.f32 %v4226_v27, %v6102_v55  ;;  %v6202_v58 = vadd.f32 %v4335_v50, %v2771_v46 }
 0x39a   : > { %v4339_v51 = vpop.f32.mrb[140].mxu1 }
 0x39b   : > { %v4340_v8 = vpop.f32.mrb[141].mxu1  ;;  %v4227_v63 = vpop.f32.mrb[140].mxu0  ;;  %v6204_v2 = vadd.f32 %v4338_v26, %v2774_v57 }
 0x39c   : > { %v4341_v1 = vadd.f32 %v4340_v8, %v4339_v51  ;;  %v4342_v59 = vpop.f32.mrb[142].mxu1  ;;  %v4228_v14 = vpop.f32.mrb[141].mxu0 }
 0x39d   : > { %v4343_v12 = vpop.f32.mrb[143].mxu1  ;;  %v4229_v35 = vadd.f32 %v4228_v14, %v4227_v63  ;;  %v4230_v11 = vpop.f32.mrb[142].mxu0 }
 0x39e   : > { %v4344_v40 = vadd.f32 %v4343_v12, %v4342_v59  ;;  %v4231_v6 = vpop.f32.mrb[143].mxu0 }
 0x39f   : > { %v2779_v37 = vadd.f32 %v4229_v35, %v6108_v56  ;;  %v4232_v62 = vadd.f32 %v4231_v6, %v4230_v11 }
 0x3a1   : > { %v2782_v55 = vadd.f32 %v4232_v62, %v6111_v38  ;;  %v6208_v20 = vadd.f32 %v4341_v1, %v2779_v37 }
 0x3a2   : > { %v4345_v30 = vpop.f32.mrb[144].mxu1 }
 0x3a3   : > { %v4346_v3 = vpop.f32.mrb[145].mxu1  ;;  %v4233_v24 = vpop.f32.mrb[144].mxu0  ;;  %v6210_v15 = vadd.f32 %v4344_v40, %v2782_v55 }
 0x3a4   : > { %v4347_v60 = vadd.f32 %v4346_v3, %v4345_v30  ;;  %v4348_v50 = vpop.f32.mrb[146].mxu1  ;;  %v4234_v4 = vpop.f32.mrb[145].mxu0 }
 0x3a5   : > { %v4349_v45 = vpop.f32.mrb[147].mxu1  ;;  %v4235_v21 = vadd.f32 %v4234_v4, %v4233_v24  ;;  %v4236_v47 = vpop.f32.mrb[146].mxu0 }
 0x3a6   : > { %v4350_v26 = vadd.f32 %v4349_v45, %v4348_v50  ;;  %v4237_v22 = vpop.f32.mrb[147].mxu0 }
 0x3a7   : > { %v2787_v56 = vadd.f32 %v4235_v21, %v6114_v52  ;;  %v4238_v46 = vadd.f32 %v4237_v22, %v4236_v47 }
 0x3a9   : > { %v2790_v38 = vadd.f32 %v4238_v46, %v6117_v49  ;;  %v6214_v57 = vadd.f32 %v4347_v60, %v2787_v56 }
 0x3aa   : > { %v4351_v27 = vpop.f32.mrb[148].mxu1 }
 0x3ab   : > { %v4352_v51 = vpop.f32.mrb[149].mxu1  ;;  %v4239_v8 = vpop.f32.mrb[148].mxu0  ;;  %v6216_v59 = vadd.f32 %v4350_v26, %v2790_v38 }
 0x3ac   : > { %v4353_v63 = vadd.f32 %v4352_v51, %v4351_v27  ;;  %v4354_v1 = vpop.f32.mrb[150].mxu1  ;;  %v4240_v14 = vpop.f32.mrb[149].mxu0 }
 0x3ad   : > { %v4355_v12 = vpop.f32.mrb[151].mxu1  ;;  %v4241_v35 = vadd.f32 %v4240_v14, %v4239_v8  ;;  %v4242_v11 = vpop.f32.mrb[150].mxu0 }
 0x3ae   : > { %v4356_v40 = vadd.f32 %v4355_v12, %v4354_v1  ;;  %v4243_v6 = vpop.f32.mrb[151].mxu0 }
 0x3af   : > { %v2795_v52 = vadd.f32 %v4241_v35, %v6122_v29  ;;  %v4244_v37 = vadd.f32 %v4243_v6, %v4242_v11 }
 0x3b1   : > { %v2798_v49 = vadd.f32 %v4244_v37, %v6124_v31  ;;  %v6220_v55 = vadd.f32 %v4353_v63, %v2795_v52 }
 0x3b2   : > { %v4357_v62 = vpop.f32.mrb[152].mxu1 }
 0x3b3   : > { %v4358_v30 = vpop.f32.mrb[153].mxu1  ;;  %v4245_v3 = vpop.f32.mrb[152].mxu0  ;;  %v6222_v50 = vadd.f32 %v4356_v40, %v2798_v49 }
 0x3b4   : > { %v4359_v24 = vadd.f32 %v4358_v30, %v4357_v62  ;;  %v4360_v60 = vpop.f32.mrb[154].mxu1  ;;  %v4246_v4 = vpop.f32.mrb[153].mxu0  ;;  %v6237_v62 = vld [vmem:[%s6535_s8] ss:$0 sm:$0xff] }
 0x3b5   : > { %v4361_v45 = vpop.f32.mrb[155].mxu1  ;;  %v4247_v21 = vadd.f32 %v4246_v4, %v4245_v3  ;;  %v4248_v47 = vpop.f32.mrb[154].mxu0 }
 0x3b6   : > { %v4362_v26 = vadd.f32 %v4361_v45, %v4360_v60  ;;  %v4249_v22 = vpop.f32.mrb[155].mxu0 }
 0x3b7   : > { %v2803_v29 = vadd.f32 %v4247_v21, %v6126_v44  ;;  %v4250_v56 = vadd.f32 %v4249_v22, %v4248_v47 }
 0x3b9   : > { %v2806_v31 = vadd.f32 %v4250_v56, %v6128_v42  ;;  %v6226_v38 = vadd.f32 %v4359_v24, %v2803_v29 }
 0x3ba   : > { %v4363_v46 = vpop.f32.mrb[156].mxu1 }
 0x3bb   : > { %v4364_v27 = vpop.f32.mrb[157].mxu1  ;;  %v4251_v51 = vpop.f32.mrb[156].mxu0  ;;  %v6228_v1 = vadd.f32 %v4362_v26, %v2806_v31 }
 0x3bc   : > { %v4365_v8 = vadd.f32 %v4364_v27, %v4363_v46  ;;  %v4366_v63 = vpop.f32.mrb[158].mxu1  ;;  %v4252_v14 = vpop.f32.mrb[157].mxu0 }
 0x3bd   : > { %v4367_v12 = vpop.f32.mrb[159].mxu1  ;;  %v4253_v35 = vadd.f32 %v4252_v14, %v4251_v51  ;;  %v4254_v11 = vpop.f32.mrb[158].mxu0 }
 0x3be   : > { %v4368_v40 = vadd.f32 %v4367_v12, %v4366_v63  ;;  %v4255_v6 = vpop.f32.mrb[159].mxu0 }
 0x3bf   : > { %v2811_v44 = vadd.f32 %v4253_v35, %v6133_v34  ;;  %v4256_v52 = vadd.f32 %v4255_v6, %v4254_v11  ;;  %v6245_v34 = vld [vmem:[%s6536_s9] ss:$0 sm:$0xff] }
 0x3c1   : > { %v2814_v42 = vadd.f32 %v4256_v52, %v6135_v7  ;;  %v6232_v37 = vadd.f32 %v4365_v8, %v2811_v44 }
 0x3c3   : > { %v4519_v49 = vpop.f32.mrb[160].mxu0  ;;  %v6239_v30 = vadd.f32 %v4368_v40, %v2814_v42 }
 0x3c4   : > { %v3021_v3 = vadd.f32 %v4519_v49, %v6148_v16  ;;  %v3012_v24 = vpop.f32.mrb[161].mxu0 }
 0x3c5   : > { %v3013_v7 = vadd.f32 %v3012_v24, %v6139_v18  ;;  %v4520_v60 = vpop.f32.mrb[162].mxu0 }
 0x3c6   : > { %v3148_v4 = vmul.f32 %v6237_v62, %v3021_v3  ;;  %v3024_v45 = vadd.f32 %v4520_v60, %v6150_v61  ;;  %v3015_v21 = vpop.f32.mrb[163].mxu0 }
 0x3c7   : > { %v3146_v47 = vmul.f32 %v6237_v62, %v3013_v7  ;;  %v3016_v26 = vadd.f32 %v3015_v21, %v6141_v5 }
 0x3c8   : > { %v3187_v16 = vadd.f32 %v6245_v34, %v3148_v4  ;;  %v3149_v22 = vmul.f32 %v6237_v62, %v3024_v45 }
 0x3c9   : > { %v3185_v29 = vadd.f32 %v6245_v34, %v3146_v47  ;;  %v3147_v56 = vmul.f32 %v6237_v62, %v3016_v26 }
 0x3ca   : > { %v3188_v18 = vadd.f32 %v6245_v34, %v3149_v22  ;;  %v3219_v27 = vmax.f32 %v3187_v16, 0.0 }
 0x3cb   : > { %v3186_v31 = vadd.f32 %v6245_v34, %v3147_v56  ;;  %v4523_v46 = vpop.f32.mrb[164].mxu0  ;;  %v3217_v63 = vmax.f32 %v3185_v29, 0.0 }
 0x3cc   : > { %v3220_v61 = vmax.f32 %v3188_v18, 0.0  ;;  %v3037_v51 = vadd.f32 %v4523_v46, %v6160_v33  ;;  %v3028_v8 = vpop.f32.mrb[165].mxu0 }
 0x3cd   : > { %v3218_v5 = vmax.f32 %v3186_v31, 0.0  ;;  %v3029_v14 = vadd.f32 %v3028_v8, %v6154_v25  ;;  %v4524_v12 = vpop.f32.mrb[166].mxu0 }
 0x3ce   : > { %v3250_v35 = vpack.c.bf16 %v3220_v61, %v3219_v27  ;;  %v3152_v11 = vmul.f32 %v6237_v62, %v3037_v51  ;;  %v3040_v40 = vadd.f32 %v4524_v12, %v6162_v0  ;;  %v3031_v6 = vpop.f32.mrb[167].mxu0 }
 0x3cf   : > { %v3150_v44 = vmul.f32 %v6237_v62, %v3029_v14  ;;  %v3032_v52 = vadd.f32 %v3031_v6, %v6156_v23  ;;  %v3249_v42 = vpack.c.bf16 %v3218_v5, %v3217_v63 }
 0x3d0   : > { %v3191_v49 = vadd.f32 %v6245_v34, %v3152_v11  ;;  %v3153_v33 = vmul.f32 %v6237_v62, %v3040_v40 }
 0x3d1   : > { %v3189_v3 = vadd.f32 %v6245_v34, %v3150_v44  ;;  %v3151_v25 = vmul.f32 %v6237_v62, %v3032_v52  ;;  %4565 = vmatprep.mubr.bf16.mxu0 %v3249_v42 }
 0x3d2   : > { %v3192_v24 = vadd.f32 %v6245_v34, %v3153_v33  ;;  %4566 = vmatmul.mubr.bf16.vlgmr.msra.gmra.mrb[192].mxu0 %v3250_v35  ;;  %v3223_v60 = vmax.f32 %v3191_v49, 0.0 }
 0x3d3   : > { %v3190_v0 = vadd.f32 %v6245_v34, %v3151_v25  ;;  %v4527_v7 = vpop.f32.mrb[168].mxu0  ;;  %v3221_v21 = vmax.f32 %v3189_v3, 0.0 }
 0x3d4   : > { %v3224_v4 = vmax.f32 %v3192_v24, 0.0  ;;  %v3053_v23 = vadd.f32 %v4527_v7, %v6172_v19  ;;  %v3044_v45 = vpop.f32.mrb[169].mxu0 }
 0x3d5   : > { %v3222_v47 = vmax.f32 %v3190_v0, 0.0  ;;  %v3045_v26 = vadd.f32 %v3044_v45, %v6166_v48  ;;  %v4528_v16 = vpop.f32.mrb[170].mxu0 }
 0x3d6   : > { %v3252_v22 = vpack.c.bf16 %v3224_v4, %v3223_v60  ;;  %v3156_v29 = vmul.f32 %v6237_v62, %v3053_v23  ;;  %v3056_v56 = vadd.f32 %v4528_v16, %v6174_v41  ;;  %v3047_v18 = vpop.f32.mrb[171].mxu0 }
 0x3d7   : > { %v3154_v31 = vmul.f32 %v6237_v62, %v3045_v26  ;;  %v3048_v46 = vadd.f32 %v3047_v18, %v6168_v36  ;;  %v3251_v27 = vpack.c.bf16 %v3222_v47, %v3221_v21 }
 0x3d8   : > { %v3195_v61 = vadd.f32 %v6245_v34, %v3156_v29  ;;  %v3157_v19 = vmul.f32 %v6237_v62, %v3056_v56 }
 0x3d9   : > { %v3193_v51 = vadd.f32 %v6245_v34, %v3154_v31  ;;  %v3155_v48 = vmul.f32 %v6237_v62, %v3048_v46  ;;  %4569 = vmatprep.mubr.bf16.mxu1 %v3251_v27 }
 0x3da   : > { %v3196_v8 = vadd.f32 %v6245_v34, %v3157_v19  ;;  %4570 = vmatmul.mubr.bf16.vlgmr.msra.gmra.mrb[160].mxu1 %v3252_v22  ;;  %v3227_v5 = vmax.f32 %v3195_v61, 0.0 }
 0x3db   : > { %v3194_v41 = vadd.f32 %v6245_v34, %v3155_v48  ;;  %v4531_v63 = vpop.f32.mrb[172].mxu0  ;;  %v3225_v35 = vmax.f32 %v3193_v51, 0.0 }
 0x3dc   : > { %v3228_v14 = vmax.f32 %v3196_v8, 0.0  ;;  %v3069_v36 = vadd.f32 %v4531_v63, %v6184_v9  ;;  %v3060_v12 = vpop.f32.mrb[173].mxu0 }
 0x3dd   : > { %v3226_v11 = vmax.f32 %v3194_v41, 0.0  ;;  %v3061_v40 = vadd.f32 %v3060_v12, %v6178_v10  ;;  %v4532_v6 = vpop.f32.mrb[174].mxu0 }
 0x3de   : > { %v3160_v44 = vmul.f32 %v6237_v62, %v3069_v36  ;;  %v3072_v52 = vadd.f32 %v4532_v6, %v6186_v43  ;;  %v3063_v42 = vpop.f32.mrb[175].mxu0  ;;  %v3254_v49 = vpack.c.bf16 %v3228_v14, %v3227_v5 }
 0x3df   : > { %v3158_v33 = vmul.f32 %v6237_v62, %v3061_v40  ;;  %v3064_v3 = vadd.f32 %v3063_v42, %v6180_v32  ;;  %v3253_v25 = vpack.c.bf16 %v3226_v11, %v3225_v35 }
 0x3e0   : > { %v3199_v24 = vadd.f32 %v6245_v34, %v3160_v44  ;;  %v3161_v9 = vmul.f32 %v6237_v62, %v3072_v52 }
 0x3e1   : > { %v3197_v0 = vadd.f32 %v6245_v34, %v3158_v33  ;;  %v3159_v10 = vmul.f32 %v6237_v62, %v3064_v3  ;;  %4573 = vmatprep.mubr.bf16.mxu1 %v3253_v25 }
 0x3e2   : > { %v3200_v7 = vadd.f32 %v6245_v34, %v3161_v9  ;;  %4574 = vmatmul.mubr.bf16.gmra.mrb[164].mxu1 %v3254_v49  ;;  %v3231_v4 = vmax.f32 %v3199_v24, 0.0 }
 0x3e3   : > { %v3198_v43 = vadd.f32 %v6245_v34, %v3159_v10  ;;  %v4535_v60 = vpop.f32.mrb[176].mxu0  ;;  %v3229_v21 = vmax.f32 %v3197_v0, 0.0 }
 0x3e4   : > { %v3232_v23 = vmax.f32 %v3200_v7, 0.0  ;;  %v3085_v32 = vadd.f32 %v4535_v60, %v6196_v17  ;;  %v3076_v45 = vpop.f32.mrb[177].mxu0 }
 0x3e5   : > { %v3230_v47 = vmax.f32 %v3198_v43, 0.0  ;;  %v3077_v26 = vadd.f32 %v3076_v45, %v6190_v28  ;;  %v4536_v16 = vpop.f32.mrb[178].mxu0 }
 0x3e6   : > { %v3164_v22 = vmul.f32 %v6237_v62, %v3085_v32  ;;  %v3088_v29 = vadd.f32 %v4536_v16, %v6198_v13  ;;  %v3079_v56 = vpop.f32.mrb[179].mxu0  ;;  %v3256_v18 = vpack.c.bf16 %v3232_v23, %v3231_v4 }
 0x3e7   : > { %v3162_v31 = vmul.f32 %v6237_v62, %v3077_v26  ;;  %v3080_v46 = vadd.f32 %v3079_v56, %v6192_v39  ;;  %v3255_v27 = vpack.c.bf16 %v3230_v47, %v3229_v21 }
 0x3e8   : > { %v3203_v61 = vadd.f32 %v6245_v34, %v3164_v22  ;;  %v3165_v17 = vmul.f32 %v6237_v62, %v3088_v29 }
 0x3e9   : > { %v3201_v19 = vadd.f32 %v6245_v34, %v3162_v31  ;;  %v3163_v28 = vmul.f32 %v6237_v62, %v3080_v46  ;;  %4577 = vmatprep.mubr.bf16.mxu1 %v3255_v27 }
 0x3ea   : > { %v3204_v51 = vadd.f32 %v6245_v34, %v3165_v17  ;;  %4578 = vmatmul.mubr.bf16.gmra.mrb[168].mxu1 %v3256_v18  ;;  %v3235_v8 = vmax.f32 %v3203_v61, 0.0 }
 0x3eb   : > { %v3202_v13 = vadd.f32 %v6245_v34, %v3163_v28  ;;  %v4539_v48 = vpop.f32.mrb[180].mxu0  ;;  %v3233_v5 = vmax.f32 %v3201_v19, 0.0 }
 0x3ec   : > { %v3236_v41 = vmax.f32 %v3204_v51, 0.0  ;;  %v3101_v39 = vadd.f32 %v4539_v48, %v6208_v20  ;;  %v3092_v63 = vpop.f32.mrb[181].mxu0 }
 0x3ed   : > { %v3234_v14 = vmax.f32 %v3202_v13, 0.0  ;;  %v3093_v36 = vadd.f32 %v3092_v63, %v6202_v58  ;;  %v4540_v12 = vpop.f32.mrb[182].mxu0 }
 0x3ee   : > { %v3168_v35 = vmul.f32 %v6237_v62, %v3101_v39  ;;  %v3104_v11 = vadd.f32 %v4540_v12, %v6210_v15  ;;  %v3095_v40 = vpop.f32.mrb[183].mxu0  ;;  %v3258_v6 = vpack.c.bf16 %v3236_v41, %v3235_v8 }
 0x3ef   : > { %v3166_v44 = vmul.f32 %v6237_v62, %v3093_v36  ;;  %v3096_v52 = vadd.f32 %v3095_v40, %v6204_v2  ;;  %v3257_v42 = vpack.c.bf16 %v3234_v14, %v3233_v5 }
 0x3f0   : > { %v3207_v49 = vadd.f32 %v6245_v34, %v3168_v35  ;;  %v3169_v20 = vmul.f32 %v6237_v62, %v3104_v11 }
 0x3f1   : > { %v3205_v33 = vadd.f32 %v6245_v34, %v3166_v44  ;;  %v3167_v58 = vmul.f32 %v6237_v62, %v3096_v52  ;;  %4581 = vmatprep.mubr.bf16.mxu1 %v3257_v42  ;;  %v6350_v44 = vld [vmem:[%s6539_s12] ss:$0 sm:$0xff] }
 0x3f2   : > { %v3208_v3 = vadd.f32 %v6245_v34, %v3169_v20  ;;  %4582 = vmatmul.mubr.bf16.gmra.mrb[172].mxu1 %v3258_v6  ;;  %v3239_v24 = vmax.f32 %v3207_v49, 0.0  ;;  %v6345_v6 = vld [vmem:[%s6538_s11] ss:$0 sm:$0xff] }
 0x3f3   : > { %v3206_v15 = vadd.f32 %v6245_v34, %v3167_v58  ;;  %v4543_v25 = vpop.f32.mrb[184].mxu0  ;;  %v3237_v10 = vmax.f32 %v3205_v33, 0.0 }
 0x3f4   : > { %v3240_v9 = vmax.f32 %v3208_v3, 0.0  ;;  %v3117_v2 = vadd.f32 %v4543_v25, %v6220_v55  ;;  %v3108_v0 = vpop.f32.mrb[185].mxu0 }
 0x3f5   : > { %v3238_v7 = vmax.f32 %v3206_v15, 0.0  ;;  %v3109_v43 = vadd.f32 %v3108_v0, %v6214_v57  ;;  %v4544_v60 = vpop.f32.mrb[186].mxu0  ;;  %v6646_v0 = vmax.f32 %v5071_v54, 0.0 }
 0x3f6   : > { %v3172_v4 = vmul.f32 %v6237_v62, %v3117_v2  ;;  %v3120_v23 = vadd.f32 %v4544_v60, %v6222_v50  ;;  %v3111_v32 = vpop.f32.mrb[187].mxu0  ;;  %v3260_v45 = vpack.c.bf16 %v3240_v9, %v3239_v24  ;;  %v6645_v24 = vmax.f32 %v5068_v53, 0.0 }
 0x3f7   : > { %v3170_v21 = vmul.f32 %v6237_v62, %v3109_v43  ;;  %v3112_v47 = vadd.f32 %v3111_v32, %v6216_v59  ;;  %v3259_v26 = vpack.c.bf16 %v3238_v7, %v3237_v10  ;;  %v6647_v7 = vld [vmem:[#allocation6_spill] sm:$0xff] }
 0x3f8   : > { %v3211_v16 = vadd.f32 %v6245_v34, %v3172_v4  ;;  %v3173_v55 = vmul.f32 %v6237_v62, %v3120_v23  ;;  %v6648_v43 = vmax.f32 %v6647_v7, 0.0  ;;  %v6649_v23 = vld [vmem:[#allocation5_spill] sm:$0xff] }
 0x3f9   : > { %v3209_v22 = vadd.f32 %v6245_v34, %v3170_v21  ;;  %v3171_v57 = vmul.f32 %v6237_v62, %v3112_v47  ;;  %4585 = vmatprep.mubr.bf16.mxu1 %v3259_v26  ;;  %v6650_v32 = vmax.f32 %v6649_v23, 0.0 }
 0x3fa   : > { %v3212_v29 = vadd.f32 %v6245_v34, %v3173_v55  ;;  %4586 = vmatmul.mubr.bf16.gmra.mrb[176].mxu1 %v3260_v45  ;;  %v3243_v18 = vmax.f32 %v3211_v16, 0.0 }
 0x3fb   : > { %v3210_v50 = vadd.f32 %v6245_v34, %v3171_v57  ;;  %v4547_v56 = vpop.f32.mrb[188].mxu0  ;;  %v3241_v27 = vmax.f32 %v3209_v22, 0.0 }
 0x3fc   : > { %v3244_v31 = vmax.f32 %v3212_v29, 0.0  ;;  %v3133_v59 = vadd.f32 %v4547_v56, %v6232_v37  ;;  %v3124_v46 = vpop.f32.mrb[189].mxu0 }
 0x3fd   : > { %v3242_v61 = vmax.f32 %v3210_v50, 0.0  ;;  %v3125_v17 = vadd.f32 %v3124_v46, %v6226_v38  ;;  %v4548_v19 = vpop.f32.mrb[190].mxu0  ;;  %v6651_v46 = vld [vmem:[#allocation8_spill] sm:$0xff] }
 0x3fe   : > { %v3176_v28 = vmul.f32 %v6237_v62, %v3133_v59  ;;  %v3136_v51 = vadd.f32 %v4548_v19, %v6239_v30  ;;  %v3127_v13 = vpop.f32.mrb[191].mxu0  ;;  %v3262_v48 = vpack.c.bf16 %v3244_v31, %v3243_v18 }
 0x3ff   : > { %v3174_v8 = vmul.f32 %v6237_v62, %v3125_v17  ;;  %v3128_v41 = vadd.f32 %v3127_v13, %v6228_v1  ;;  %v3261_v39 = vpack.c.bf16 %v3242_v61, %v3241_v27  ;;  %v6652_v27 = vmax.f32 %v6651_v46, 0.0 }
 0x400   : > { %v3215_v63 = vadd.f32 %v6245_v34, %v3176_v28  ;;  %v3177_v37 = vmul.f32 %v6237_v62, %v3136_v51  ;;  %v6653_v28 = vld [vmem:[#allocation7_spill] sm:$0xff] }
 0x401   : > { %v3213_v5 = vadd.f32 %v6245_v34, %v3174_v8  ;;  %v3175_v38 = vmul.f32 %v6237_v62, %v3128_v41  ;;  %4589 = vmatprep.mubr.bf16.mxu1 %v3261_v39  ;;  %v6654_v51 = vmax.f32 %v6653_v28, 0.0  ;;  %v6655_v41 = vld [vmem:[#allocation10_spill] sm:$0xff] }
 0x402   : > { %v3216_v14 = vadd.f32 %v6245_v34, %v3177_v37  ;;  %4590 = vmatmul.mubr.bf16.gmra.mrb[180].mxu1 %v3262_v48  ;;  %v3247_v36 = vmax.f32 %v3215_v63, 0.0  ;;  %v6656_v39 = vmax.f32 %v6655_v41, 0.0 }
 0x403   : > { %v3214_v30 = vadd.f32 %v6245_v34, %v3175_v38  ;;  %v3245_v35 = vmax.f32 %v3213_v5, 0.0 }
 0x404   : > { %v3248_v12 = vmax.f32 %v3216_v14, 0.0 }
 0x405   : > { %v3246_v11 = vmax.f32 %v3214_v30, 0.0  ;;  %v6657_v30 = vld [vmem:[#allocation9_spill] sm:$0xff] }
 0x406   : > { %v3264_v1 = vpack.c.bf16 %v3248_v12, %v3247_v36  ;;  %v6658_v36 = vmax.f32 %v6657_v30, 0.0 }
 0x407   : > { %v3263_v40 = vpack.c.bf16 %v3246_v11, %v3245_v35 }
 0x409   : > { %4593 = vmatprep.mubr.bf16.mxu1 %v3263_v40 }
 0x40a   : > { %4594 = vmatmul.mubr.bf16.gmra.mrb[184].mxu1 %v3264_v1 }
 0x4a5   : > { %v4567_v62 = vpop.f32.mrb[192].mxu0 }
 0x4a6   : > { %v3499_v34 = vmul.f32 %v4567_v62, %v6345_v6  ;;  %v3363_v52 = vpop.f32.mrb[193].mxu0 }
 0x4a7   : > { %v3497_v42 = vmul.f32 %v6345_v6, %v3363_v52  ;;  %v4568_v49 = vpop.f32.mrb[194].mxu0 }
 0x4a8   : > { %v3538_v20 = vadd.f32 %v6350_v44, %v3499_v34  ;;  %v3500_v33 = vmul.f32 %v4568_v49, %v6345_v6  ;;  %v3366_v58 = vpop.f32.mrb[195].mxu0 }
 0x4a9   : > { %v3536_v3 = vadd.f32 %v6350_v44, %v3497_v42  ;;  %v3498_v15 = vmul.f32 %v6345_v6, %v3366_v58 }
 0x4aa   : > { %v3539_v25 = vadd.f32 %v6350_v44, %v3500_v33  ;;  %v3570_v10 = vadd.f32 %v3538_v20, %v6646_v0 }
 0x4ab   : > { %v3568_v9 = vadd.f32 %v3536_v3, %v6645_v24  ;;  %v3537_v2 = vadd.f32 %v6350_v44, %v3498_v15  ;;  %v6659_v15 = vld [vmem:[#allocation12_spill] sm:$0xff] }
 0x4ac   : > { %v3571_v45 = vadd.f32 %v3539_v25, %v6650_v32  ;;  %v3602_v22 = vmax.f32 %v3570_v10, 0.0  ;;  %v6660_v25 = vmax.f32 %v6659_v15, 0.0 }
 0x4ad   : > { %v3569_v60 = vadd.f32 %v3537_v2, %v6648_v43  ;;  %v4571_v4 = vpop.f32.mrb[160].mxu1  ;;  %v3600_v26 = vmax.f32 %v3568_v9, 0.0  ;;  %v6661_v2 = vld [vmem:[#allocation11_spill] sm:$0xff] }
 0x4ae   : > { %v3503_v21 = vmul.f32 %v4571_v4, %v6345_v6  ;;  %v3379_v47 = vpop.f32.mrb[161].mxu1  ;;  %v3603_v31 = vmax.f32 %v3571_v45, 0.0  ;;  %v6662_v0 = vmax.f32 %v6661_v2, 0.0  ;;  %v6665_v45 = vld [vmem:[#allocation13_spill] sm:$0xff] }
 0x4af   : > { %v3601_v16 = vmax.f32 %v3569_v60, 0.0  ;;  %v3501_v53 = vmul.f32 %v6345_v6, %v3379_v47  ;;  %v4572_v55 = vpop.f32.mrb[162].mxu1  ;;  %v6663_v60 = vld [vmem:[#allocation14_spill] sm:$0xff] }
 0x4b0   : > { %v3504_v57 = vmul.f32 %v4572_v55, %v6345_v6  ;;  %v3382_v54 = vpop.f32.mrb[163].mxu1  ;;  %v3542_v50 = vadd.f32 %v6350_v44, %v3503_v21  ;;  %v6664_v4 = vmax.f32 %v6663_v60, 0.0  ;;  %v6666_v21 = vmax.f32 %v6665_v45, 0.0 }
 0x4b1   : > { %v3632_v29 = vadd.f32 %v3601_v16, %v3600_v26  ;;  %v3540_v56 = vadd.f32 %v6350_v44, %v3501_v53  ;;  %v3502_v18 = vmul.f32 %v6345_v6, %v3382_v54 }
 0x4b2   : > { %v3543_v17 = vadd.f32 %v6350_v44, %v3504_v57  ;;  %v3574_v13 = vadd.f32 %v3542_v50, %v6654_v51 }
 0x4b3   : > { %v3633_v59 = vadd.f32 %v3632_v29, %v3602_v22  ;;  %v3572_v61 = vadd.f32 %v3540_v56, %v6652_v27  ;;  %v3541_v19 = vadd.f32 %v6350_v44, %v3502_v18 }
 0x4b4   : > { %v3575_v12 = vadd.f32 %v3543_v17, %v6658_v36  ;;  %v3606_v52 = vmax.f32 %v3574_v13, 0.0  ;;  %v6669_v13 = vld [vmem:[#allocation15_spill] sm:$0xff] }
 0x4b5   : > { %v3604_v48 = vmax.f32 %v3572_v61, 0.0  ;;  %v3634_v8 = vadd.f32 %v3633_v59, %v3603_v31  ;;  %v3573_v63 = vadd.f32 %v3541_v19, %v6656_v39  ;;  %v4575_v37 = vpop.f32.mrb[164].mxu1  ;;  %v6667_v61 = vld [vmem:[#allocation16_spill] sm:$0xff] }
 0x4b6   : > { %v3507_v5 = vmul.f32 %v4575_v37, %v6345_v6  ;;  %v3395_v38 = vpop.f32.mrb[165].mxu1  ;;  %v3607_v58 = vmax.f32 %v3575_v12, 0.0  ;;  %v6668_v17 = vmax.f32 %v6667_v61, 0.0  ;;  %v6673_v12 = vld [vmem:[#allocation17_spill] sm:$0xff] }
 0x4b7   : > { %v3635_v14 = vadd.f32 %v3634_v8, %v3604_v48  ;;  %v3605_v35 = vmax.f32 %v3573_v63, 0.0  ;;  %v3505_v11 = vmul.f32 %v6345_v6, %v3395_v38  ;;  %v4576_v1 = vpop.f32.mrb[166].mxu1  ;;  %v6670_v48 = vmax.f32 %v6669_v13, 0.0  ;;  %v6671_v63 = vld [vmem:[#allocation18_spill] sm:$0xff] }
 0x4b8   : > { %v3546_v40 = vadd.f32 %v6350_v44, %v3507_v5  ;;  %v3508_v62 = vmul.f32 %v4576_v1, %v6345_v6  ;;  %v3398_v34 = vpop.f32.mrb[167].mxu1  ;;  %v6672_v37 = vmax.f32 %v6671_v63, 0.0 }
 0x4b9   : > { %v3636_v42 = vadd.f32 %v3635_v14, %v3605_v35  ;;  %v3544_v49 = vadd.f32 %v6350_v44, %v3505_v11  ;;  %v3506_v20 = vmul.f32 %v6345_v6, %v3398_v34  ;;  %v6674_v35 = vmax.f32 %v6673_v12, 0.0 }
 0x4ba   : > { %v3547_v33 = vadd.f32 %v6350_v44, %v3508_v62  ;;  %v3578_v10 = vadd.f32 %v3546_v40, %v6662_v0 }
 0x4bb   : > { %v3637_v3 = vadd.f32 %v3636_v42, %v3606_v52  ;;  %v3576_v24 = vadd.f32 %v3544_v49, %v6660_v25  ;;  %v3545_v9 = vadd.f32 %v6350_v44, %v3506_v20 }
 0x4bc   : > { %v3579_v47 = vadd.f32 %v3547_v33, %v6666_v21  ;;  %v3610_v54 = vmax.f32 %v3578_v10, 0.0  ;;  %v6677_v10 = vld [vmem:[#allocation19_spill] sm:$0xff] }
 0x4bd   : > { %v3608_v7 = vmax.f32 %v3576_v24, 0.0  ;;  %v3638_v43 = vadd.f32 %v3637_v3, %v3607_v58  ;;  %v3577_v23 = vadd.f32 %v3545_v9, %v6664_v4  ;;  %v4579_v32 = vpop.f32.mrb[168].mxu1  ;;  %v6675_v24 = vld [vmem:[#allocation20_spill] sm:$0xff] }
 0x4be   : > { %v3511_v26 = vmul.f32 %v4579_v32, %v6345_v6  ;;  %v3411_v16 = vpop.f32.mrb[169].mxu1  ;;  %v3611_v46 = vmax.f32 %v3579_v47, 0.0  ;;  %v6676_v9 = vmax.f32 %v6675_v24, 0.0  ;;  %v6681_v47 = vld [vmem:[#allocation21_spill] sm:$0xff] }
 0x4bf   : > { %v3639_v53 = vadd.f32 %v3638_v43, %v3608_v7  ;;  %v3609_v55 = vmax.f32 %v3577_v23, 0.0  ;;  %v3509_v22 = vmul.f32 %v6345_v6, %v3411_v16  ;;  %v4580_v57 = vpop.f32.mrb[170].mxu1  ;;  %v6678_v7 = vmax.f32 %v6677_v10, 0.0  ;;  %v6679_v23 = vld [vmem:[#allocation22_spill] sm:$0xff] }
 0x4c0   : > { %v3512_v29 = vmul.f32 %v4580_v57, %v6345_v6  ;;  %v3414_v50 = vpop.f32.mrb[171].mxu1  ;;  %v3550_v18 = vadd.f32 %v6350_v44, %v3511_v26  ;;  %v6680_v32 = vmax.f32 %v6679_v23, 0.0  ;;  %v6682_v26 = vmax.f32 %v6681_v47, 0.0 }
 0x4c1   : > { %v3640_v56 = vadd.f32 %v3639_v53, %v3609_v55  ;;  %v3548_v31 = vadd.f32 %v6350_v44, %v3509_v22  ;;  %v3510_v59 = vmul.f32 %v6345_v6, %v3414_v50 }
 0x4c2   : > { %v3551_v28 = vadd.f32 %v6350_v44, %v3512_v29  ;;  %v3582_v8 = vadd.f32 %v3550_v18, %v6670_v48 }
 0x4c3   : > { %v3641_v27 = vadd.f32 %v3640_v56, %v3610_v54  ;;  %v3580_v19 = vadd.f32 %v3548_v31, %v6668_v17  ;;  %v3549_v51 = vadd.f32 %v6350_v44, %v3510_v59 }
 0x4c4   : > { %v3583_v11 = vadd.f32 %v3551_v28, %v6674_v35  ;;  %v3614_v49 = vmax.f32 %v3582_v8, 0.0  ;;  %v6685_v8 = vld [vmem:[#allocation23_spill] sm:$0xff] }
 0x4c5   : > { %v3612_v41 = vmax.f32 %v3580_v19, 0.0  ;;  %v3642_v39 = vadd.f32 %v3641_v27, %v3611_v46  ;;  %v3581_v5 = vadd.f32 %v3549_v51, %v6672_v37  ;;  %v4583_v38 = vpop.f32.mrb[172].mxu1  ;;  %v6683_v19 = vld [vmem:[#allocation24_spill] sm:$0xff] }
 0x4c6   : > { %v3515_v14 = vmul.f32 %v4583_v38, %v6345_v6  ;;  %v3427_v30 = vpop.f32.mrb[173].mxu1  ;;  %v3615_v15 = vmax.f32 %v3583_v11, 0.0  ;;  %v6684_v28 = vmax.f32 %v6683_v19, 0.0  ;;  %v6689_v11 = vld [vmem:[#allocation25_spill] sm:$0xff] }
 0x4c7   : > { %v3643_v36 = vadd.f32 %v3642_v39, %v3612_v41  ;;  %v3613_v1 = vmax.f32 %v3581_v5, 0.0  ;;  %v3513_v40 = vmul.f32 %v6345_v6, %v3427_v30  ;;  %v4584_v62 = vpop.f32.mrb[174].mxu1  ;;  %v6686_v41 = vmax.f32 %v6685_v8, 0.0  ;;  %v6687_v5 = vld [vmem:[#allocation26_spill] sm:$0xff] }
 0x4c8   : > { %v3554_v34 = vadd.f32 %v6350_v44, %v3515_v14  ;;  %v3516_v52 = vmul.f32 %v4584_v62, %v6345_v6  ;;  %v3430_v42 = vpop.f32.mrb[175].mxu1  ;;  %v6688_v38 = vmax.f32 %v6687_v5, 0.0 }
 0x4c9   : > { %v3644_v20 = vadd.f32 %v3643_v36, %v3613_v1  ;;  %v3552_v33 = vadd.f32 %v6350_v44, %v3513_v40  ;;  %v3514_v58 = vmul.f32 %v6345_v6, %v3430_v42  ;;  %v6690_v1 = vmax.f32 %v6689_v11, 0.0 }
 0x4ca   : > { %v3555_v3 = vadd.f32 %v6350_v44, %v3516_v52  ;;  %v3586_v43 = vadd.f32 %v3554_v34, %v6678_v7 }
 0x4cb   : > { %v3645_v25 = vadd.f32 %v3644_v20, %v3614_v49  ;;  %v3584_v2 = vadd.f32 %v3552_v33, %v6676_v9  ;;  %v3553_v0 = vadd.f32 %v6350_v44, %v3514_v58 }
 0x4cc   : > { %v3587_v16 = vadd.f32 %v3555_v3, %v6682_v26  ;;  %v3618_v50 = vmax.f32 %v3586_v43, 0.0  ;;  %v6693_v43 = vld [vmem:[#allocation27_spill] sm:$0xff] }
 0x4cd   : > { %v3616_v60 = vmax.f32 %v3584_v2, 0.0  ;;  %v3646_v4 = vadd.f32 %v3645_v25, %v3615_v15  ;;  %v3585_v45 = vadd.f32 %v3553_v0, %v6680_v32  ;;  %v4587_v21 = vpop.f32.mrb[176].mxu1  ;;  %v6691_v2 = vld [vmem:[#allocation28_spill] sm:$0xff] }
 0x4ce   : > { %v3519_v53 = vmul.f32 %v4587_v21, %v6345_v6  ;;  %v3443_v55 = vpop.f32.mrb[177].mxu1  ;;  %v3619_v61 = vmax.f32 %v3587_v16, 0.0  ;;  %v6692_v0 = vmax.f32 %v6691_v2, 0.0  ;;  %v6697_v16 = vld [vmem:[#allocation29_spill] sm:$0xff] }
 0x4cf   : > { %v3647_v22 = vadd.f32 %v3646_v4, %v3616_v60  ;;  %v3617_v57 = vmax.f32 %v3585_v45, 0.0  ;;  %v3517_v54 = vmul.f32 %v6345_v6, %v3443_v55  ;;  %v4588_v29 = vpop.f32.mrb[178].mxu1  ;;  %v6694_v60 = vmax.f32 %v6693_v43, 0.0  ;;  %v6695_v45 = vld [vmem:[#allocation30_spill] sm:$0xff] }
 0x4d0   : > { %v3520_v56 = vmul.f32 %v4588_v29, %v6345_v6  ;;  %v3446_v18 = vpop.f32.mrb[179].mxu1  ;;  %v3558_v59 = vadd.f32 %v6350_v44, %v3519_v53  ;;  %v6696_v21 = vmax.f32 %v6695_v45, 0.0  ;;  %v6698_v53 = vmax.f32 %v6697_v16, 0.0 }
 0x4d1   : > { %v3648_v31 = vadd.f32 %v3647_v22, %v3617_v57  ;;  %v3556_v46 = vadd.f32 %v6350_v44, %v3517_v54  ;;  %v3518_v27 = vmul.f32 %v6345_v6, %v3446_v18 }
 0x4d2   : > { %v3559_v13 = vadd.f32 %v6350_v44, %v3520_v56  ;;  %v3590_v39 = vadd.f32 %v3558_v59, %v6686_v41 }
 0x4d3   : > { %v3649_v17 = vadd.f32 %v3648_v31, %v3618_v50  ;;  %v3588_v51 = vadd.f32 %v3556_v46, %v6684_v28  ;;  %v3557_v48 = vadd.f32 %v6350_v44, %v3518_v27 }
 0x4d4   : > { %v3591_v40 = vadd.f32 %v3559_v13, %v6690_v1  ;;  %v3622_v33 = vmax.f32 %v3590_v39, 0.0  ;;  %v6701_v39 = vld [vmem:[#allocation31_spill] sm:$0xff] }
 0x4d5   : > { %v3620_v63 = vmax.f32 %v3588_v51, 0.0  ;;  %v3650_v37 = vadd.f32 %v3649_v17, %v3619_v61  ;;  %v3589_v14 = vadd.f32 %v3557_v48, %v6688_v38  ;;  %v4591_v30 = vpop.f32.mrb[180].mxu1  ;;  %v6699_v51 = vld [vmem:[#allocation32_spill] sm:$0xff] }
 0x4d6   : > { %v3523_v36 = vmul.f32 %v4591_v30, %v6345_v6  ;;  %v3459_v12 = vpop.f32.mrb[181].mxu1  ;;  %v3623_v24 = vmax.f32 %v3591_v40, 0.0  ;;  %v6700_v13 = vmax.f32 %v6699_v51, 0.0 }
 0x4d7   : > { %v3651_v35 = vadd.f32 %v3650_v37, %v3620_v63  ;;  %v3621_v62 = vmax.f32 %v3589_v14, 0.0  ;;  %v3521_v34 = vmul.f32 %v6345_v6, %v3459_v12  ;;  %v4592_v52 = vpop.f32.mrb[182].mxu1  ;;  %v6702_v63 = vmax.f32 %v6701_v39, 0.0  ;;  %v6703_v14 = vld [vmem:[#allocation34_spill] sm:$0xff]  ;;  %v6705_v12 = vld [vmem:[#allocation33_spill] sm:$0xff] }
 0x4d8   : > { %v3562_v42 = vadd.f32 %v6350_v44, %v3523_v36  ;;  %v3524_v49 = vmul.f32 %v4592_v52, %v6345_v6  ;;  %v3462_v20 = vpop.f32.mrb[183].mxu1  ;;  %v6704_v30 = vmax.f32 %v6703_v14, 0.0 }
 0x4d9   : > { %v3652_v58 = vadd.f32 %v3651_v35, %v3621_v62  ;;  %v3560_v3 = vadd.f32 %v6350_v44, %v3521_v34  ;;  %v3522_v15 = vmul.f32 %v6345_v6, %v3462_v20  ;;  %v6706_v35 = vmax.f32 %v6705_v12, 0.0 }
 0x4da   : > { %v3563_v25 = vadd.f32 %v6350_v44, %v3524_v49  ;;  %v3594_v4 = vadd.f32 %v3562_v42, %v6694_v60 }
 0x4db   : > { %v3653_v9 = vadd.f32 %v3652_v58, %v3622_v33  ;;  %v3592_v10 = vadd.f32 %v3560_v3, %v6692_v0  ;;  %v3561_v7 = vadd.f32 %v6350_v44, %v3522_v15 }
 0x4dc   : > { %v3595_v55 = vadd.f32 %v3563_v25, %v6698_v53  ;;  %v3626_v18 = vmax.f32 %v3594_v4, 0.0 }
 0x4dd   : > { %v3624_v23 = vmax.f32 %v3592_v10, 0.0  ;;  %v3654_v32 = vadd.f32 %v3653_v9, %v3623_v24  ;;  %v3593_v47 = vadd.f32 %v3561_v7, %v6696_v21  ;;  %v4595_v26 = vpop.f32.mrb[184].mxu1 }
 0x4de   : > { %v3527_v22 = vmul.f32 %v4595_v26, %v6345_v6  ;;  %v3475_v57 = vpop.f32.mrb[185].mxu1  ;;  %v3627_v19 = vmax.f32 %v3595_v55, 0.0 }
 0x4df   : > { %v3655_v54 = vadd.f32 %v3654_v32, %v3624_v23  ;;  %v3625_v29 = vmax.f32 %v3593_v47, 0.0  ;;  %v3525_v50 = vmul.f32 %v6345_v6, %v3475_v57  ;;  %v4596_v56 = vpop.f32.mrb[186].mxu1 }
 0x4e0   : > { %v3528_v31 = vmul.f32 %v4596_v56, %v6345_v6  ;;  %v3478_v59 = vpop.f32.mrb[187].mxu1  ;;  %v3566_v27 = vadd.f32 %v6350_v44, %v3527_v22 }
 0x4e1   : > { %v3656_v46 = vadd.f32 %v3655_v54, %v3625_v29  ;;  %v3564_v61 = vadd.f32 %v6350_v44, %v3525_v50  ;;  %v3526_v17 = vmul.f32 %v6345_v6, %v3478_v59 }
 0x4e2   : > { %v3567_v8 = vadd.f32 %v6350_v44, %v3528_v31  ;;  %v3598_v37 = vadd.f32 %v3566_v27, %v6702_v63 }
 0x4e3   : > { %v3657_v28 = vadd.f32 %v3656_v46, %v3626_v18  ;;  %v3596_v48 = vadd.f32 %v3564_v61, %v6700_v13  ;;  %v3565_v41 = vadd.f32 %v6350_v44, %v3526_v17 }
 0x4e4   : > { %v3599_v11 = vadd.f32 %v3567_v8, %v6706_v35  ;;  %v3630_v40 = vmax.f32 %v3598_v37, 0.0 }
 0x4e5   : > { %v3628_v5 = vmax.f32 %v3596_v48, 0.0  ;;  %v3658_v38 = vadd.f32 %v3657_v28, %v3627_v19  ;;  %v3597_v36 = vadd.f32 %v3565_v41, %v6704_v30 }
 0x4e6   : > { %v3631_v34 = vmax.f32 %v3599_v11, 0.0 }
 0x4e7   : > { %v3659_v6 = vadd.f32 %v3658_v38, %v3628_v5  ;;  %v3629_v1 = vmax.f32 %v3597_v36, 0.0 }
 0x4e9   : > { %v3660_v62 = vadd.f32 %v3659_v6, %v3629_v1 }
 0x4eb   : > { %v3661_v52 = vadd.f32 %v3660_v62, %v3630_v40 }
 0x4ed   : > { %v3662_v42 = vadd.f32 %v3661_v52, %v3631_v34 }
 0x4ef   : > { %v3663_v44 = vrot.slane %v3662_v42, 4 }
 0x4f1   : > { %v3664_v49 = vadd.f32 %v3663_v44, %v3662_v42 }
 0x4f3   : > { %v3665_v20 = vrot.slane %v3664_v49, 2 }
 0x4f5   : > { %v3666_v33 = vadd.f32 %v3665_v20, %v3664_v49 }
 0x4f7   : > { %v3667_v58 = vrot.slane %v3666_v33, 1 }
 0x4f9   : > { %v3668_v3 = vadd.f32 %v3667_v58, %v3666_v33 }
 0x4fb   : > { %v3669_v15 = vmul.f32 0.00390625, %v3668_v3 }
 0x4fd   : > { %3670 = vst [vmem:[%s432_s15] sm:$0x1] %v3669_v15 }
 0x4fe   : > { %4773 = shalt.err (!%p4770_p3)
}
 0x4ff   : > { %s4774_s24 = scalar_lea.hbm %s6485_s21, 16  ;;  %s4778_s1 = scalar_lea.hbm %s6540_s13, 32 }
 0x500   : > { %p4775_p4 = scmp.ne.s32.totalorder %s6485_s21, %s4774_s24  ;;  %p4779_p9 = scmp.lt.u32.totalorder %s6485_s21, %s6540_s13 }
 0x501   : > { %p4780_p10 = scmp.lt.u32.totalorder %s4778_s1, %s4774_s24  ;;  %p4782_p12 = scmp.lt.u32.totalorder %s4774_s24, %s6485_s21 }
 0x502   : > { %p4776_p7 = pnand %p4775_p4, %p4935_p5 }
 0x503   : > { %p4781_p11 = por %p4780_p10, %p4779_p9 }
 0x504   : > { %p4777_p8 = pneg %p4776_p7 }
 0x505   : > { %p4783_p13 = por %p4782_p12, %p4781_p11 }
 0x507   : > { %p4784_p0 = pnand %p4783_p13, %p4777_p8 }
 0x509   : > { %4787 = shalt.err (!%p4784_p0)
}
 0x50a   : > { %4613 = dma.vmem_to_hbm [thread:$0]  (%p4935_p5), %s6487_s16, 16, %s6485_s21, %s3672_s0  }
 0x50b PF: > { %p4619_p1 = scmp.ge.s32.totalorder %s4822_s28, 2  ;;  %s3696_s2 = sand.u32 1, %s4810_s25  }
 0x50c   : > { %s3697_s22 = scalar_lea.sflag [#allocation3], %s3696_s2 }
 0x50d   : > { %p4616_p2 = pnand %p4619_p1, %p4939_p6 }
 0x50f   : > { %4805 = dma.done.wait (!%p4616_p2), %s3697_s22, 16  }
 0x510   : > { %4807 = vsyncadd (!%p4616_p2), %s3697_s22, 4294967280  ;;  %p23_p3 = scmp.ge.s32.totalorder %s4922_s14, 4   ;;  %s6707_s25 = smov %s4814_s26 }
 0x511   : > { %s6708_s26 = smov %s4818_s27  ;;  %s6709_s27 = smov %s4933_s17 }
 0x512   : > { %s6710_s28 = smov %s4922_s14  ;;  %25 = sbr.rel (!%p23_p3) target bundleno = 7 (0x7), region = 107 }
 0x519   :  { %3701 = vsyncpa [#allocation3], 1 }
 0x51a   :  { %3703 = vsyncpa [#allocation3 + $0x1], 1 }

</bundles_post_ra>
